<compile_context>
chip_gen: v7x
topology: tpu7x:2x2x1
jax: 0.10.0
libtpu: 0.0.40
codegen_flags: <defaults>
</compile_context>

<pallas_src>
import functools
import math

import jax
import jax.numpy as jnp
from jax.experimental import pallas as pl
from jax.experimental.pallas import tpu as pltpu


def _qconv_kernel(scale_ref, x_ref, w_ref, b_ref, o_ref, xpad_ref, *,
                  a_bit, act_lo, act_hi, inv_s_a,
                  Nb, KH, KW, H, W, ph, pw, OH, OW, Cin, tap_loop):
    # scale_ref: (1, 1) f32 SMEM         -- combined post-scale s_a * s_w
    # x_ref:     (Nb, H, W, Cin) f32     -- unpadded NHWC activations
    # w_ref:     (CoutT, KH*KW*Cin)      -- pre-quantized weight INTEGER levels
    # b_ref:     (CoutT, 1) f32          -- bias (unquantized, per module semantics)
    # o_ref:     (Nb, CoutT, OH*OW)      -- lane-dense NCHW-flat output
    # xpad_ref:  (Nb, Hp, Wp, Cin)       -- VMEM scratch (MXU dtype), fused zero pad
    M = OH * OW

    # ---- fused zero padding + activation fake-quant -> integer levels ----
    if ph > 0 or pw > 0:
        xpad_ref[...] = jnp.zeros_like(xpad_ref)
    x = x_ref[...]                                           # (Nb, H, W, Cin) f32
    if a_bit > 0:
        xq = jnp.round(jnp.clip(x, act_lo, act_hi) * inv_s_a)
    else:
        xq = x
    # cast to MXU dtype immediately: all im2col copies below run at this width
    xpad_ref[:, ph:ph + H, pw:pw + W, :] = xq.astype(xpad_ref.dtype)

    scale = scale_ref[0, 0]
    bias = b_ref[...]                                        # (CoutT, 1)
    wm = w_ref[...]                                          # (CoutT, KH*KW*Cin)

    for b in range(Nb):                                      # static unroll, Nb small
        xb = xpad_ref[b]                                     # (Hp, Wp, Cin)
        if tap_loop:
            # production path: never materialize the full im2col patch
            acc = jnp.zeros((wm.shape[0], M), jnp.float32)
            for kh in range(KH):                             # stride=1, dilation=1
                for kw in range(KW):
                    t = kh * KW + kw
                    tap = xb[kh:kh + OH, kw:kw + OW, :].reshape(M, Cin)
                    acc = acc + jax.lax.dot_general(
                        wm[:, t * Cin:(t + 1) * Cin], tap,
                        (((1,), (1,)), ((), ())),
                        preferred_element_type=jnp.float32)  # (CoutT, M)
        else:
            # tiny-Cin path: one (M, KH*KW*Cin) patch, single MXU contraction
            cols = [xb[kh:kh + OH, kw:kw + OW, :].reshape(M, Cin)
                    for kh in range(KH) for kw in range(KW)]
            patch = jnp.concatenate(cols, axis=1)            # (M, K), MXU dtype
            acc = jax.lax.dot_general(                       # (CoutT, M), no transpose
                wm, patch, (((1,), (1,)), ((), ())),
                preferred_element_type=jnp.float32)
        # one scalar rescale + bias on the small output tile; lane-dense store
        o_ref[b] = (acc * scale + bias).astype(o_ref.dtype)


def qconv2d_forward(x_nchw, weight_oihw, bias=None, *, stride=1, padding=0,
                    dilation=1, groups=1, w_bit=8, a_bit=8,
                    act_range=6.0, half_wave=True):
    assert stride == 1 and dilation == 1 and groups == 1, \
        "TODO(synk): only stride=1, dilation=1, groups=1 supported in kernel"
    N, Cin, H, W = x_nchw.shape
    Cout, _, KH, KW = weight_oihw.shape
    ph = pw = int(padding)
    Hp, Wp = H + 2 * ph, W + 2 * pw
    OH, OW = Hp - KH + 1, Wp - KW + 1
    M = OH * OW
    if bias is None:
        bias = jnp.zeros((Cout,), jnp.float32)

    # ---- activation quant constants (compile-time Python floats) ----
    eff_a_bit = a_bit if half_wave else a_bit - 1            # QModule._a_bit
    if a_bit > 0:
        s_a = act_range / (2.0 ** eff_a_bit - 1.0)
        inv_s_a = 1.0 / s_a
        act_lo, act_hi = (0.0, act_range) if half_wave else (-act_range, act_range)
    else:
        s_a, inv_s_a, act_lo, act_hi = 1.0, 1.0, 0.0, 0.0

    # ---- weight fake-quant, hoisted out of the kernel (done ONCE; the max|W|
    # reduction stays GLOBAL even though Cout is tiled below) ----
    w_okkc = jnp.transpose(weight_oihw, (0, 2, 3, 1))        # OIHW -> (O, KH, KW, I)
    if w_bit > 0:
        th = jnp.max(jnp.abs(w_okkc))
        s_w = th / (2.0 ** (w_bit - 1) - 1.0)
        wq = jnp.round(jnp.clip(w_okkc, -th, th) / s_w)      # integer levels
    else:
        s_w = jnp.float32(1.0)
        wq = w_okkc
    w_mat = wq.reshape(Cout, KH * KW * Cin)                  # tap order (kh, kw, ci)

    # integer levels (<=255 / <=127) are exact in bf16 -> bf16 MXU feed,
    # one scalar (s_a*s_w) rescale on the output tile.
    quant_exact = (a_bit > 0) and (w_bit > 0)
    mxu_dtype = jnp.bfloat16 if quant_exact else jnp.float32
    w_mat = w_mat.astype(mxu_dtype)

    post_scale = (jnp.float32(s_a) * jnp.asarray(s_w, jnp.float32)).reshape(1, 1)
    b_col = bias.astype(jnp.float32).reshape(Cout, 1)

    # ---- layout: NCHW -> NHWC (zero padding is fused into the kernel; 0 is a
    # fixed point of the activation fake-quant, so this stays equivalent) ----
    x = jnp.transpose(x_nchw, (0, 2, 3, 1))

    # ---- blocking: fold Nb batch elems / step, tile Cout, keep blocks small ----
    esz = 2 if mxu_dtype == jnp.bfloat16 else 4
    patch_bytes = (M * KH * KW * Cin * esz) if Cin < 128 else (M * Cin * esz)
    per_elem = (H * W * Cin * 4          # x block (f32)
                + Hp * Wp * Cin * esz    # padded scratch
                + Cout * M * 4           # output tile (f32)
                + patch_bytes)           # im2col temporaries
    budget = 8 * 1024 * 1024             # stays under every generation's scoped default
    Nb = 1
    for cand in range(min(N, 8), 0, -1):
        if N % cand == 0 and 2 * cand * per_elem <= budget:
            Nb = cand
            break

    ct = Cout if (Cout <= 256 or Cout % 256 != 0) else 256   # Cout tile
    n_ct = Cout // ct
    tap_loop = Cin >= 128

    kern = functools.partial(
        _qconv_kernel, a_bit=a_bit, act_lo=act_lo, act_hi=act_hi,
        inv_s_a=inv_s_a, Nb=Nb, KH=KH, KW=KW, H=H, W=W, ph=ph, pw=pw,
        OH=OH, OW=OW, Cin=Cin, tap_loop=tap_loop)

    out_flat = pl.pallas_call(
        kern,
        out_shape=jax.ShapeDtypeStruct((N, Cout, M), jnp.float32),
        grid=(N // Nb, n_ct),
        in_specs=[
            pl.BlockSpec(memory_space=pltpu.MemorySpace.SMEM),             # scale
            pl.BlockSpec((Nb, H, W, Cin), lambda nb, cj: (nb, 0, 0, 0)),   # x (unpadded)
            pl.BlockSpec((ct, KH * KW * Cin), lambda nb, cj: (cj, 0)),     # w levels
            pl.BlockSpec((ct, 1), lambda nb, cj: (cj, 0)),                 # bias
        ],
        out_specs=pl.BlockSpec((Nb, ct, M), lambda nb, cj: (nb, cj, 0)),
        scratch_shapes=[pltpu.VMEM((Nb, Hp, Wp, Cin), mxu_dtype)],
        compiler_params=pltpu.CompilerParams(
            dimension_semantics=("parallel", "parallel")),
    )(post_scale, x, w_mat, b_col)

    return out_flat.reshape(N, Cout, OH, OW)                 # already NCHW


def _reference_forward(x, W, b, padding, a_bit, w_bit, act_range):
    # plain-JAX reference of the same forward semantics (half_wave path)
    r = act_range
    ori = 0.5 * (jnp.abs(x) - jnp.abs(x - r) + r)             # == clamp(x, 0, r)
    s_a = r / (2.0 ** a_bit - 1.0)
    xq = jnp.round(ori / s_a) * s_a
    th = jnp.max(jnp.abs(W))
    s_w = th / (2.0 ** (w_bit - 1) - 1.0)
    wq = jnp.round(jnp.clip(W, -th, th) / s_w) * s_w
    out = jax.lax.conv_general_dilated(
        xq, wq, window_strides=(1, 1),
        padding=[(padding, padding), (padding, padding)],
        dimension_numbers=("NCHW", "OIHW", "NCHW"),
        precision=jax.lax.Precision.HIGHEST)
    return out + b[None, :, None, None]


if __name__ == "__main__":
    # QConv2d(in_channels=4, out_channels=8, kernel_size=3, padding=1,
    #         bias=True, w_bit=8, a_bit=8, half_wave=True)
    N, Cin, H, W = 2, 4, 16, 16
    Cout, KH, KW = 8, 3, 3
    padding = 1
    w_bit, a_bit = 8, 8
    act_range = 6.0          # QModule.init_range default

    key = jax.random.PRNGKey(0)
    kx, kw, kb = jax.random.split(key, 3)

    # reset_parameters(): kaiming_uniform_(a=sqrt(5)) -> U(-1/sqrt(fan_in), 1/sqrt(fan_in))
    fan_in = Cin * KH * KW
    bound = 1.0 / math.sqrt(fan_in)
    weight = jax.random.uniform(kw, (Cout, Cin, KH, KW), jnp.float32,
                                minval=-bound, maxval=bound)
    bias = jax.random.uniform(kb, (Cout,), jnp.float32,
                              minval=-bound, maxval=bound)
    x = jax.random.normal(kx, (N, Cin, H, W), jnp.float32) * 2.0

    out = qconv2d_forward(x, weight, bias, stride=1, padding=padding,
                          w_bit=w_bit, a_bit=a_bit, act_range=act_range,
                          half_wave=True)
    out = jax.block_until_ready(out)

    ref = _reference_forward(x, weight, bias, padding, a_bit, w_bit, act_range)
    ref = jax.block_until_ready(ref)

    assert out.shape == (N, Cout, H, W), out.shape
    assert jnp.allclose(out, ref, rtol=1e-4, atol=1e-4), \
        float(jnp.max(jnp.abs(out - ref)))
    print("KERNEL_OK")
</pallas_src>

<mosaic_0001>
module attributes {stable_mosaic.version = 11 : i64} {
  func.func @_qconv_kernel(%arg0: i32, %arg1: i32, %arg2: memref<1x1xf32, #tpu.memory_space<smem>>, %arg3: memref<2x16x16x4xf32, #tpu.memory_space<vmem>>, %arg4: memref<8x36xbf16, #tpu.memory_space<vmem>>, %arg5: memref<8x1xf32, #tpu.memory_space<vmem>>, %arg6: memref<2x8x256xf32, #tpu.memory_space<vmem>>, %arg7: memref<2x18x18x4xbf16, #tpu.memory_space<vmem>>) attributes {dimension_semantics = [#tpu.dimension_semantics<parallel>, #tpu.dimension_semantics<parallel>], iteration_bounds = array<i64: 1, 1>, scalar_prefetch = 0 : i64, scratch_operands = 1 : i64, tpu.core_type = #tpu.core_type<tc>, window_params = [{transform_indices = @transform_0, window_bounds = array<i64: 1, 1>}, {transform_indices = @transform_1, window_bounds = array<i64: 2, 16, 16, 4>}, {transform_indices = @transform_2, window_bounds = array<i64: 8, 36>}, {transform_indices = @transform_3, window_bounds = array<i64: 8, 1>}, {transform_indices = @transform_4, window_bounds = array<i64: 2, 8, 256>}]} {
    %cst = arith.constant 0.000000e+00 : bf16
    %0 = vector.broadcast %cst : bf16 to vector<2x18x18x4xbf16>
    %c0 = arith.constant 0 : index
    %c0_0 = arith.constant 0 : index
    %c0_1 = arith.constant 0 : index
    %c0_2 = arith.constant 0 : index
    %1 = vector.load %arg7[%c0, %c0_0, %c0_1, %c0_2] : memref<2x18x18x4xbf16, #tpu.memory_space<vmem>>, vector<2x18x18x4xbf16>
    tpu.vector_store %arg7[%c0, %c0_0, %c0_1, %c0_2], %0 {strides = array<i32>} : memref<2x18x18x4xbf16, #tpu.memory_space<vmem>>, vector<2x18x18x4xbf16>,
    %c0_3 = arith.constant 0 : index
    %c0_4 = arith.constant 0 : index
    %c0_5 = arith.constant 0 : index
    %c0_6 = arith.constant 0 : index
    %2 = vector.load %arg3[%c0_3, %c0_4, %c0_5, %c0_6] : memref<2x16x16x4xf32, #tpu.memory_space<vmem>>, vector<2x16x16x4xf32>
    %cst_7 = arith.constant 0.000000e+00 : f32
    %cst_8 = arith.constant 6.000000e+00 : f32
    %3 = vector.broadcast %cst_7 : f32 to vector<2x16x16x4xf32>
    %4 = arith.maximumf %3, %2 : vector<2x16x16x4xf32>
    %5 = vector.broadcast %cst_8 : f32 to vector<2x16x16x4xf32>
    %6 = arith.minimumf %5, %4 : vector<2x16x16x4xf32>
    %cst_9 = arith.constant 4.250000e+01 : f32
    %7 = vector.broadcast %cst_9 : f32 to vector<2x16x16x4xf32>
    %8 = arith.mulf %6, %7 : vector<2x16x16x4xf32>
    %9 = math.roundeven %8 : vector<2x16x16x4xf32>
    %10 = arith.truncf %9 : vector<2x16x16x4xf32> to vector<2x16x16x4xbf16>
    %c0_10 = arith.constant 0 : index
    %c1 = arith.constant 1 : index
    %c1_11 = arith.constant 1 : index
    %c0_12 = arith.constant 0 : index
    %11 = vector.load %arg7[%c0_10, %c1, %c1_11, %c0_12] : memref<2x18x18x4xbf16, #tpu.memory_space<vmem>>, vector<2x16x16x4xbf16>
    tpu.vector_store %arg7[%c0_10, %c1, %c1_11, %c0_12], %10 {strides = array<i32>} : memref<2x18x18x4xbf16, #tpu.memory_space<vmem>>, vector<2x16x16x4xbf16>,
    %c0_13 = arith.constant 0 : index
    %c0_14 = arith.constant 0 : index
    %12 = memref.load %arg2[%c0_13, %c0_14] : memref<1x1xf32, #tpu.memory_space<smem>>
    %c0_15 = arith.constant 0 : index
    %c0_16 = arith.constant 0 : index
    %13 = vector.load %arg5[%c0_15, %c0_16] : memref<8x1xf32, #tpu.memory_space<vmem>>, vector<8x1xf32>
    %c0_17 = arith.constant 0 : index
    %c0_18 = arith.constant 0 : index
    %14 = vector.load %arg4[%c0_17, %c0_18] : memref<8x36xbf16, #tpu.memory_space<vmem>>, vector<8x36xbf16>
    %c0_19 = arith.constant 0 : index
    %c0_20 = arith.constant 0 : index
    %c0_21 = arith.constant 0 : index
    %c0_22 = arith.constant 0 : index
    %15 = vector.load %arg7[%c0_19, %c0_20, %c0_21, %c0_22] : memref<2x18x18x4xbf16, #tpu.memory_space<vmem>>, vector<1x18x18x4xbf16>
    %16 = vector.shape_cast %15 : vector<1x18x18x4xbf16> to vector<18x18x4xbf16>
    %17 = vector.extract_strided_slice %16 {offsets = [0, 0, 0], sizes = [16, 16, 4], strides = [1, 1, 1]} : vector<18x18x4xbf16> to vector<16x16x4xbf16>
    %18 = vector.shape_cast %17 : vector<16x16x4xbf16> to vector<256x4xbf16>
    %19 = vector.extract_strided_slice %16 {offsets = [0, 1, 0], sizes = [16, 16, 4], strides = [1, 1, 1]} : vector<18x18x4xbf16> to vector<16x16x4xbf16>
    %20 = vector.shape_cast %19 : vector<16x16x4xbf16> to vector<256x4xbf16>
    %21 = vector.extract_strided_slice %16 {offsets = [0, 2, 0], sizes = [16, 16, 4], strides = [1, 1, 1]} : vector<18x18x4xbf16> to vector<16x16x4xbf16>
    %22 = vector.shape_cast %21 : vector<16x16x4xbf16> to vector<256x4xbf16>
    %23 = vector.extract_strided_slice %16 {offsets = [1, 0, 0], sizes = [16, 16, 4], strides = [1, 1, 1]} : vector<18x18x4xbf16> to vector<16x16x4xbf16>
    %24 = vector.shape_cast %23 : vector<16x16x4xbf16> to vector<256x4xbf16>
    %25 = vector.extract_strided_slice %16 {offsets = [1, 1, 0], sizes = [16, 16, 4], strides = [1, 1, 1]} : vector<18x18x4xbf16> to vector<16x16x4xbf16>
    %26 = vector.shape_cast %25 : vector<16x16x4xbf16> to vector<256x4xbf16>
    %27 = vector.extract_strided_slice %16 {offsets = [1, 2, 0], sizes = [16, 16, 4], strides = [1, 1, 1]} : vector<18x18x4xbf16> to vector<16x16x4xbf16>
    %28 = vector.shape_cast %27 : vector<16x16x4xbf16> to vector<256x4xbf16>
    %29 = vector.extract_strided_slice %16 {offsets = [2, 0, 0], sizes = [16, 16, 4], strides = [1, 1, 1]} : vector<18x18x4xbf16> to vector<16x16x4xbf16>
    %30 = vector.shape_cast %29 : vector<16x16x4xbf16> to vector<256x4xbf16>
    %31 = vector.extract_strided_slice %16 {offsets = [2, 1, 0], sizes = [16, 16, 4], strides = [1, 1, 1]} : vector<18x18x4xbf16> to vector<16x16x4xbf16>
    %32 = vector.shape_cast %31 : vector<16x16x4xbf16> to vector<256x4xbf16>
    %33 = vector.extract_strided_slice %16 {offsets = [2, 2, 0], sizes = [16, 16, 4], strides = [1, 1, 1]} : vector<18x18x4xbf16> to vector<16x16x4xbf16>
    %34 = vector.shape_cast %33 : vector<16x16x4xbf16> to vector<256x4xbf16>
    %35 = tpu.concatenate %18, %20, %22, %24, %26, %28, %30, %32, %34 in 1 : vector<256x4xbf16>, vector<256x4xbf16>, vector<256x4xbf16>, vector<256x4xbf16>, vector<256x4xbf16>, vector<256x4xbf16>, vector<256x4xbf16>, vector<256x4xbf16>, vector<256x4xbf16> -> vector<256x36xbf16>
    %cst_23 = arith.constant dense<0.000000e+00> : vector<8x256xf32>
    %36 = tpu.matmul %14, %35, %cst_23 {dimension_numbers = #tpu.dot_dimension_numbers<[1], [1], [0], [0], [0, 0, 1, 0], [], []>} : vector<8x36xbf16>, vector<256x36xbf16>, vector<8x256xf32> -> vector<8x256xf32>
    %37 = vector.broadcast %12 : f32 to vector<8x256xf32>
    %38 = arith.mulf %36, %37 : vector<8x256xf32>
    %39 = vector.broadcast %13 : vector<8x1xf32> to vector<8x256xf32>
    %40 = arith.addf %38, %39 : vector<8x256xf32>
    %c0_24 = arith.constant 0 : index
    %c0_25 = arith.constant 0 : index
    %c0_26 = arith.constant 0 : index
    %41 = vector.load %arg6[%c0_24, %c0_25, %c0_26] : memref<2x8x256xf32, #tpu.memory_space<vmem>>, vector<1x8x256xf32>
    %42 = vector.shape_cast %41 : vector<1x8x256xf32> to vector<8x256xf32>
    %43 = vector.shape_cast %40 : vector<8x256xf32> to vector<1x8x256xf32>
    tpu.vector_store %arg6[%c0_24, %c0_25, %c0_26], %43 {strides = array<i32>} : memref<2x8x256xf32, #tpu.memory_space<vmem>>, vector<1x8x256xf32>,
    %c1_27 = arith.constant 1 : index
    %c0_28 = arith.constant 0 : index
    %c0_29 = arith.constant 0 : index
    %c0_30 = arith.constant 0 : index
    %44 = vector.load %arg7[%c1_27, %c0_28, %c0_29, %c0_30] : memref<2x18x18x4xbf16, #tpu.memory_space<vmem>>, vector<1x18x18x4xbf16>
    %45 = vector.shape_cast %44 : vector<1x18x18x4xbf16> to vector<18x18x4xbf16>
    %46 = vector.extract_strided_slice %45 {offsets = [0, 0, 0], sizes = [16, 16, 4], strides = [1, 1, 1]} : vector<18x18x4xbf16> to vector<16x16x4xbf16>
    %47 = vector.shape_cast %46 : vector<16x16x4xbf16> to vector<256x4xbf16>
    %48 = vector.extract_strided_slice %45 {offsets = [0, 1, 0], sizes = [16, 16, 4], strides = [1, 1, 1]} : vector<18x18x4xbf16> to vector<16x16x4xbf16>
    %49 = vector.shape_cast %48 : vector<16x16x4xbf16> to vector<256x4xbf16>
    %50 = vector.extract_strided_slice %45 {offsets = [0, 2, 0], sizes = [16, 16, 4], strides = [1, 1, 1]} : vector<18x18x4xbf16> to vector<16x16x4xbf16>
    %51 = vector.shape_cast %50 : vector<16x16x4xbf16> to vector<256x4xbf16>
    %52 = vector.extract_strided_slice %45 {offsets = [1, 0, 0], sizes = [16, 16, 4], strides = [1, 1, 1]} : vector<18x18x4xbf16> to vector<16x16x4xbf16>
    %53 = vector.shape_cast %52 : vector<16x16x4xbf16> to vector<256x4xbf16>
    %54 = vector.extract_strided_slice %45 {offsets = [1, 1, 0], sizes = [16, 16, 4], strides = [1, 1, 1]} : vector<18x18x4xbf16> to vector<16x16x4xbf16>
    %55 = vector.shape_cast %54 : vector<16x16x4xbf16> to vector<256x4xbf16>
    %56 = vector.extract_strided_slice %45 {offsets = [1, 2, 0], sizes = [16, 16, 4], strides = [1, 1, 1]} : vector<18x18x4xbf16> to vector<16x16x4xbf16>
    %57 = vector.shape_cast %56 : vector<16x16x4xbf16> to vector<256x4xbf16>
    %58 = vector.extract_strided_slice %45 {offsets = [2, 0, 0], sizes = [16, 16, 4], strides = [1, 1, 1]} : vector<18x18x4xbf16> to vector<16x16x4xbf16>
    %59 = vector.shape_cast %58 : vector<16x16x4xbf16> to vector<256x4xbf16>
    %60 = vector.extract_strided_slice %45 {offsets = [2, 1, 0], sizes = [16, 16, 4], strides = [1, 1, 1]} : vector<18x18x4xbf16> to vector<16x16x4xbf16>
    %61 = vector.shape_cast %60 : vector<16x16x4xbf16> to vector<256x4xbf16>
    %62 = vector.extract_strided_slice %45 {offsets = [2, 2, 0], sizes = [16, 16, 4], strides = [1, 1, 1]} : vector<18x18x4xbf16> to vector<16x16x4xbf16>
    %63 = vector.shape_cast %62 : vector<16x16x4xbf16> to vector<256x4xbf16>
    %64 = tpu.concatenate %47, %49, %51, %53, %55, %57, %59, %61, %63 in 1 : vector<256x4xbf16>, vector<256x4xbf16>, vector<256x4xbf16>, vector<256x4xbf16>, vector<256x4xbf16>, vector<256x4xbf16>, vector<256x4xbf16>, vector<256x4xbf16>, vector<256x4xbf16> -> vector<256x36xbf16>
    %cst_31 = arith.constant dense<0.000000e+00> : vector<8x256xf32>
    %65 = tpu.matmul %14, %64, %cst_31 {dimension_numbers = #tpu.dot_dimension_numbers<[1], [1], [0], [0], [0, 0, 1, 0], [], []>} : vector<8x36xbf16>, vector<256x36xbf16>, vector<8x256xf32> -> vector<8x256xf32>
    %66 = vector.broadcast %12 : f32 to vector<8x256xf32>
    %67 = arith.mulf %65, %66 : vector<8x256xf32>
    %68 = vector.broadcast %13 : vector<8x1xf32> to vector<8x256xf32>
    %69 = arith.addf %67, %68 : vector<8x256xf32>
    %c1_32 = arith.constant 1 : index
    %c0_33 = arith.constant 0 : index
    %c0_34 = arith.constant 0 : index
    %70 = vector.load %arg6[%c1_32, %c0_33, %c0_34] : memref<2x8x256xf32, #tpu.memory_space<vmem>>, vector<1x8x256xf32>
    %71 = vector.shape_cast %70 : vector<1x8x256xf32> to vector<8x256xf32>
    %72 = vector.shape_cast %69 : vector<8x256xf32> to vector<1x8x256xf32>
    tpu.vector_store %arg6[%c1_32, %c0_33, %c0_34], %72 {strides = array<i32>} : memref<2x8x256xf32, #tpu.memory_space<vmem>>, vector<1x8x256xf32>,
    return
  }
  func.func @transform_0(%arg0: i32, %arg1: i32) -> (i32, i32) {
    %c0_i32 = arith.constant 0 : i32
    %c0_i32_0 = arith.constant 0 : i32
    %c0_i32_1 = arith.constant 0 : i32
    return %c0_i32, %c0_i32_0 : i32, i32
  }
  func.func @transform_1(%arg0: i32, %arg1: i32) -> (i32, i32, i32, i32) {
    %c0_i32 = arith.constant 0 : i32
    %c0_i32_0 = arith.constant 0 : i32
    %c0_i32_1 = arith.constant 0 : i32
    %c0_i32_2 = arith.constant 0 : i32
    return %arg0, %c0_i32, %c0_i32_0, %c0_i32_1 : i32, i32, i32, i32
  }
  func.func @transform_2(%arg0: i32, %arg1: i32) -> (i32, i32) {
    %c0_i32 = arith.constant 0 : i32
    %c0_i32_0 = arith.constant 0 : i32
    return %arg1, %c0_i32 : i32, i32
  }
  func.func @transform_3(%arg0: i32, %arg1: i32) -> (i32, i32) {
    %c0_i32 = arith.constant 0 : i32
    %c0_i32_0 = arith.constant 0 : i32
    return %arg1, %c0_i32 : i32, i32
  }
  func.func @transform_4(%arg0: i32, %arg1: i32) -> (i32, i32, i32) {
    %c0_i32 = arith.constant 0 : i32
    %c0_i32_0 = arith.constant 0 : i32
    return %arg0, %arg1, %c0_i32 : i32, i32, i32
  }
}

</mosaic_0001>

<bundles_post_ra>
// kernel: tpu_custom_call.1
= control target key start
LH: loop header
LB: loop body
LE: loop exit
PB: predicated region body
PF: predicated region fallthrough
CT: control target
= control target key end

     0   :  { %vm20_vm0 = vcmask 27648   ;;  %vm23_vm1 = vcmask 24576   ;;  %v4897_v0 = vmov 0   ;;  %vm2007_vm2 = vcmask 1042432   ;;  %s4898_s5 = smov 8   ;;  %s4899_s8 = smov 4   ;;  %s7963_s0 = inlined_call_operand.<no memory space> [shape: f32[1,1], index: 0, kind: input, shape index: {}]   ;;  %s7964_s1 = inlined_call_operand.vmem [shape: f32[2,16,16,4], index: 1, kind: input, shape index: {}]   ;;  %s7965_s2 = inlined_call_operand.vmem [shape: bf16[8,36], index: 2, kind: input, shape index: {}]   ;;  %s7966_s3 = inlined_call_operand.vmem [shape: f32[8,1], index: 3, kind: input, shape index: {}]   ;;  %s7967_s4 = inlined_call_operand.hbm [shape: f32[2,8,256], index: 4, kind: output, shape index: {}]  }
   0x1   :  { %21 = vst.msk [vmem:[#allocation2] sm:$0xf] %vm20_vm0, %v4897_v0  ;;  %22 = vst.msk [vmem:[#allocation2 + $0x4] sm:$0xf] %vm20_vm0, %v4897_v0  ;;  %v130_v1 = vld [vmem:[%s7964_s1] sm:$0xff]  ;;  %4831 = vset.pattern.permute.xlu0 %v4897_v0  ;;  %v131_v2 = vld [vmem:[%s7964_s1 + $0x8] sm:$0xff] }
   0x2   :  { %24 = vst.msk [vmem:[#allocation2 + $0x8] sm:$0x1] %vm23_vm1, %v4897_v0  ;;  %27 = vst.msk [vmem:[#allocation2 + $0x14] sm:$0x1] %vm23_vm1, %v4897_v0  ;;  %v194_v3 = vmax.f32 %v130_v1, 0.0  ;;  %v195_v4 = vmax.f32 %v131_v2, 0.0 }
   0x3   :  { %25 = vst.msk [vmem:[#allocation2 + $0xc] sm:$0xf] %vm20_vm0, %v4897_v0  ;;  %26 = vst.msk [vmem:[#allocation2 + $0x10] sm:$0xf] %vm20_vm0, %v4897_v0  ;;  %v132_v5 = vld [vmem:[%s7964_s1 + $0x10] sm:$0xff]  ;;  %v133_v6 = vld [vmem:[%s7964_s1 + $0x18] sm:$0xff] }
   0x4   :  { %28 = vst.msk [vmem:[#allocation2 + $0x18] sm:$0xf] %vm20_vm0, %v4897_v0  ;;  %29 = vst.msk [vmem:[#allocation2 + $0x1c] sm:$0xf] %vm20_vm0, %v4897_v0  ;;  %vm2008_vm3 = vcmask 1046532   ;;  %v258_v7 = vmin.f32 %v194_v3, 6.0 }
   0x5   :  { %30 = vst.msk [vmem:[#allocation2 + $0x20] sm:$0x1] %vm23_vm1, %v4897_v0  ;;  %33 = vst.msk [vmem:[#allocation2 + $0x2c] sm:$0x1] %vm23_vm1, %v4897_v0  ;;  %vm1572_vm4 = vsmask.f32 3328 }
   0x6   :  { %31 = vst.msk [vmem:[#allocation2 + $0x24] sm:$0xf] %vm20_vm0, %v4897_v0  ;;  %32 = vst.msk [vmem:[#allocation2 + $0x28] sm:$0xf] %vm20_vm0, %v4897_v0  ;;  %vm1573_vm5 = vsmask.f32 7440 }
   0x7   :  { %34 = vst.msk [vmem:[#allocation2 + $0x30] sm:$0xf] %vm20_vm0, %v4897_v0  ;;  %35 = vst.msk [vmem:[#allocation2 + $0x34] sm:$0xf] %vm20_vm0, %v4897_v0  ;;  %v196_v8 = vmax.f32 %v132_v5, 0.0  ;;  %v197_v9 = vmax.f32 %v133_v6, 0.0 }
   0x8   :  { %36 = vst.msk [vmem:[#allocation2 + $0x38] sm:$0x1] %vm23_vm1, %v4897_v0  ;;  %39 = vst.msk [vmem:[#allocation2 + $0x44] sm:$0x1] %vm23_vm1, %v4897_v0  ;;  %v134_v10 = vld [vmem:[%s7964_s1 + $0x20] sm:$0xff]  ;;  %v135_v11 = vld [vmem:[%s7964_s1 + $0x28] sm:$0xff] }
   0x9   :  { %37 = vst.msk [vmem:[#allocation2 + $0x3c] sm:$0xf] %vm20_vm0, %v4897_v0  ;;  %38 = vst.msk [vmem:[#allocation2 + $0x40] sm:$0xf] %vm20_vm0, %v4897_v0  ;;  %v259_v12 = vmin.f32 %v195_v4, 6.0  ;;  %v198_v13 = vmax.f32 %v134_v10, 0.0 }
   0xa   :  { %40 = vst.msk [vmem:[#allocation2 + $0x48] sm:$0xf] %vm20_vm0, %v4897_v0  ;;  %41 = vst.msk [vmem:[#allocation2 + $0x4c] sm:$0xf] %vm20_vm0, %v4897_v0  ;;  %v199_v14 = vmax.f32 %v135_v11, 0.0  ;;  %v5171_v15 = vld [vmem:[%s7964_s1 + $0x30] sm:$0xff] }
   0xb   :  { %42 = vst.msk [vmem:[#allocation2 + $0x50] sm:$0x1] %vm23_vm1, %v4897_v0  ;;  %45 = vst.msk [vmem:[#allocation2 + $0x5c] sm:$0x1] %vm23_vm1, %v4897_v0  ;;  %v5176_v16 = vld [vmem:[%s7964_s1 + $0x38] sm:$0xff]  ;;  %v322_v17 = vmul.f32 42.5, %v258_v7 }
   0xc   :  { %43 = vst.msk [vmem:[#allocation2 + $0x54] sm:$0xf] %vm20_vm0, %v4897_v0  ;;  %44 = vst.msk [vmem:[#allocation2 + $0x58] sm:$0xf] %vm20_vm0, %v4897_v0  ;;  %vm642_vm6 = vsmask.f32 256 }
   0xd   :  { %46 = vst.msk [vmem:[#allocation2 + $0x60] sm:$0xf] %vm20_vm0, %v4897_v0  ;;  %47 = vst.msk [vmem:[#allocation2 + $0x64] sm:$0xf] %vm20_vm0, %v4897_v0  ;;  %vm643_vm7 = vsmask.f32 4368  ;;  %v4756_v29 = vround.rtne.f32 %v322_v17 }
   0xe   :  { %48 = vst.msk [vmem:[#allocation2 + $0x68] sm:$0x1] %vm23_vm1, %v4897_v0  ;;  %51 = vst.msk [vmem:[#allocation2 + $0x74] sm:$0x1] %vm23_vm1, %v4897_v0  ;;  %v260_v18 = vmin.f32 %v196_v8, 6.0  ;;  %v261_v19 = vmin.f32 %v197_v9, 6.0 }
   0xf   :  { %49 = vst.msk [vmem:[#allocation2 + $0x6c] sm:$0xf] %vm20_vm0, %v4897_v0  ;;  %50 = vst.msk [vmem:[#allocation2 + $0x70] sm:$0xf] %vm20_vm0, %v4897_v0  ;;  %v200_v20 = vmax.f32 %v5171_v15, 0.0  ;;  %v323_v22 = vmul.f32 42.5, %v259_v12  ;;  %v4640_v47 = vpack.c.bf16 %v4756_v29, %v4756_v29 }
  0x10   :  { %52 = vst.msk [vmem:[#allocation2 + $0x78] sm:$0xf] %vm20_vm0, %v4897_v0  ;;  %53 = vst.msk [vmem:[#allocation2 + $0x7c] sm:$0xf] %vm20_vm0, %v4897_v0  ;;  %vm1287_vm9 = vsmask.f32 7938 }
  0x11   :  { %54 = vst.msk [vmem:[#allocation2 + $0x80] sm:$0x1] %vm23_vm1, %v4897_v0  ;;  %57 = vst.msk [vmem:[#allocation2 + $0x8c] sm:$0x1] %vm23_vm1, %v4897_v0  ;;  %v262_v23 = vmin.f32 %v198_v13, 6.0  ;;  %v263_v24 = vmin.f32 %v199_v14, 6.0  ;;  %v4757_v41 = vround.rtne.f32 %v323_v22 }
  0x12   :  { %55 = vst.msk [vmem:[#allocation2 + $0x84] sm:$0xf] %vm20_vm0, %v4897_v0  ;;  %56 = vst.msk [vmem:[#allocation2 + $0x88] sm:$0xf] %vm20_vm0, %v4897_v0  ;;  %v201_v25 = vmax.f32 %v5176_v16, 0.0  ;;  %v324_v49 = vmul.f32 42.5, %v260_v18 }
  0x13   :  { %58 = vst.msk [vmem:[#allocation2 + $0x90] sm:$0xf] %vm20_vm0, %v4897_v0  ;;  %59 = vst.msk [vmem:[#allocation2 + $0x94] sm:$0xf] %vm20_vm0, %v4897_v0  ;;  %v1518_v26 = vld [vmem:[#allocation2] sm:$0xf]  ;;  %v4641_v48 = vpack.c.bf16 %v4757_v41, %v4757_v41 }
  0x14   :  { %60 = vst.msk [vmem:[#allocation2 + $0x98] sm:$0x1] %vm23_vm1, %v4897_v0  ;;  %63 = vst.msk [vmem:[#allocation2 + $0xa4] sm:$0x1] %vm23_vm1, %v4897_v0  ;;  %v1519_v27 = vld [vmem:[#allocation2 + $0x4] sm:$0xf]  ;;  %v4758_v61 = vround.rtne.f32 %v324_v49 }
  0x15   :  { %61 = vst.msk [vmem:[#allocation2 + $0x9c] sm:$0xf] %vm20_vm0, %v4897_v0  ;;  %62 = vst.msk [vmem:[#allocation2 + $0xa0] sm:$0xf] %vm20_vm0, %v4897_v0  ;;  %v1520_v28 = vld [vmem:[#allocation2 + $0x8] sm:$0x1] }
  0x16   :  { %64 = vst.msk [vmem:[#allocation2 + $0xa8] sm:$0xf] %vm20_vm0, %v4897_v0  ;;  %65 = vst.msk [vmem:[#allocation2 + $0xac] sm:$0xf] %vm20_vm0, %v4897_v0  ;;  %v1595_v30 = vshll.u32 %v1520_v28, 16  ;;  %v4494_v31 = vrot.slane %v1518_v26, 9  ;;  %v4642_v8 = vpack.c.bf16 %v4758_v61, %v4758_v61 }
  0x17   :  { %66 = vst.msk [vmem:[#allocation2 + $0xb0] sm:$0x1] %vm23_vm1, %v4897_v0  ;;  %69 = vst.msk [vmem:[#allocation2 + $0xbc] sm:$0x1] %vm23_vm1, %v4897_v0  ;;  %v2012_v32 = vrot.slane %v1519_v27, 5  ;;  %v2015_v33 = vrot.slane %v1520_v28, 5 }
  0x18   :  { %67 = vst.msk [vmem:[#allocation2 + $0xb4] sm:$0xf] %vm20_vm0, %v4897_v0  ;;  %68 = vst.msk [vmem:[#allocation2 + $0xb8] sm:$0xf] %vm20_vm0, %v4897_v0  ;;  %v1576_v34 = vshrl.u32 %v1518_v26, 16  ;;  %v1579_v35 = vshll.u32 %v1518_v26, 16 }
  0x19   :  { %70 = vst.msk [vmem:[#allocation2 + $0xc0] sm:$0xf] %vm20_vm0, %v4897_v0  ;;  %71 = vst.msk [vmem:[#allocation2 + $0xc4] sm:$0xf] %vm20_vm0, %v4897_v0  ;;  %v1585_v36 = vshll.u32 %v1519_v27, 16  ;;  %v1589_v37 = vshrl.u32 %v1519_v27, 16 }
  0x1a   :  { %72 = vst.msk [vmem:[#allocation2 + $0xc8] sm:$0x1] %vm23_vm1, %v4897_v0  ;;  %75 = vst.msk [vmem:[#allocation2 + $0xd4] sm:$0x1] %vm23_vm1, %v4897_v0  ;;  %v2014_v39 = vrot.slane %v2012_v32, 4  ;;  %v1597_v40 = vrot.slane %v1595_v30, 5 }
  0x1b   :  { %73 = vst.msk [vmem:[#allocation2 + $0xcc] sm:$0xf] %vm20_vm0, %v4897_v0  ;;  %74 = vst.msk [vmem:[#allocation2 + $0xd0] sm:$0xf] %vm20_vm0, %v4897_v0  ;;  %v1578_v42 = vrot.slane %v1576_v34, 4  ;;  %v1581_v43 = vrot.slane %v1579_v35, 5 }
  0x1c   :  { %76 = vst.msk [vmem:[#allocation2 + $0xd8] sm:$0xf] %vm20_vm0, %v4897_v0  ;;  %77 = vst.msk [vmem:[#allocation2 + $0xdc] sm:$0xf] %vm20_vm0, %v4897_v0  ;;  %v1587_v44 = vrot.slane %v1585_v36, 5  ;;  %v1591_v45 = vrot.slane %v1589_v37, 4 }
  0x1d   :  { %78 = vst.msk [vmem:[#allocation2 + $0xe0] sm:$0x1] %vm23_vm1, %v4897_v0  ;;  %81 = vst.msk [vmem:[#allocation2 + $0xec] sm:$0x1] %vm23_vm1, %v4897_v0  ;;  %v1582_v51 = vor.u32 %v1581_v43, %v1578_v42  ;;  %v325_v53 = vmul.f32 42.5, %v261_v19  ;;  %v646_v55 = vshrl.u32 %v4640_v47, 16 }
  0x1e   :  { %79 = vst.msk [vmem:[#allocation2 + $0xe4] sm:$0xf] %vm20_vm0, %v4897_v0  ;;  %80 = vst.msk [vmem:[#allocation2 + $0xe8] sm:$0xf] %vm20_vm0, %v4897_v0  ;;  %v1592_v52 = vor.u32 %v1591_v45, %v1587_v44  ;;  %v649_v56 = vshll.u32 %v4640_v47, 16  ;;  %v654_v57 = vshrl.u32 %v4641_v48, 16 }
  0x1f   :  { %82 = vst.msk [vmem:[#allocation2 + $0xf0] sm:$0xf] %vm20_vm0, %v4897_v0  ;;  %83 = vst.msk [vmem:[#allocation2 + $0xf4] sm:$0xf] %vm20_vm0, %v4897_v0  ;;  %v657_v58 = vshll.u32 %v4641_v48, 16  ;;  %v1583_v59 = vrot.slane %v1582_v51, 4  ;;  %v4759_v62 = vround.rtne.f32 %v325_v53 }
  0x20   :  { %84 = vst.msk [vmem:[#allocation2 + $0xf8] sm:$0x1] %vm23_vm1, %v4897_v0  ;;  %87 = vst.msk [vmem:[#allocation2 + $0x104] sm:$0x1] %vm23_vm1, %v4897_v0  ;;  %v1593_v60 = vrot.slane %v1592_v52, 4  ;;  %v656_v1 = vrot.slane %v654_v57, 7 }
  0x21   :  { %85 = vst.msk [vmem:[#allocation2 + $0xfc] sm:$0xf] %vm20_vm0, %v4897_v0  ;;  %86 = vst.msk [vmem:[#allocation2 + $0x100] sm:$0xf] %vm20_vm0, %v4897_v0  ;;  %v326_v2 = vmul.f32 42.5, %v262_v23  ;;  %v327_v3 = vmul.f32 42.5, %v263_v24  ;;  %v4643_v9 = vpack.c.bf16 %v4759_v62, %v4759_v62 }
  0x22   :  { %88 = vst.msk [vmem:[#allocation2 + $0x108] sm:$0xf] %vm20_vm0, %v4897_v0  ;;  %89 = vst.msk [vmem:[#allocation2 + $0x10c] sm:$0xf] %vm20_vm0, %v4897_v0  ;;  %v1289_v7 = vld [vmem:[#allocation2 + $0xc] sm:$0xf]  ;;  %v659_v13 = vor.u32 %v657_v58, %v656_v1 }
  0x23   :  { %90 = vst.msk [vmem:[#allocation2 + $0x110] sm:$0x1] %vm23_vm1, %v4897_v0  ;;  %93 = vst.msk [vmem:[#allocation2 + $0x11c] sm:$0x1] %vm23_vm1, %v4897_v0  ;;  %v1295_v17 = vld [vmem:[#allocation2 + $0x14] sm:$0x1]  ;;  %v4760_v29 = vround.rtne.f32 %v326_v2  ;;  %v4761_v34 = vround.rtne.f32 %v327_v3 }
  0x24   :  { %91 = vst.msk [vmem:[#allocation2 + $0x114] sm:$0xf] %vm20_vm0, %v4897_v0  ;;  %92 = vst.msk [vmem:[#allocation2 + $0x118] sm:$0xf] %vm20_vm0, %v4897_v0  ;;  %v661_v18 = vrot.slane %v656_v1, 4  ;;  %v663_v19 = vshrl.u32 %v4642_v8, 16 }
  0x25   :  { %94 = vst.msk [vmem:[#allocation2 + $0x120] sm:$0xf] %vm20_vm0, %v4897_v0  ;;  %95 = vst.msk [vmem:[#allocation2 + $0x124] sm:$0xf] %vm20_vm0, %v4897_v0  ;;  %v666_v22 = vshll.u32 %v4642_v8, 16  ;;  %v671_v23 = vshrl.u32 %v4643_v9, 16  ;;  %v4644_v36 = vpack.c.bf16 %v4760_v29, %v4760_v29 }
  0x26   :  { %96 = vst.msk [vmem:[#allocation2 + $0x128] sm:$0x1] %vm23_vm1, %v4897_v0  ;;  %99 = vst.msk [vmem:[#allocation2 + $0x134] sm:$0x1] %vm23_vm1, %v4897_v0  ;;  %v140_v24 = vld [vmem:[%s7964_s1 + $0x50] sm:$0xff]  ;;  %v674_v28 = vshll.u32 %v4643_v9, 16 }
  0x27   :  { %97 = vst.msk [vmem:[#allocation2 + $0x12c] sm:$0xf] %vm20_vm0, %v4897_v0  ;;  %98 = vst.msk [vmem:[#allocation2 + $0x130] sm:$0xf] %vm20_vm0, %v4897_v0  ;;  %v1302_v35 = vld [vmem:[#allocation2 + $0x20] sm:$0x1] }
  0x28   :  { %100 = vst.msk [vmem:[#allocation2 + $0x138] sm:$0xf] %vm20_vm0, %v4897_v0  ;;  %101 = vst.msk [vmem:[#allocation2 + $0x13c] sm:$0xf] %vm20_vm0, %v4897_v0  ;;  %v264_v37 = vmin.f32 %v200_v20, 6.0  ;;  %v680_v45 = vshrl.u32 %v4644_v36, 16 }
  0x29   :  { %102 = vst.msk [vmem:[#allocation2 + $0x140] sm:$0x1] %vm23_vm1, %v4897_v0  ;;  %105 = vst.msk [vmem:[#allocation2 + $0x14c] sm:$0x1] %vm23_vm1, %v4897_v0  ;;  %v5237_v48 = vld [vmem:[%s7964_s1 + $0x58] sm:$0xff]  ;;  %v5242_v15 = vld [vmem:[%s7964_s1 + $0x40] sm:$0xff] }
  0x2a   :  { %103 = vst.msk [vmem:[#allocation2 + $0x144] sm:$0xf] %vm20_vm0, %v4897_v0  ;;  %104 = vst.msk [vmem:[#allocation2 + $0x148] sm:$0xf] %vm20_vm0, %v4897_v0  ;;  %v328_v47 = vmul.f32 42.5, %v264_v37  ;;  %v205_v57 = vmax.f32 %v5237_v48, 0.0 }
  0x2b   :  { %106 = vst.msk [vmem:[#allocation2 + $0x150] sm:$0xf] %vm20_vm0, %v4897_v0  ;;  %107 = vst.msk [vmem:[#allocation2 + $0x154] sm:$0xf] %vm20_vm0, %v4897_v0  ;;  %v1305_v53 = vld [vmem:[#allocation2 + $0x24] sm:$0xf] }
  0x2c   :  { %108 = vst.msk [vmem:[#allocation2 + $0x158] sm:$0x1] %vm23_vm1, %v4897_v0  ;;  %111 = vst.msk [vmem:[#allocation2 + $0x164] sm:$0x1] %vm23_vm1, %v4897_v0 }
  0x2d   :  { %109 = vst.msk [vmem:[#allocation2 + $0x15c] sm:$0xf] %vm20_vm0, %v4897_v0  ;;  %110 = vst.msk [vmem:[#allocation2 + $0x160] sm:$0xf] %vm20_vm0, %v4897_v0 }
  0x2e   :  { %112 = vst.msk [vmem:[#allocation2 + $0x168] sm:$0xf] %vm20_vm0, %v4897_v0  ;;  %113 = vst.msk [vmem:[#allocation2 + $0x16c] sm:$0xf] %vm20_vm0, %v4897_v0 }
  0x2f   :  { %114 = vst.msk [vmem:[#allocation2 + $0x170] sm:$0x1] %vm23_vm1, %v4897_v0  ;;  %117 = vst.msk [vmem:[#allocation2 + $0x17c] sm:$0x1] %vm23_vm1, %v4897_v0 }
  0x30   :  { %115 = vst.msk [vmem:[#allocation2 + $0x174] sm:$0xf] %vm20_vm0, %v4897_v0  ;;  %116 = vst.msk [vmem:[#allocation2 + $0x178] sm:$0xf] %vm20_vm0, %v4897_v0 }
  0x31   :  { %118 = vst.msk [vmem:[#allocation2 + $0x180] sm:$0xf] %vm20_vm0, %v4897_v0  ;;  %119 = vst.msk [vmem:[#allocation2 + $0x184] sm:$0xf] %vm20_vm0, %v4897_v0 }
  0x32   :  { %120 = vst.msk [vmem:[#allocation2 + $0x188] sm:$0x1] %vm23_vm1, %v4897_v0  ;;  %123 = vst.msk [vmem:[#allocation2 + $0x194] sm:$0x1] %vm23_vm1, %v4897_v0 }
  0x33   :  { %121 = vst.msk [vmem:[#allocation2 + $0x18c] sm:$0xf] %vm20_vm0, %v4897_v0  ;;  %122 = vst.msk [vmem:[#allocation2 + $0x190] sm:$0xf] %vm20_vm0, %v4897_v0 }
  0x34   :  { %124 = vst.msk [vmem:[#allocation2 + $0x198] sm:$0xf] %vm20_vm0, %v4897_v0  ;;  %125 = vst.msk [vmem:[#allocation2 + $0x19c] sm:$0xf] %vm20_vm0, %v4897_v0 }
  0x35   :  { %126 = vst.msk [vmem:[#allocation2 + $0x1a0] sm:$0x1] %vm23_vm1, %v4897_v0  ;;  %129 = vst.msk [vmem:[#allocation2 + $0x1ac] sm:$0x1] %vm23_vm1, %v4897_v0 }
  0x36   :  { %127 = vst.msk [vmem:[#allocation2 + $0x1a4] sm:$0xf] %vm20_vm0, %v4897_v0  ;;  %128 = vst.msk [vmem:[#allocation2 + $0x1a8] sm:$0xf] %vm20_vm0, %v4897_v0  ;;  %v648_v0 = vrot.slane %v646_v55, 7 }
  0x37   :  { %vm5181_vm8 = vmor %vm2007_vm2, %vm2008_vm3  ;;  %v1309_v55 = vld [vmem:[#allocation2 + $0x2c] sm:$0x1] }
  0x38   :  { %v2013_v38 = vsel %vm5181_vm8, %v4494_v31, %v2012_v32  ;;  %v2016_v46 = vsel %vm5181_vm8, %v2014_v39, %v2015_v33  ;;  %vm5192_vm10 = vmor %vm1572_vm4, %vm1573_vm5  ;;  %v651_v11 = vor.u32 %v649_v56, %v648_v0  ;;  %v652_v12 = vrot.slane %v648_v0, 4  ;;  %v1298_v33 = vld [vmem:[#allocation2 + $0x18] sm:$0xf] }
  0x39   :  { %v4544_v50 = vcombine.low %v2013_v38, %v2016_v46  ;;  %vm5199_vm11 = vmor %vm642_vm6, %vm643_vm7  ;;  %v1588_v4 = vsel %vm5192_vm10, %v1583_v59, %v1587_v44  ;;  %v1598_v5 = vsel %vm5192_vm10, %v1593_v60, %v1597_v40  ;;  %v665_v31 = vrot.slane %v663_v19, 7 }
  0x3a   :  { %vm5209_vm12 = vmand %vm20_vm0, %vm1287_vm9  ;;  %v4528_v10 = vcombine.low %v1588_v4, %v1598_v5  ;;  %v660_v26 = vsel %vm5199_vm11, %v652_v12, %v659_v13  ;;  %v673_v32 = vrot.slane %v671_v23, 7  ;;  %v265_v38 = vmin.f32 %v201_v25, 6.0 }
  0x3b   :  { %2366 = vrot.lane.b32.xlu0 %v4544_v50, %s4898_s5  ;;  %vm5215_vm13 = vmand %vm23_vm1, %vm642_vm6  ;;  %v1290_v27 = vsel %vm5209_vm12, %v651_v11, %v1289_v7  ;;  %1292 = vst.msk [vmem:[#allocation2 + $0x10] sm:$0xf] %vm20_vm0, %v660_v26  ;;  %v204_v39 = vmax.f32 %v140_v24, 0.0  ;;  %v668_v40 = vor.u32 %v666_v22, %v665_v31  ;;  %v669_v41 = vrot.slane %v665_v31, 4 }
  0x3c   :  { %1291 = vst [vmem:[#allocation2 + $0xc] sm:$0xf] %v1290_v27  ;;  %v1296_v30 = vsel %vm5215_vm13, %v661_v18, %v1295_v17  ;;  %v676_v42 = vor.u32 %v674_v28, %v673_v32  ;;  %v678_v43 = vrot.slane %v673_v32, 4  ;;  %v4645_v44 = vpack.c.bf16 %v4761_v34, %v4761_v34 }
  0x3d   :  { %1297 = vst [vmem:[#allocation2 + $0x14] sm:$0x1] %v1296_v30  ;;  %v683_v46 = vshll.u32 %v4644_v36, 16  ;;  %v1299_v20 = vsel %vm5209_vm12, %v668_v40, %v1298_v33  ;;  %v329_v49 = vmul.f32 42.5, %v265_v38  ;;  %v682_v50 = vrot.slane %v680_v45, 7 }
  0x3e   :  { %v677_v16 = vsel %vm5199_vm11, %v669_v41, %v676_v42  ;;  %v1303_v25 = vsel %vm5215_vm13, %v678_v43, %v1302_v35  ;;  %1300 = vst [vmem:[#allocation2 + $0x18] sm:$0xf] %v1299_v20  ;;  %v688_v51 = vshrl.u32 %v4645_v44, 16  ;;  %v691_v52 = vshll.u32 %v4645_v44, 16 }
  0x3f   :  { %2286 = vrot.lane.b32.xlu0 %v4528_v10, %s4899_s8  ;;  %1301 = vst.msk [vmem:[#allocation2 + $0x1c] sm:$0xf] %vm20_vm0, %v677_v16  ;;  %1304 = vst [vmem:[#allocation2 + $0x20] sm:$0x1] %v1303_v25  ;;  %v4762_v56 = vround.rtne.f32 %v328_v47  ;;  %v5252_v58 = vmin.f32 %v204_v39, 6.0  ;;  %v202_v59 = vmax.f32 %v5242_v15, 0.0  ;;  %v685_v62 = vor.u32 %v683_v46, %v682_v50 }
  0x40   :  { %v686_v0 = vrot.slane %v682_v50, 4  ;;  %v690_v1 = vrot.slane %v688_v51, 7  ;;  %v4763_v2 = vround.rtne.f32 %v329_v49 }
  0x41   :  { %v1306_v18 = vsel %vm5209_vm12, %v685_v62, %v1305_v53 }
  0x42   :  { %v1522_v61 = vld [vmem:[#allocation2 + $0x10] sm:$0xf]  ;;  %v693_v11 = vor.u32 %v691_v52, %v690_v1  ;;  %v695_v12 = vrot.slane %v690_v1, 4  ;;  %1307 = vst [vmem:[#allocation2 + $0x24] sm:$0xf] %v1306_v18 }
  0x43   :  { %v1521_v60 = vld [vmem:[#allocation2 + $0xc] sm:$0xf]  ;;  %v2019_v5 = vrot.slane %v1522_v61, 5  ;;  %v1609_v26 = vshll.u32 %v1522_v61, 16 }
  0x44   :  { %v1523_v3 = vld [vmem:[#allocation2 + $0x14] sm:$0x1]  ;;  %v4495_v4 = vrot.slane %v1521_v60, 9  ;;  %v1600_v7 = vshrl.u32 %v1521_v60, 16  ;;  %v1603_v8 = vshll.u32 %v1521_v60, 16  ;;  %v694_v22 = vsel %vm5199_vm11, %v686_v0, %v693_v11 }
  0x45   :  { %v1619_v9 = vshll.u32 %v1523_v3, 16  ;;  %v2022_v10 = vrot.slane %v1523_v3, 5  ;;  %v2021_v17 = vrot.slane %v2019_v5, 4  ;;  %v1310_v23 = vsel %vm5215_vm13, %v695_v12, %v1309_v55 }
  0x46   :  { %v2020_v13 = vsel %vm5181_vm8, %v4495_v4, %v2019_v5  ;;  %v1602_v19 = vrot.slane %v1600_v7, 4  ;;  %v1605_v24 = vrot.slane %v1603_v8, 5 }
  0x47   :  { %10 = vsyncpa [#allocation5], 0  ;;  %v2023_v27 = vsel %vm5181_vm8, %v2021_v17, %v2022_v10  ;;  %v1524_v28 = vld [vmem:[#allocation2 + $0x18] sm:$0xf]  ;;  %v1525_v29 = vld [vmem:[#allocation2 + $0x1c] sm:$0xf]  ;;  %v4646_v31 = vpack.c.bf16 %v4762_v56, %v4762_v56  ;;  %v4647_v39 = vpack.c.bf16 %v4763_v2, %v4763_v2 }
  0x48   :  { %v1526_v30 = vld [vmem:[#allocation2 + $0x20] sm:$0x1]  ;;  %1308 = vst.msk [vmem:[#allocation2 + $0x28] sm:$0xf] %vm20_vm0, %v694_v22  ;;  %1311 = vst [vmem:[#allocation2 + $0x2c] sm:$0x1] %v1310_v23  ;;  %v5266_v32 = vcombine.low %v2020_v13, %v2023_v27  ;;  %v1606_v36 = vor.u32 %v1605_v24, %v1602_v19 }
  0x49   :  { %v4496_v33 = vrot.slane %v1524_v28, 9  ;;  %v2026_v34 = vrot.slane %v1525_v29, 5  ;;  %v2029_v35 = vrot.slane %v1526_v30, 5  ;;  %v1611_v37 = vrot.slane %v1609_v26, 5  ;;  %v1527_v51 = vld [vmem:[#allocation2 + $0x24] sm:$0xf] }
  0x4a   :  { %8051 = vst [vmem:[#allocation7_spill] sm:$0xff] %v5266_v32  ;;  %v1613_v38 = vshrl.u32 %v1522_v61, 16  ;;  %2368 = vrot.lane.b32.xlu1 %v5266_v32, %s4898_s5  ;;  %v1624_v42 = vshrl.u32 %v1524_v28, 16  ;;  %v1627_v43 = vshll.u32 %v1524_v28, 16  ;;  %v1607_v44 = vrot.slane %v1606_v36, 4  ;;  %s4900_s6 = smov 12  }
  0x4b   :  { %v2027_v40 = vsel %vm5181_vm8, %v4496_v33, %v2026_v34  ;;  %v2028_v41 = vrot.slane %v2026_v34, 4  ;;  %v1633_v46 = vshll.u32 %v1525_v29, 16  ;;  %v1637_v47 = vshrl.u32 %v1525_v29, 16  ;;  %v1312_v28 = vld [vmem:[#allocation2 + $0x30] sm:$0xf]  ;;  %s4901_s20 = smov 16  }
  0x4c   :  { %v1615_v45 = vrot.slane %v1613_v38, 4  ;;  %v1626_v20 = vrot.slane %v1624_v42, 4  ;;  %v1629_v25 = vrot.slane %v1627_v43, 5  ;;  %v1643_v49 = vshll.u32 %v1526_v30, 16  ;;  %s4902_s10 = smov 20   ;;  %s4903_s19 = smov 24  }
  0x4d   :  { %v2030_v16 = vsel %vm5181_vm8, %v2028_v41, %v2029_v35  ;;  %v1621_v53 = vrot.slane %v1619_v9, 5  ;;  %v1635_v55 = vrot.slane %v1633_v46, 5  ;;  %v4497_v61 = vrot.slane %v1527_v51, 9  ;;  %v1316_v35 = vld [vmem:[#allocation2 + $0x38] sm:$0x1]  ;;  %s4904_s7 = smov 28  }
  0x4e   :  { %v5274_v50 = vcombine.low %v2027_v40, %v2030_v16  ;;  %v1616_v52 = vor.u32 %v1615_v45, %v1611_v37  ;;  %v1612_v62 = vsel %vm5192_vm10, %v1607_v44, %v1611_v37  ;;  %v1630_v0 = vor.u32 %v1629_v25, %v1626_v20  ;;  %v139_v44 = vld [vmem:[%s7964_s1 + $0x48] sm:$0xff]  ;;  %v144_v20 = vld [vmem:[%s7964_s1 + $0x70] sm:$0xff]  ;;  %s4905_s12 = smov 32  }
  0x4f   :  { %v1528_v56 = vld [vmem:[#allocation2 + $0x28] sm:$0xf]  ;;  %v1529_v60 = vld [vmem:[#allocation2 + $0x2c] sm:$0x1]  ;;  %v1639_v1 = vrot.slane %v1637_v47, 4  ;;  %v1645_v5 = vrot.slane %v1643_v49, 5 }
  0x50   :  { %8052 = vst [vmem:[#allocation8_spill] sm:$0xff] %v5274_v50  ;;  %2370 = vrot.lane.b32.xlu0 %v5274_v50, %s4898_s5  ;;  %v2033_v2 = vrot.slane %v1528_v56, 5  ;;  %v2036_v3 = vrot.slane %v1529_v60, 5  ;;  %v1617_v4 = vrot.slane %v1616_v52, 4  ;;  %v1631_v7 = vrot.slane %v1630_v0, 4 }
  0x51   :  { %v1640_v8 = vor.u32 %v1639_v1, %v1635_v55  ;;  %v697_v10 = vshrl.u32 %v4646_v31, 16  ;;  %v700_v9 = vshll.u32 %v4646_v31, 16  ;;  %v705_v17 = vshrl.u32 %v4647_v39, 16 }
  0x52   :  { %v2034_v11 = vsel %vm5181_vm8, %v4497_v61, %v2033_v2  ;;  %v2035_v12 = vrot.slane %v2033_v2, 4  ;;  %v1622_v13 = vsel %vm5192_vm10, %v1617_v4, %v1621_v53  ;;  %v1636_v19 = vsel %vm5192_vm10, %v1631_v7, %v1635_v55  ;;  %v145_v53 = vld [vmem:[%s7964_s1 + $0x78] sm:$0xff] }
  0x53   :  { %v5284_v18 = vcombine.low %v1612_v62, %v1622_v13  ;;  %v1641_v22 = vrot.slane %v1640_v8, 4  ;;  %v699_v23 = vrot.slane %v697_v10, 7  ;;  %v707_v26 = vrot.slane %v705_v17, 7 }
  0x54   :  { %v2037_v24 = vsel %vm5181_vm8, %v2035_v12, %v2036_v3  ;;  %v708_v27 = vshll.u32 %v4647_v39, 16  ;;  %v1648_v29 = vshrl.u32 %v1527_v51, 16  ;;  %v1651_v41 = vshll.u32 %v1527_v51, 16 }
  0x55   :  { %v5290_v30 = vcombine.low %v2034_v11, %v2037_v24  ;;  %2288 = vrot.lane.b32.xlu0 %v5284_v18, %s4899_s8  ;;  %v1646_v31 = vsel %vm5192_vm10, %v1641_v22, %v1645_v5  ;;  %v702_v33 = vor.u32 %v700_v9, %v699_v23  ;;  %v703_v34 = vrot.slane %v699_v23, 4 }
  0x56   :  { %v5296_v36 = vcombine.low %v1636_v19, %v1646_v31  ;;  %v710_v37 = vor.u32 %v708_v27, %v707_v26  ;;  %v712_v38 = vrot.slane %v707_v26, 4  ;;  %v1650_v40 = vrot.slane %v1648_v29, 4 }
  0x57   :  { %8053 = vst [vmem:[#allocation9_spill] sm:$0xff] %v5290_v30  ;;  %2372 = vrot.lane.b32.xlu1 %v5290_v30, %s4898_s5  ;;  %v1313_v39 = vsel %vm5209_vm12, %v702_v33, %v1312_v28  ;;  %v1657_v42 = vshll.u32 %v1528_v56, 16  ;;  %v1661_v43 = vshrl.u32 %v1528_v56, 16  ;;  %v1667_v47 = vshll.u32 %v1529_v60, 16 }
  0x58   :  { %8054 = vst [vmem:[#allocation10_spill] sm:$0xff] %v5296_v36  ;;  %v711_v45 = vsel %vm5199_vm11, %v703_v34, %v710_v37  ;;  %1314 = vst [vmem:[#allocation2 + $0x30] sm:$0xf] %v1313_v39  ;;  %v1317_v46 = vsel %vm5215_vm13, %v712_v38, %v1316_v35  ;;  %v269_v16 = vmin.f32 %v205_v57, 6.0  ;;  %v1653_v25 = vrot.slane %v1651_v41, 5 }
  0x59   :  { %1315 = vst.msk [vmem:[#allocation2 + $0x34] sm:$0xf] %vm20_vm0, %v711_v45  ;;  %1318 = vst [vmem:[#allocation2 + $0x38] sm:$0x1] %v1317_v46  ;;  %v1659_v49 = vrot.slane %v1657_v42, 5  ;;  %v1663_v51 = vrot.slane %v1661_v43, 4 }
  0x5a   :  { %v332_v52 = vmul.f32 42.5, %v5252_v58  ;;  %v1669_v55 = vrot.slane %v1667_v47, 5  ;;  %v333_v56 = vmul.f32 42.5, %v269_v16  ;;  %v203_v48 = vmax.f32 %v139_v44, 0.0  ;;  %v1326_v39 = vld [vmem:[#allocation2 + $0x48] sm:$0xf] }
  0x5b   :  { %v266_v57 = vmin.f32 %v202_v59, 6.0  ;;  %2290 = vrot.lane.b32.xlu1 %v5296_v36, %s4899_s8  ;;  %v1654_v60 = vor.u32 %v1653_v25, %v1650_v40  ;;  %v1664_v61 = vor.u32 %v1663_v51, %v1659_v49  ;;  %v208_v0 = vmax.f32 %v144_v20, 0.0 }
  0x5c   :  { %v4766_v62 = vround.rtne.f32 %v332_v52  ;;  %v4767_v1 = vround.rtne.f32 %v333_v56  ;;  %v267_v2 = vmin.f32 %v203_v48, 6.0  ;;  %v209_v3 = vmax.f32 %v145_v53, 0.0 }
  0x5d   :  { %v330_v58 = vmul.f32 42.5, %v266_v57  ;;  %v1655_v4 = vrot.slane %v1654_v60, 4  ;;  %v1665_v5 = vrot.slane %v1664_v61, 4  ;;  %v272_v8 = vmin.f32 %v208_v0, 6.0  ;;  %v142_v0 = vld [vmem:[%s7964_s1 + $0x60] sm:$0xff] }
  0x5e   :  { %v4650_v7 = vpack.c.bf16 %v4766_v62, %v4766_v62  ;;  %v4651_v10 = vpack.c.bf16 %v4767_v1, %v4767_v1  ;;  %v331_v9 = vmul.f32 42.5, %v267_v2  ;;  %v273_v15 = vmin.f32 %v209_v3, 6.0 }
  0x5f   :  { %v4764_v11 = vround.rtne.f32 %v330_v58  ;;  %v5323_v59 = vld [vmem:[#allocation2 + $0x30] sm:$0xf]  ;;  %v1660_v12 = vsel %vm5192_vm10, %v1655_v4, %v1659_v49  ;;  %v1670_v13 = vsel %vm5192_vm10, %v1665_v5, %v1669_v55  ;;  %v336_v52 = vmul.f32 42.5, %v272_v8 }
  0x60   :  { %v731_v17 = vshrl.u32 %v4650_v7, 16  ;;  %v734_v19 = vshll.u32 %v4650_v7, 16  ;;  %v5329_v22 = vld [vmem:[#allocation2 + $0x34] sm:$0xf]  ;;  %v5331_v23 = vld [vmem:[#allocation2 + $0x38] sm:$0x1]  ;;  %v5335_v27 = vcombine.low %v1660_v12, %v1670_v13  ;;  %v4765_v28 = vround.rtne.f32 %v331_v9 }
  0x61   :  { %v1672_v24 = vshrl.u32 %v5323_v59, 16  ;;  %v1675_v26 = vshll.u32 %v5323_v59, 16  ;;  %v1681_v29 = vshll.u32 %v5329_v22, 16  ;;  %v1685_v31 = vshrl.u32 %v5329_v22, 16  ;;  %v1330_v49 = vld [vmem:[#allocation2 + $0x50] sm:$0x1] }
  0x62   :  { %v1691_v33 = vshll.u32 %v5331_v23, 16  ;;  %v733_v34 = vrot.slane %v731_v17, 7  ;;  %2292 = vrot.lane.b32.xlu1 %v5335_v27, %s4899_s8  ;;  %v739_v38 = vshrl.u32 %v4651_v10, 16  ;;  %v742_v40 = vshll.u32 %v4651_v10, 16  ;;  %v1319_v7 = vld [vmem:[#allocation2 + $0x3c] sm:$0xf] }
  0x63   :  { %v1674_v35 = vrot.slane %v1672_v24, 4  ;;  %v1677_v37 = vrot.slane %v1675_v26, 5  ;;  %v1683_v41 = vrot.slane %v1681_v29, 5  ;;  %v1687_v42 = vrot.slane %v1685_v31, 4  ;;  %v143_v9 = vld [vmem:[%s7964_s1 + $0x68] sm:$0xff] }
  0x64   :  { %v1693_v43 = vrot.slane %v1691_v33, 5  ;;  %v736_v44 = vor.u32 %v734_v19, %v733_v34  ;;  %v737_v46 = vrot.slane %v733_v34, 4  ;;  %v741_v47 = vrot.slane %v739_v38, 7  ;;  %v1323_v19 = vld [vmem:[#allocation2 + $0x44] sm:$0x1] }
  0x65   :  { %v1678_v45 = vor.u32 %v1677_v37, %v1674_v35  ;;  %v4648_v16 = vpack.c.bf16 %v4764_v11, %v4764_v11  ;;  %v1688_v20 = vor.u32 %v1687_v42, %v1683_v41  ;;  %v4649_v51 = vpack.c.bf16 %v4765_v28, %v4765_v28  ;;  %v5362_v11 = vld [vmem:[%s7964_s1 + $0x90] sm:$0xff] }
  0x66   :  { %v1327_v25 = vsel %vm5209_vm12, %v736_v44, %v1326_v39  ;;  %v744_v55 = vor.u32 %v742_v40, %v741_v47  ;;  %v746_v56 = vrot.slane %v741_v47, 4  ;;  %v337_v8 = vmul.f32 42.5, %v273_v15 }
  0x67   :  { %v1679_v53 = vrot.slane %v1678_v45, 4  ;;  %1328 = vst [vmem:[#allocation2 + $0x48] sm:$0xf] %v1327_v25  ;;  %v714_v48 = vshrl.u32 %v4648_v16, 16  ;;  %v1689_v57 = vrot.slane %v1688_v20, 4  ;;  %v717_v60 = vshll.u32 %v4648_v16, 16 }
  0x68   :  { %v722_v61 = vshrl.u32 %v4649_v51, 16  ;;  %v725_v62 = vshll.u32 %v4649_v51, 16  ;;  %v745_v2 = vsel %vm5199_vm11, %v737_v46, %v744_v55  ;;  %v1331_v58 = vsel %vm5215_vm13, %v746_v56, %v1330_v49  ;;  %v1340_v20 = vld [vmem:[#allocation2 + $0x60] sm:$0xf] }
  0x69   :  { %v1684_v1 = vsel %vm5192_vm10, %v1679_v53, %v1683_v41  ;;  %v716_v3 = vrot.slane %v714_v48, 7  ;;  %v1694_v4 = vsel %vm5192_vm10, %v1689_v57, %v1693_v43  ;;  %1329 = vst.msk [vmem:[#allocation2 + $0x4c] sm:$0xf] %vm20_vm0, %v745_v2  ;;  %1332 = vst [vmem:[#allocation2 + $0x50] sm:$0x1] %v1331_v58  ;;  %v4770_v10 = vround.rtne.f32 %v336_v52 }
  0x6a   :  { %v724_v5 = vrot.slane %v722_v61, 7  ;;  %v5364_v12 = vcombine.low %v1684_v1, %v1694_v4  ;;  %v206_v24 = vmax.f32 %v142_v0, 0.0  ;;  %v4771_v29 = vround.rtne.f32 %v337_v8 }
  0x6b   :  { %v719_v13 = vor.u32 %v717_v60, %v716_v3  ;;  %v720_v17 = vrot.slane %v716_v3, 4  ;;  %v4654_v15 = vpack.c.bf16 %v4770_v10, %v4770_v10  ;;  %v207_v33 = vmax.f32 %v143_v9, 0.0  ;;  %v1344_v10 = vld [vmem:[#allocation2 + $0x68] sm:$0x1] }
  0x6c   :  { %8055 = vst [vmem:[#allocation11_spill] sm:$0xff] %v5364_v12  ;;  %v727_v26 = vor.u32 %v725_v62, %v724_v5  ;;  %v729_v28 = vrot.slane %v724_v5, 4  ;;  %2294 = vrot.lane.b32.xlu0 %v5364_v12, %s4899_s8  ;;  %v270_v34 = vmin.f32 %v206_v24, 6.0  ;;  %v212_v35 = vmax.f32 %v5362_v11, 0.0 }
  0x6d   :  { %v1320_v31 = vsel %vm5209_vm12, %v719_v13, %v1319_v7  ;;  %v4655_v39 = vpack.c.bf16 %v4771_v29, %v4771_v29  ;;  %v765_v41 = vshrl.u32 %v4654_v15, 16  ;;  %v768_v44 = vshll.u32 %v4654_v15, 16 }
  0x6e   :  { %v5371_v37 = vld [vmem:[#allocation2 + $0x48] sm:$0xf]  ;;  %v728_v38 = vsel %vm5199_vm11, %v720_v17, %v727_v26  ;;  %1321 = vst [vmem:[#allocation2 + $0x3c] sm:$0xf] %v1320_v31  ;;  %v1324_v40 = vsel %vm5215_vm13, %v729_v28, %v1323_v19  ;;  %v271_v45 = vmin.f32 %v207_v33, 6.0  ;;  %v334_v25 = vmul.f32 42.5, %v270_v34 }
  0x6f   :  { %v1720_v42 = vshrl.u32 %v5371_v37, 16  ;;  %v1723_v43 = vshll.u32 %v5371_v37, 16  ;;  %1322 = vst.msk [vmem:[#allocation2 + $0x40] sm:$0xf] %vm20_vm0, %v728_v38  ;;  %1325 = vst [vmem:[#allocation2 + $0x44] sm:$0x1] %v1324_v40 }
  0x70   :  { %v767_v46 = vrot.slane %v765_v41, 7  ;;  %v773_v47 = vshrl.u32 %v4655_v39, 16  ;;  %v776_v16 = vshll.u32 %v4655_v39, 16  ;;  %v5380_v49 = vld [vmem:[#allocation2 + $0x4c] sm:$0xf]  ;;  %v335_v0 = vmul.f32 42.5, %v271_v45 }
  0x71   :  { %v5382_v51 = vld [vmem:[#allocation2 + $0x50] sm:$0x1]  ;;  %v1722_v52 = vrot.slane %v1720_v42, 4  ;;  %v1725_v53 = vrot.slane %v1723_v43, 5  ;;  %v1729_v55 = vshll.u32 %v5380_v49, 16  ;;  %v1733_v56 = vshrl.u32 %v5380_v49, 16 }
  0x72   :  { %v1739_v48 = vshll.u32 %v5382_v51, 16  ;;  %v770_v57 = vor.u32 %v768_v44, %v767_v46  ;;  %v771_v61 = vrot.slane %v767_v46, 4  ;;  %v775_v62 = vrot.slane %v773_v47, 7  ;;  %v149_v41 = vld [vmem:[%s7964_s1 + $0x98] sm:$0xff] }
  0x73   :  { %v1726_v60 = vor.u32 %v1725_v53, %v1722_v52  ;;  %v1731_v1 = vrot.slane %v1729_v55, 5  ;;  %v1735_v2 = vrot.slane %v1733_v56, 4  ;;  %v4768_v9 = vround.rtne.f32 %v334_v25 }
  0x74   :  { %v1741_v58 = vrot.slane %v1739_v48, 5  ;;  %v1341_v3 = vsel %vm5209_vm12, %v770_v57, %v1340_v20  ;;  %v778_v7 = vor.u32 %v776_v16, %v775_v62  ;;  %v780_v8 = vrot.slane %v775_v62, 4 }
  0x75   :  { %v1727_v4 = vrot.slane %v1726_v60, 4  ;;  %v5389_v5 = vld [vmem:[#allocation2 + $0x3c] sm:$0xf]  ;;  %1342 = vst [vmem:[#allocation2 + $0x60] sm:$0xf] %v1341_v3  ;;  %v1736_v13 = vor.u32 %v1735_v2, %v1731_v1  ;;  %v4769_v28 = vround.rtne.f32 %v335_v0  ;;  %v4652_v16 = vpack.c.bf16 %v4768_v9, %v4768_v9 }
  0x76   :  { %v5391_v17 = vld [vmem:[#allocation2 + $0x40] sm:$0xf]  ;;  %v5393_v19 = vld [vmem:[#allocation2 + $0x44] sm:$0x1]  ;;  %v1696_v24 = vshrl.u32 %v5389_v5, 16  ;;  %v1699_v26 = vshll.u32 %v5389_v5, 16  ;;  %v779_v39 = vsel %vm5199_vm11, %v771_v61, %v778_v7  ;;  %v1345_v45 = vsel %vm5215_vm13, %v780_v8, %v1344_v10 }
  0x77   :  { %v1732_v29 = vsel %vm5192_vm10, %v1727_v4, %v1731_v1  ;;  %v1705_v15 = vshll.u32 %v5391_v17, 16  ;;  %v1709_v31 = vshrl.u32 %v5391_v17, 16  ;;  %v1715_v33 = vshll.u32 %v5393_v19, 16  ;;  %1343 = vst.msk [vmem:[#allocation2 + $0x64] sm:$0xf] %vm20_vm0, %v779_v39  ;;  %v146_v39 = vld [vmem:[%s7964_s1 + $0x80] sm:$0xff] }
  0x78   :  { %v1737_v34 = vrot.slane %v1736_v13, 4  ;;  %v1698_v38 = vrot.slane %v1696_v24, 4  ;;  %v1701_v40 = vrot.slane %v1699_v26, 5  ;;  %1346 = vst [vmem:[#allocation2 + $0x68] sm:$0x1] %v1345_v45  ;;  %v4653_v20 = vpack.c.bf16 %v4769_v28, %v4769_v28  ;;  %v147_v45 = vld [vmem:[%s7964_s1 + $0x88] sm:$0xff] }
  0x79   :  { %v1707_v42 = vrot.slane %v1705_v15, 5  ;;  %v1711_v43 = vrot.slane %v1709_v31, 4  ;;  %v1717_v44 = vrot.slane %v1715_v33, 5  ;;  %v213_v53 = vmax.f32 %v149_v41, 0.0  ;;  %v1333_v10 = vld [vmem:[#allocation2 + $0x54] sm:$0xf] }
  0x7a   :  { %v1742_v46 = vsel %vm5192_vm10, %v1737_v34, %v1741_v58  ;;  %v1702_v47 = vor.u32 %v1701_v40, %v1698_v38  ;;  %v276_v55 = vmin.f32 %v212_v35, 6.0  ;;  %v748_v57 = vshrl.u32 %v4652_v16, 16  ;;  %v1337_v15 = vld [vmem:[#allocation2 + $0x5c] sm:$0x1] }
  0x7b   :  { %v5412_v25 = vcombine.low %v1732_v29, %v1742_v46  ;;  %v1712_v52 = vor.u32 %v1711_v43, %v1707_v42  ;;  %v751_v60 = vshll.u32 %v4652_v16, 16  ;;  %v756_v61 = vshrl.u32 %v4653_v20, 16  ;;  %v152_v46 = vld [vmem:[%s7964_s1 + $0xb0] sm:$0xff] }
  0x7c   :  { %v1703_v56 = vrot.slane %v1702_v47, 4  ;;  %v5416_v48 = vld [vmem:[#allocation2 + $0x60] sm:$0xf]  ;;  %v759_v2 = vshll.u32 %v4653_v20, 16  ;;  %v750_v11 = vrot.slane %v748_v57, 7  ;;  %v277_v3 = vmin.f32 %v213_v53, 6.0 }
  0x7d   :  { %8056 = vst [vmem:[#allocation12_spill] sm:$0xff] %v5412_v25  ;;  %2298 = vrot.lane.b32.xlu0 %v5412_v25, %s4899_s8  ;;  %v1713_v62 = vrot.slane %v1712_v52, 4  ;;  %v1768_v0 = vshrl.u32 %v5416_v48, 16  ;;  %v1771_v1 = vshll.u32 %v5416_v48, 16  ;;  %v758_v35 = vrot.slane %v756_v61, 7  ;;  %v153_v53 = vld [vmem:[%s7964_s1 + $0xb8] sm:$0xff] }
  0x7e   :  { %v1708_v58 = vsel %vm5192_vm10, %v1703_v56, %v1707_v42  ;;  %v340_v9 = vmul.f32 42.5, %v276_v55  ;;  %v5428_v24 = vld [vmem:[#allocation2 + $0x64] sm:$0xf]  ;;  %v753_v26 = vor.u32 %v751_v60, %v750_v11  ;;  %v754_v28 = vrot.slane %v750_v11, 4 }
  0x7f   :  { %v1718_v4 = vsel %vm5192_vm10, %v1713_v62, %v1717_v44  ;;  %v1770_v7 = vrot.slane %v1768_v0, 4  ;;  %v1773_v8 = vrot.slane %v1771_v1, 5  ;;  %v761_v29 = vor.u32 %v759_v2, %v758_v35  ;;  %v5430_v31 = vld [vmem:[#allocation2 + $0x68] sm:$0x1]  ;;  %v5459_v61 = vld [vmem:[%s7964_s1 + $0xa0] sm:$0xff] }
  0x80   :  { %v5426_v13 = vcombine.low %v1708_v58, %v1718_v4  ;;  %v1777_v34 = vshll.u32 %v5428_v24, 16  ;;  %v1781_v38 = vshrl.u32 %v5428_v24, 16  ;;  %v763_v40 = vrot.slane %v758_v35, 4 }
  0x81   :  { %v1774_v33 = vor.u32 %v1773_v8, %v1770_v7  ;;  %v1787_v41 = vshll.u32 %v5430_v31, 16  ;;  %v762_v42 = vsel %vm5199_vm11, %v754_v28, %v761_v29  ;;  %v1334_v43 = vsel %vm5209_vm12, %v753_v26, %v1333_v10 }
  0x82   :  { %8057 = vst [vmem:[#allocation13_spill] sm:$0xff] %v5426_v13  ;;  %2296 = vrot.lane.b32.xlu1 %v5426_v13, %s4899_s8  ;;  %v341_v44 = vmul.f32 42.5, %v277_v3  ;;  %v1779_v16 = vrot.slane %v1777_v34, 5  ;;  %v1783_v20 = vrot.slane %v1781_v38, 4  ;;  %1335 = vst [vmem:[#allocation2 + $0x54] sm:$0xf] %v1334_v43  ;;  %v1338_v52 = vsel %vm5215_vm13, %v763_v40, %v1337_v15 }
  0x83   :  { %v1775_v47 = vrot.slane %v1774_v33, 4  ;;  %1336 = vst.msk [vmem:[#allocation2 + $0x58] sm:$0xf] %vm20_vm0, %v762_v42  ;;  %v1789_v55 = vrot.slane %v1787_v41, 5  ;;  %1339 = vst [vmem:[#allocation2 + $0x5c] sm:$0x1] %v1338_v52  ;;  %v4774_v56 = vround.rtne.f32 %v340_v9 }
  0x84   :  { %v4775_v57 = vround.rtne.f32 %v341_v44  ;;  %v210_v60 = vmax.f32 %v146_v39, 0.0  ;;  %v1784_v0 = vor.u32 %v1783_v20, %v1779_v16  ;;  %v211_v1 = vmax.f32 %v147_v45, 0.0  ;;  %v1354_v33 = vld [vmem:[#allocation2 + $0x78] sm:$0xf] }
  0x85   :  { %v1780_v62 = vsel %vm5192_vm10, %v1775_v47, %v1779_v16  ;;  %v216_v2 = vmax.f32 %v152_v46, 0.0  ;;  %v4658_v58 = vpack.c.bf16 %v4774_v56, %v4774_v56  ;;  %v217_v3 = vmax.f32 %v153_v53, 0.0 }
  0x86   :  { %v4659_v11 = vpack.c.bf16 %v4775_v57, %v4775_v57  ;;  %v274_v35 = vmin.f32 %v210_v60, 6.0  ;;  %v1785_v4 = vrot.slane %v1784_v0, 4  ;;  %v275_v7 = vmin.f32 %v211_v1, 6.0  ;;  %v1358_v57 = vld [vmem:[#allocation2 + $0x80] sm:$0x1]  ;;  %v151_v1 = vld [vmem:[%s7964_s1 + $0xa8] sm:$0xff] }
  0x87   :  { %v280_v8 = vmin.f32 %v216_v2, 6.0  ;;  %v214_v10 = vmax.f32 %v5459_v61, 0.0  ;;  %v799_v9 = vshrl.u32 %v4658_v58, 16  ;;  %v802_v26 = vshll.u32 %v4658_v58, 16 }
  0x88   :  { %v807_v28 = vshrl.u32 %v4659_v11, 16  ;;  %v810_v29 = vshll.u32 %v4659_v11, 16  ;;  %v1790_v15 = vsel %vm5192_vm10, %v1785_v4, %v1789_v55  ;;  %v338_v34 = vmul.f32 42.5, %v274_v35 }
  0x89   :  { %v339_v38 = vmul.f32 42.5, %v275_v7  ;;  %v281_v40 = vmin.f32 %v217_v3, 6.0  ;;  %v5466_v39 = vcombine.low %v1780_v62, %v1790_v15  ;;  %v5468_v41 = vld [vmem:[#allocation2 + $0x54] sm:$0xf]  ;;  %v801_v43 = vrot.slane %v799_v9, 7 }
  0x8a   :  { %v5470_v42 = vld [vmem:[#allocation2 + $0x58] sm:$0xf]  ;;  %v809_v44 = vrot.slane %v807_v28, 7  ;;  %v5472_v45 = vld [vmem:[#allocation2 + $0x5c] sm:$0x1]  ;;  %v1744_v46 = vshrl.u32 %v5468_v41, 16  ;;  %v4772_v7 = vround.rtne.f32 %v338_v34 }
  0x8b   :  { %8058 = vst [vmem:[#allocation14_spill] sm:$0xff] %v5466_v39  ;;  %v1747_v47 = vshll.u32 %v5468_v41, 16  ;;  %v1753_v16 = vshll.u32 %v5470_v42, 16  ;;  %v1757_v20 = vshrl.u32 %v5470_v42, 16  ;;  %2302 = vrot.lane.b32.xlu0 %v5466_v39, %s4899_s8  ;;  %v1763_v52 = vshll.u32 %v5472_v45, 16 }
  0x8c   :  { %v804_v53 = vor.u32 %v802_v26, %v801_v43  ;;  %v805_v55 = vrot.slane %v801_v43, 4  ;;  %v812_v56 = vor.u32 %v810_v29, %v809_v44  ;;  %v1746_v60 = vrot.slane %v1744_v46, 4 }
  0x8d   :  { %v1749_v61 = vrot.slane %v1747_v47, 5  ;;  %v1755_v62 = vrot.slane %v1753_v16, 5  ;;  %v1759_v0 = vrot.slane %v1757_v20, 4  ;;  %v1765_v2 = vrot.slane %v1763_v52, 5 }
  0x8e   :  { %v813_v58 = vsel %vm5199_vm11, %v805_v55, %v812_v56  ;;  %v814_v11 = vrot.slane %v809_v44, 4  ;;  %v1355_v35 = vsel %vm5209_vm12, %v804_v53, %v1354_v33  ;;  %v4773_v9 = vround.rtne.f32 %v339_v38 }
  0x8f   :  { %v1750_v3 = vor.u32 %v1749_v61, %v1746_v60  ;;  %v1760_v4 = vor.u32 %v1759_v0, %v1755_v62  ;;  %1356 = vst [vmem:[#allocation2 + $0x78] sm:$0xf] %v1355_v35  ;;  %1357 = vst.msk [vmem:[#allocation2 + $0x7c] sm:$0xf] %vm20_vm0, %v813_v58  ;;  %v344_v28 = vmul.f32 42.5, %v280_v8  ;;  %v345_v29 = vmul.f32 42.5, %v281_v40 }
  0x90   :  { %v1359_v26 = vsel %vm5215_vm13, %v814_v11, %v1358_v57  ;;  %v215_v15 = vmax.f32 %v151_v1, 0.0  ;;  %v4656_v44 = vpack.c.bf16 %v4772_v7, %v4772_v7  ;;  %v4657_v47 = vpack.c.bf16 %v4773_v9, %v4773_v9  ;;  %v1347_v61 = vld [vmem:[#allocation2 + $0x6c] sm:$0xf]  ;;  %v1351_v9 = vld [vmem:[#allocation2 + $0x74] sm:$0x1] }
  0x91   :  { %v1751_v43 = vrot.slane %v1750_v3, 4  ;;  %v1761_v46 = vrot.slane %v1760_v4, 4  ;;  %1360 = vst [vmem:[#allocation2 + $0x80] sm:$0x1] %v1359_v26  ;;  %v4778_v16 = vround.rtne.f32 %v344_v28  ;;  %v4779_v33 = vround.rtne.f32 %v345_v29 }
  0x92   :  { %v278_v20 = vmin.f32 %v214_v10, 6.0  ;;  %v279_v52 = vmin.f32 %v215_v15, 6.0  ;;  %v782_v38 = vshrl.u32 %v4656_v44, 16  ;;  %v785_v55 = vshll.u32 %v4656_v44, 16 }
  0x93   :  { %v1756_v53 = vsel %vm5192_vm10, %v1751_v43, %v1755_v62  ;;  %v1766_v34 = vsel %vm5192_vm10, %v1761_v46, %v1765_v2  ;;  %v790_v40 = vshrl.u32 %v4657_v47, 16  ;;  %v793_v56 = vshll.u32 %v4657_v47, 16 }
  0x94   :  { %v5495_v8 = vcombine.low %v1756_v53, %v1766_v34  ;;  %v4662_v57 = vpack.c.bf16 %v4778_v16, %v4778_v16  ;;  %v784_v60 = vrot.slane %v782_v38, 7  ;;  %v342_v0 = vmul.f32 42.5, %v278_v20 }
  0x95   :  { %v343_v1 = vmul.f32 42.5, %v279_v52  ;;  %v792_v58 = vrot.slane %v790_v40, 7  ;;  %v4663_v2 = vpack.c.bf16 %v4779_v33, %v4779_v33  ;;  %vm2608_vm14 = vcmask 31744  }
  0x96   :  { %8059 = vst [vmem:[#allocation15_spill] sm:$0xff] %v5495_v8  ;;  %2300 = vrot.lane.b32.xlu1 %v5495_v8, %s4899_s8  ;;  %v5499_v10 = vld [vmem:[#allocation2 + $0x78] sm:$0xf]  ;;  %v5501_v62 = vld [vmem:[#allocation2 + $0x7c] sm:$0xf]  ;;  %v833_v11 = vshrl.u32 %v4662_v57, 16  ;;  %v787_v28 = vor.u32 %v785_v55, %v784_v60 }
  0x97   :  { %v1816_v35 = vshrl.u32 %v5499_v10, 16  ;;  %v1819_v3 = vshll.u32 %v5499_v10, 16  ;;  %v1825_v4 = vshll.u32 %v5501_v62, 16  ;;  %v1829_v7 = vshrl.u32 %v5501_v62, 16  ;;  %v1393_v8 = vld [vmem:[#allocation2 + $0xbc] sm:$0x1] }
  0x98   :  { %v5507_v26 = vld [vmem:[#allocation2 + $0x80] sm:$0x1]  ;;  %v788_v29 = vrot.slane %v784_v60, 4  ;;  %v795_v15 = vor.u32 %v793_v56, %v792_v58  ;;  %v797_v43 = vrot.slane %v792_v58, 4  ;;  %v1348_v52 = vsel %vm5209_vm12, %v787_v28, %v1347_v61  ;;  %v156_v56 = vld [vmem:[%s7964_s1 + $0xd0] sm:$0xff] }
  0x99   :  { %v1818_v46 = vrot.slane %v1816_v35, 4  ;;  %v1821_v44 = vrot.slane %v1819_v3, 5  ;;  %v1827_v47 = vrot.slane %v1825_v4, 5  ;;  %v1831_v16 = vrot.slane %v1829_v7, 4  ;;  %1349 = vst [vmem:[#allocation2 + $0x6c] sm:$0xf] %v1348_v52 }
  0x9a   :  { %v1835_v33 = vshll.u32 %v5507_v26, 16  ;;  %v796_v20 = vsel %vm5199_vm11, %v788_v29, %v795_v15  ;;  %v1352_v53 = vsel %vm5215_vm13, %v797_v43, %v1351_v9  ;;  %v835_v55 = vrot.slane %v833_v11, 7  ;;  %v1368_v3 = vld [vmem:[#allocation2 + $0x90] sm:$0xf]  ;;  %v157_v4 = vld [vmem:[%s7964_s1 + $0xd8] sm:$0xff] }
  0x9b   :  { %v1822_v34 = vor.u32 %v1821_v44, %v1818_v46  ;;  %v1832_v38 = vor.u32 %v1831_v16, %v1827_v47  ;;  %1350 = vst.msk [vmem:[#allocation2 + $0x70] sm:$0xf] %vm20_vm0, %v796_v20  ;;  %1353 = vst [vmem:[#allocation2 + $0x74] sm:$0x1] %v1352_v53  ;;  %v836_v40 = vshll.u32 %v4662_v57, 16  ;;  %v841_v58 = vshrl.u32 %v4663_v2, 16 }
  0x9c   :  { %v1837_v60 = vrot.slane %v1835_v33, 5  ;;  %v844_v35 = vshll.u32 %v4663_v2, 16  ;;  %v4776_v61 = vround.rtne.f32 %v342_v0  ;;  %v839_v29 = vrot.slane %v835_v55, 4  ;;  %v1372_v44 = vld [vmem:[#allocation2 + $0x98] sm:$0x1] }
  0x9d   :  { %v1823_v7 = vrot.slane %v1822_v34, 4  ;;  %v1833_v9 = vrot.slane %v1832_v38, 4  ;;  %v838_v28 = vor.u32 %v836_v40, %v835_v55  ;;  %v843_v15 = vrot.slane %v841_v58, 7 }
  0x9e   :  { %v4777_v11 = vround.rtne.f32 %v343_v1  ;;  %v4660_v57 = vpack.c.bf16 %v4776_v61, %v4776_v61  ;;  %v220_v43 = vmax.f32 %v156_v56, 0.0  ;;  %v221_v16 = vmax.f32 %v157_v4, 0.0 }
  0x9f   :  { %v1828_v46 = vsel %vm5192_vm10, %v1823_v7, %v1827_v47  ;;  %v1838_v2 = vsel %vm5192_vm10, %v1833_v9, %v1837_v60  ;;  %v1369_v0 = vsel %vm5209_vm12, %v838_v28, %v1368_v3  ;;  %v846_v20 = vor.u32 %v844_v35, %v843_v15 }
  0xa0   :  { %v5529_v33 = vcombine.low %v1828_v46, %v1838_v2  ;;  %v848_v52 = vrot.slane %v843_v15, 4  ;;  %1370 = vst [vmem:[#allocation2 + $0x90] sm:$0xf] %v1369_v0  ;;  %v4661_v53 = vpack.c.bf16 %v4777_v11, %v4777_v11  ;;  %v816_v1 = vshrl.u32 %v4660_v57, 16  ;;  %v5533_v47 = vld [vmem:[#allocation2 + $0x6c] sm:$0xf] }
  0xa1   :  { %v819_v34 = vshll.u32 %v4660_v57, 16  ;;  %v284_v38 = vmin.f32 %v220_v43, 6.0  ;;  %v285_v55 = vmin.f32 %v221_v16, 6.0  ;;  %v847_v60 = vsel %vm5199_vm11, %v839_v29, %v846_v20  ;;  %v1361_v16 = vld [vmem:[#allocation2 + $0x84] sm:$0xf] }
  0xa2   :  { %8060 = vst [vmem:[#allocation16_spill] sm:$0xff] %v5529_v33  ;;  %2306 = vrot.lane.b32.xlu0 %v5529_v33, %s4899_s8  ;;  %v5535_v40 = vld [vmem:[#allocation2 + $0x70] sm:$0xf]  ;;  %v5537_v56 = vld [vmem:[#allocation2 + $0x74] sm:$0x1]  ;;  %v1373_v58 = vsel %vm5215_vm13, %v848_v52, %v1372_v44  ;;  %v1792_v35 = vshrl.u32 %v5533_v47, 16 }
  0xa3   :  { %v1795_v3 = vshll.u32 %v5533_v47, 16  ;;  %v1801_v61 = vshll.u32 %v5535_v40, 16  ;;  %v1805_v4 = vshrl.u32 %v5535_v40, 16  ;;  %1371 = vst.msk [vmem:[#allocation2 + $0x94] sm:$0xf] %vm20_vm0, %v847_v60  ;;  %v1811_v7 = vshll.u32 %v5537_v56, 16 }
  0xa4   :  { %1374 = vst [vmem:[#allocation2 + $0x98] sm:$0x1] %v1373_v58  ;;  %v818_v9 = vrot.slane %v816_v1, 7  ;;  %v824_v28 = vshrl.u32 %v4661_v53, 16  ;;  %v827_v15 = vshll.u32 %v4661_v53, 16  ;;  %v1794_v29 = vrot.slane %v1792_v35, 4 }
  0xa5   :  { %v1797_v11 = vrot.slane %v1795_v3, 5  ;;  %v1803_v57 = vrot.slane %v1801_v61, 5  ;;  %v1807_v43 = vrot.slane %v1805_v4, 4  ;;  %v1813_v46 = vrot.slane %v1811_v7, 5  ;;  %v1365_v60 = vld [vmem:[#allocation2 + $0x8c] sm:$0x1] }
  0xa6   :  { %v821_v2 = vor.u32 %v819_v34, %v818_v9  ;;  %v822_v0 = vrot.slane %v818_v9, 4  ;;  %v826_v44 = vrot.slane %v824_v28, 7  ;;  %v348_v58 = vmul.f32 42.5, %v284_v38  ;;  %v154_v9 = vld [vmem:[%s7964_s1 + $0xc0] sm:$0xff] }
  0xa7   :  { %v1798_v20 = vor.u32 %v1797_v11, %v1794_v29  ;;  %v1808_v52 = vor.u32 %v1807_v43, %v1803_v57  ;;  %v5549_v50 = vld [vmem:[#allocation2 + $0x90] sm:$0xf]  ;;  %v349_v33 = vmul.f32 42.5, %v285_v55  ;;  %vm2657_vm15 = vcmask 64512  }
  0xa8   :  { %v1864_v1 = vshrl.u32 %v5549_v50, 16  ;;  %v1867_v53 = vshll.u32 %v5549_v50, 16  ;;  %v829_v35 = vor.u32 %v827_v15, %v826_v44  ;;  %v831_v3 = vrot.slane %v826_v44, 4 }
  0xa9   :  { %v1799_v61 = vrot.slane %v1798_v20, 4  ;;  %v1809_v4 = vrot.slane %v1808_v52, 4  ;;  %v1362_v34 = vsel %vm5209_vm12, %v821_v2, %v1361_v16  ;;  %v4782_v7 = vround.rtne.f32 %v348_v58 }
  0xaa   :  { %v5558_v28 = vld [vmem:[#allocation2 + $0x94] sm:$0xf]  ;;  %v1866_v55 = vrot.slane %v1864_v1, 4  ;;  %v1869_v29 = vrot.slane %v1867_v53, 5  ;;  %v830_v15 = vsel %vm5199_vm11, %v822_v0, %v829_v35  ;;  %1363 = vst [vmem:[#allocation2 + $0x84] sm:$0xf] %v1362_v34  ;;  %v1366_v11 = vsel %vm5215_vm13, %v831_v3, %v1365_v60 }
  0xab   :  { %v5560_v38 = vld [vmem:[#allocation2 + $0x98] sm:$0x1]  ;;  %v1804_v43 = vsel %vm5192_vm10, %v1799_v61, %v1803_v57  ;;  %v1814_v2 = vsel %vm5192_vm10, %v1809_v4, %v1813_v46  ;;  %v1873_v44 = vshll.u32 %v5558_v28, 16  ;;  %v1877_v16 = vshrl.u32 %v5558_v28, 16  ;;  %1364 = vst.msk [vmem:[#allocation2 + $0x88] sm:$0xf] %vm20_vm0, %v830_v15 }
  0xac   :  { %1367 = vst [vmem:[#allocation2 + $0x8c] sm:$0x1] %v1366_v11  ;;  %v155_v0 = vld [vmem:[%s7964_s1 + $0xc8] sm:$0xff]  ;;  %v5576_v20 = vcombine.low %v1804_v43, %v1814_v2  ;;  %v1870_v52 = vor.u32 %v1869_v29, %v1866_v55  ;;  %v1883_v60 = vshll.u32 %v5560_v38, 16  ;;  %v4783_v57 = vround.rtne.f32 %v349_v33 }
  0xad   :  { %v1875_v58 = vrot.slane %v1873_v44, 5  ;;  %v1879_v1 = vrot.slane %v1877_v16, 4  ;;  %v4666_v46 = vpack.c.bf16 %v4782_v7, %v4782_v7  ;;  %v218_v53 = vmax.f32 %v154_v9, 0.0 }
  0xae   :  { %8061 = vst [vmem:[#allocation17_spill] sm:$0xff] %v5576_v20  ;;  %2304 = vrot.lane.b32.xlu1 %v5576_v20, %s4899_s8  ;;  %v1871_v35 = vrot.slane %v1870_v52, 4  ;;  %v4667_v3 = vpack.c.bf16 %v4783_v57, %v4783_v57  ;;  %v219_v61 = vmax.f32 %v155_v0, 0.0  ;;  %v1885_v34 = vrot.slane %v1883_v60, 5 }
  0xaf   :  { %v1880_v4 = vor.u32 %v1879_v1, %v1875_v58  ;;  %v867_v15 = vshrl.u32 %v4666_v46, 16  ;;  %v282_v11 = vmin.f32 %v218_v53, 6.0  ;;  %v870_v29 = vshll.u32 %v4666_v46, 16  ;;  %v1382_v53 = vld [vmem:[#allocation2 + $0xa8] sm:$0xf] }
  0xb0   :  { %v1876_v55 = vsel %vm5192_vm10, %v1871_v35, %v1875_v58  ;;  %v875_v43 = vshrl.u32 %v4667_v3, 16  ;;  %v878_v33 = vshll.u32 %v4667_v3, 16  ;;  %v283_v9 = vmin.f32 %v219_v61, 6.0 }
  0xb1   :  { %v1881_v2 = vrot.slane %v1880_v4, 4  ;;  %v5583_v44 = vld [vmem:[#allocation2 + $0x84] sm:$0xf]  ;;  %v869_v7 = vrot.slane %v867_v15, 7  ;;  %v346_v16 = vmul.f32 42.5, %v282_v11  ;;  %v2040_v20 = vrot.slane %v5329_v22, 5 }
  0xb2   :  { %v5585_v30 = vld [vmem:[#allocation2 + $0x88] sm:$0xf]  ;;  %v1840_v0 = vshrl.u32 %v5583_v44, 16  ;;  %v1843_v60 = vshll.u32 %v5583_v44, 16  ;;  %v347_v25 = vmul.f32 42.5, %v283_v9  ;;  %vm2690_vm1 = vcmask 97280  }
  0xb3   :  { %v5587_v52 = vld [vmem:[#allocation2 + $0x8c] sm:$0x1]  ;;  %v1886_v57 = vsel %vm5192_vm10, %v1881_v2, %v1885_v34  ;;  %v1849_v58 = vshll.u32 %v5585_v30, 16  ;;  %v1853_v1 = vshrl.u32 %v5585_v30, 16  ;;  %v872_v4 = vor.u32 %v870_v29, %v869_v7 }
  0xb4   :  { %v1859_v46 = vshll.u32 %v5587_v52, 16  ;;  %v5596_v35 = vcombine.low %v1876_v55, %v1886_v57  ;;  %v1842_v3 = vrot.slane %v1840_v0, 4  ;;  %v1845_v61 = vrot.slane %v1843_v60, 5  ;;  %v1386_v55 = vld [vmem:[#allocation2 + $0xb0] sm:$0x1] }
  0xb5   :  { %v1851_v15 = vrot.slane %v1849_v58, 5  ;;  %v1855_v11 = vrot.slane %v1853_v1, 4  ;;  %v873_v39 = vrot.slane %v869_v7, 4  ;;  %v877_v34 = vrot.slane %v875_v43, 7 }
  0xb6   :  { %8062 = vst [vmem:[#allocation18_spill] sm:$0xff] %v5596_v35  ;;  %2310 = vrot.lane.b32.xlu0 %v5596_v35, %s4899_s8  ;;  %v1846_v32 = vor.u32 %v1845_v61, %v1842_v3  ;;  %v1383_v2 = vsel %vm5209_vm12, %v872_v4, %v1382_v53  ;;  %v1861_v36 = vrot.slane %v1859_v46, 5  ;;  %v4780_v57 = vround.rtne.f32 %v346_v16  ;;  %v1375_v4 = vld [vmem:[#allocation2 + $0x9c] sm:$0xf] }
  0xb7   :  { %v1856_v12 = vor.u32 %v1855_v11, %v1851_v15  ;;  %1384 = vst [vmem:[#allocation2 + $0xa8] sm:$0xf] %v1383_v2  ;;  %v880_v60 = vor.u32 %v878_v33, %v877_v34  ;;  %v882_v29 = vrot.slane %v877_v34, 4  ;;  %v4781_v58 = vround.rtne.f32 %v347_v25 }
  0xb8   :  { %v1847_v0 = vrot.slane %v1846_v32, 4  ;;  %v4664_v7 = vpack.c.bf16 %v4780_v57, %v4780_v57  ;;  %v158_v32 = vld [vmem:[%s7964_s1 + $0xe0] sm:$0xff]  ;;  %v2043_v57 = vrot.slane %v5331_v23, 5  ;;  %vm2723_vm2 = vcmask 130048  }
  0xb9   :  { %v1857_v1 = vrot.slane %v1856_v12, 4  ;;  %v881_v53 = vsel %vm5199_vm11, %v873_v39, %v880_v60  ;;  %v1387_v9 = vsel %vm5215_vm13, %v882_v29, %v1386_v55  ;;  %v4665_v46 = vpack.c.bf16 %v4781_v58, %v4781_v58  ;;  %v159_v12 = vld [vmem:[%s7964_s1 + $0xe8] sm:$0xff] }
  0xba   :  { %v1852_v43 = vsel %vm5192_vm10, %v1847_v0, %v1851_v15  ;;  %1385 = vst.msk [vmem:[#allocation2 + $0xac] sm:$0xf] %vm20_vm0, %v881_v53  ;;  %1388 = vst [vmem:[#allocation2 + $0xb0] sm:$0x1] %v1387_v9  ;;  %v850_v25 = vshrl.u32 %v4664_v7, 16  ;;  %v853_v39 = vshll.u32 %v4664_v7, 16 }
  0xbb   :  { %v1862_v22 = vsel %vm5192_vm10, %v1857_v1, %v1861_v36  ;;  %v858_v16 = vshrl.u32 %v4665_v46, 16  ;;  %v861_v3 = vshll.u32 %v4665_v46, 16  ;;  %v4498_v15 = vrot.slane %v5323_v59, 9  ;;  %v1379_v1 = vld [vmem:[#allocation2 + $0xa4] sm:$0x1] }
  0xbc   :  { %v5618_v33 = vcombine.low %v1852_v43, %v1862_v22  ;;  %v852_v61 = vrot.slane %v850_v25, 7  ;;  %v222_v11 = vmax.f32 %v158_v32, 0.0  ;;  %v223_v34 = vmax.f32 %v159_v12, 0.0 }
  0xbd   :  { %v860_v36 = vrot.slane %v858_v16, 7  ;;  %v2042_v55 = vrot.slane %v2040_v20, 4  ;;  %v2041_v12 = vsel %vm5181_vm8, %v4498_v15, %v2040_v20  ;;  %vm2756_vm3 = vcmask 162816  }
  0xbe   :  { %8063 = vst [vmem:[#allocation19_spill] sm:$0xff] %v5618_v33  ;;  %2308 = vrot.lane.b32.xlu1 %v5618_v33, %s4899_s8  ;;  %v5623_v2 = vld [vmem:[#allocation2 + $0xa8] sm:$0xf]  ;;  %v855_v29 = vor.u32 %v853_v39, %v852_v61  ;;  %v856_v58 = vrot.slane %v852_v61, 4  ;;  %v286_v43 = vmin.f32 %v222_v11, 6.0  ;;  %v287_v53 = vmin.f32 %v223_v34, 6.0 }
  0xbf   :  { %v1912_v0 = vshrl.u32 %v5623_v2, 16  ;;  %v1915_v60 = vshll.u32 %v5623_v2, 16  ;;  %v863_v7 = vor.u32 %v861_v3, %v860_v36  ;;  %v865_v59 = vrot.slane %v860_v36, 4 }
  0xc0   :  { %v1376_v32 = vsel %vm5209_vm12, %v855_v29, %v1375_v4  ;;  %v350_v16 = vmul.f32 42.5, %v286_v43  ;;  %v351_v3 = vmul.f32 42.5, %v287_v53  ;;  %v2044_v15 = vsel %vm5181_vm8, %v2042_v55, %v2043_v57 }
  0xc1   :  { %v1914_v9 = vrot.slane %v1912_v0, 4  ;;  %v1917_v46 = vrot.slane %v1915_v60, 5  ;;  %v5632_v23 = vld [vmem:[#allocation2 + $0xac] sm:$0xf]  ;;  %v5634_v22 = vld [vmem:[#allocation2 + $0xb0] sm:$0x1]  ;;  %v864_v25 = vsel %vm5199_vm11, %v856_v58, %v863_v7  ;;  %v1380_v39 = vsel %vm5215_vm13, %v865_v59, %v1379_v1 }
  0xc2   :  { %1377 = vst [vmem:[#allocation2 + $0x9c] sm:$0xf] %v1376_v32  ;;  %v1921_v11 = vshll.u32 %v5632_v23, 16  ;;  %v1925_v4 = vshrl.u32 %v5632_v23, 16  ;;  %v1931_v20 = vshll.u32 %v5634_v22, 16  ;;  %v4784_v34 = vround.rtne.f32 %v350_v16 }
  0xc3   :  { %v1918_v61 = vor.u32 %v1917_v46, %v1914_v9  ;;  %1378 = vst.msk [vmem:[#allocation2 + $0xa0] sm:$0xf] %vm20_vm0, %v864_v25  ;;  %1381 = vst [vmem:[#allocation2 + $0xa4] sm:$0x1] %v1380_v39  ;;  %v4785_v36 = vround.rtne.f32 %v351_v3  ;;  %v2054_v0 = vrot.slane %v5380_v49, 5  ;;  %v4500_v59 = vrot.slane %v5371_v37, 9 }
  0xc4   :  { %v1923_v29 = vrot.slane %v1921_v11, 5  ;;  %v1927_v58 = vrot.slane %v1925_v4, 4  ;;  %v4668_v1 = vpack.c.bf16 %v4784_v34, %v4784_v34  ;;  %v1933_v53 = vrot.slane %v1931_v20, 5 }
  0xc5   :  { %v1919_v60 = vrot.slane %v1918_v61, 4  ;;  %v4669_v7 = vpack.c.bf16 %v4785_v36, %v4785_v36  ;;  %v5648_v9 = vcombine.low %v2041_v12, %v2044_v15  ;;  %v2057_v46 = vrot.slane %v5382_v51, 5 }
  0xc6   :  { %v1928_v43 = vor.u32 %v1927_v58, %v1923_v29  ;;  %v884_v57 = vshrl.u32 %v4668_v1, 16  ;;  %v887_v32 = vshll.u32 %v4668_v1, 16  ;;  %v2056_v25 = vrot.slane %v2054_v0, 4 }
  0xc7   :  { %v1924_v55 = vsel %vm5192_vm10, %v1919_v60, %v1923_v29  ;;  %v892_v16 = vshrl.u32 %v4669_v7, 16  ;;  %v895_v3 = vshll.u32 %v4669_v7, 16  ;;  %v2068_v61 = vrot.slane %v5428_v24, 5 }
  0xc8   :  { %v1929_v49 = vrot.slane %v1928_v43, 4  ;;  %v2055_v4 = vsel %vm5181_vm8, %v4500_v59, %v2054_v0  ;;  %v5666_v20 = vcombine.low %v5533_v47, %v5535_v40  ;;  %v886_v1 = vrot.slane %v884_v57, 7  ;;  %v1389_v43 = vld [vmem:[#allocation2 + $0xb4] sm:$0xf] }
  0xc9   :  { %v5653_v39 = vld [vmem:[#allocation2 + $0x9c] sm:$0xf]  ;;  %v894_v59 = vrot.slane %v892_v16, 7  ;;  %v2058_v35 = vsel %vm5181_vm8, %v2056_v25, %v2057_v46  ;;  %v2071_v25 = vrot.slane %v5430_v31, 5  ;;  %vm2789_vm4 = vcmask 195584  }
  0xca   :  { %v5656_v37 = vld [vmem:[#allocation2 + $0xa0] sm:$0xf]  ;;  %v5658_v11 = vld [vmem:[#allocation2 + $0xa4] sm:$0x1]  ;;  %v1888_v12 = vshrl.u32 %v5653_v39, 16  ;;  %v1891_v51 = vshll.u32 %v5653_v39, 16  ;;  %v1934_v15 = vsel %vm5192_vm10, %v1929_v49, %v1933_v53  ;;  %v889_v49 = vor.u32 %v887_v32, %v886_v1 }
  0xcb   :  { %8064 = vst [vmem:[#allocation20_spill] sm:$0xff] %v5666_v20  ;;  %v1897_v24 = vshll.u32 %v5656_v37, 16  ;;  %v1901_v34 = vshrl.u32 %v5656_v37, 16  ;;  %v1907_v36 = vshll.u32 %v5658_v11, 16  ;;  %v5673_v60 = vcombine.low %v1924_v55, %v1934_v15 }
  0xcc   :  { %v1890_v29 = vrot.slane %v1888_v12, 4  ;;  %v1893_v58 = vrot.slane %v1891_v51, 5  ;;  %v890_v33 = vrot.slane %v886_v1, 4  ;;  %v4502_v55 = vrot.slane %v5416_v48, 9 }
  0xcd   :  { %8065 = vst [vmem:[#allocation21_spill] sm:$0xff] %v5673_v60  ;;  %v1899_v7 = vrot.slane %v1897_v24, 5  ;;  %v1903_v0 = vrot.slane %v1901_v34, 4  ;;  %2314 = vrot.lane.b32.xlu0 %v5673_v60, %s4899_s8  ;;  %v1909_v12 = vrot.slane %v1907_v36, 5  ;;  %v897_v51 = vor.u32 %v895_v3, %v894_v59 }
  0xce   :  { %v1894_v53 = vor.u32 %v1893_v58, %v1890_v29  ;;  %v899_v57 = vrot.slane %v894_v59, 4  ;;  %v1390_v16 = vsel %vm5209_vm12, %v889_v49, %v1389_v43  ;;  %v2070_v34 = vrot.slane %v2068_v61, 4 }
  0xcf   :  { %v1904_v15 = vor.u32 %v1903_v0, %v1899_v7  ;;  %v898_v46 = vsel %vm5199_vm11, %v890_v33, %v897_v51  ;;  %1391 = vst [vmem:[#allocation2 + $0xb4] sm:$0xf] %v1390_v16  ;;  %v5692_v3 = vcombine.low %v2055_v4, %v2058_v35  ;;  %v2069_v33 = vsel %vm5181_vm8, %v4502_v55, %v2068_v61 }
  0xd0   :  { %v1895_v24 = vrot.slane %v1894_v53, 4  ;;  %v1394_v32 = vsel %vm5215_vm13, %v899_v57, %v1393_v8  ;;  %1392 = vst.msk [vmem:[#allocation2 + $0xb8] sm:$0xf] %vm20_vm0, %v898_v46  ;;  %v2072_v31 = vsel %vm5181_vm8, %v2070_v34, %v2071_v25  ;;  %v4504_v8 = vrot.slane %v5499_v10, 9 }
  0xd1   :  { %v1905_v13 = vrot.slane %v1904_v15, 4  ;;  %2374 = vrot.lane.b32.xlu0 %v5648_v9, %s4898_s5  ;;  %1395 = vst [vmem:[#allocation2 + $0xbc] sm:$0x1] %v1394_v32  ;;  %v2082_v29 = vrot.slane %v5501_v62, 5  ;;  %v2085_v4 = vrot.slane %v5507_v26, 5  ;;  %v4503_v61 = vrot.slane %v5533_v47, 9 }
  0xd2   :  { %v1900_v48 = vsel %vm5192_vm10, %v1895_v24, %v1899_v7  ;;  %v2075_v10 = vrot.slane %v5535_v40, 5  ;;  %v2078_v62 = vrot.slane %v5537_v56, 5  ;;  %v4506_v7 = vrot.slane %v5549_v50, 9 }
  0xd3   :  { %v1910_v36 = vsel %vm5192_vm10, %v1905_v13, %v1909_v12  ;;  %v2083_v1 = vsel %vm5181_vm8, %v4504_v8, %v2082_v29  ;;  %v2084_v35 = vrot.slane %v2082_v29, 4  ;;  %v5712_v13 = vcombine.low %v2069_v33, %v2072_v31 }
  0xd4   :  { %v5702_v58 = vcombine.low %v1900_v48, %v1910_v36  ;;  %v2047_v0 = vrot.slane %v5391_v17, 5  ;;  %v2096_v47 = vrot.slane %v5558_v28, 5  ;;  %v2076_v53 = vsel %vm5181_vm8, %v4503_v61, %v2075_v10 }
  0xd5   :  { %2378 = vrot.lane.b32.xlu0 %v5692_v3, %s4898_s5  ;;  %8067 = vst [vmem:[#allocation23_spill] sm:$0xff] %v5712_v13  ;;  %v2086_v26 = vsel %vm5181_vm8, %v2084_v35, %v2085_v4  ;;  %v2077_v49 = vrot.slane %v2075_v10, 4  ;;  %v2099_v40 = vrot.slane %v5560_v38, 5  ;;  %v5738_v51 = vcombine.low %v5583_v44, %v5585_v30 }
  0xd6   :  { %8066 = vst [vmem:[#allocation22_spill] sm:$0xff] %v5702_v58  ;;  %2312 = vrot.lane.b32.xlu1 %v5702_v58, %s4899_s8  ;;  %v5721_v59 = vld [vmem:[#allocation2 + $0xb4] sm:$0xf]  ;;  %v5723_v43 = vcombine.low %v2083_v1, %v2086_v26  ;;  %v2097_v12 = vsel %vm5181_vm8, %v4506_v7, %v2096_v47  ;;  %v2098_v25 = vrot.slane %v2096_v47, 4  ;;  %v4499_v36 = vrot.slane %v5389_v5, 9 }
  0xd7   :  { %v5728_v56 = vld [vmem:[#allocation2 + $0xb8] sm:$0xf]  ;;  %v1936_v17 = vshrl.u32 %v5721_v59, 16  ;;  %v1939_v15 = vshll.u32 %v5721_v59, 16  ;;  %8068 = vst [vmem:[#allocation24_spill] sm:$0xff] %v5738_v51  ;;  %v2079_v16 = vsel %vm5181_vm8, %v2077_v49, %v2078_v62  ;;  %v2049_v31 = vrot.slane %v2047_v0, 4 }
  0xd8   :  { %v5730_v55 = vld [vmem:[#allocation2 + $0xbc] sm:$0x1]  ;;  %v1945_v57 = vshll.u32 %v5728_v56, 16  ;;  %v1949_v24 = vshrl.u32 %v5728_v56, 16  ;;  %v5747_v32 = vcombine.low %v2076_v53, %v2079_v16  ;;  %v2061_v29 = vrot.slane %v5470_v42, 5 }
  0xd9   :  { %v1955_v38 = vshll.u32 %v5730_v55, 16  ;;  %2382 = vrot.lane.b32.xlu0 %v5712_v13, %s4898_s5  ;;  %v1938_v34 = vrot.slane %v1936_v17, 4  ;;  %v1941_v46 = vrot.slane %v1939_v15, 5  ;;  %v2100_v1 = vsel %vm5181_vm8, %v2098_v25, %v2099_v40  ;;  %v161_v16 = vld [vmem:[%s7964_s1 + $0xf8] sm:$0xff] }
  0xda   :  { %8069 = vst [vmem:[#allocation25_spill] sm:$0xff] %v5747_v32  ;;  %v1947_v48 = vrot.slane %v1945_v57, 5  ;;  %v1951_v33 = vrot.slane %v1949_v24, 4  ;;  %v4508_v35 = vrot.slane %v5623_v2, 9  ;;  %v2050_v10 = vrot.slane %v5393_v19, 5 }
  0xdb   :  { %v1942_v8 = vor.u32 %v1941_v46, %v1938_v34  ;;  %v1957_v61 = vrot.slane %v1955_v38, 5  ;;  %v5757_v62 = vcombine.low %v2097_v12, %v2100_v1  ;;  %v2110_v5 = vrot.slane %v5632_v23, 5  ;;  %v160_v38 = vld [vmem:[%s7964_s1 + $0xf0] sm:$0xff]  ;;  %v4851_v34 = vld [vmem:[#allocation2 + $0xc] sm:$0xf] }
  0xdc   :  { %v1952_v4 = vor.u32 %v1951_v33, %v1947_v48  ;;  %v2113_v26 = vrot.slane %v5634_v22, 5  ;;  %v4501_v53 = vrot.slane %v5468_v41, 9  ;;  %v2064_v49 = vrot.slane %v5472_v45, 5  ;;  %v4852_v46 = vld [vmem:[#allocation2 + $0x10] sm:$0xf] }
  0xdd   :  { %2386 = vrot.lane.b32.xlu0 %v5723_v43, %s4898_s5  ;;  %v1943_v7 = vrot.slane %v1942_v8, 4  ;;  %v2063_v17 = vrot.slane %v2061_v29, 4  ;;  %v2111_v19 = vsel %vm5181_vm8, %v4508_v35, %v2110_v5  ;;  %v2112_v15 = vrot.slane %v2110_v5, 4 }
  0xde   :  { %v1953_v47 = vrot.slane %v1952_v4, 4  ;;  %v2048_v57 = vsel %vm5181_vm8, %v4499_v36, %v2047_v0  ;;  %v2051_v22 = vsel %vm5181_vm8, %v2049_v31, %v2050_v10  ;;  %v5787_v25 = vcombine.low %v4851_v34, %v4852_v46  ;;  %v177_v46 = vld [vmem:[%s7964_s1 + $0x178] sm:$0xff] }
  0xdf   :  { %v1948_v40 = vsel %vm5192_vm10, %v1943_v7, %v1947_v48  ;;  %v2114_v24 = vsel %vm5181_vm8, %v2112_v15, %v2113_v26  ;;  %v5791_v48 = vcombine.low %v2048_v57, %v2051_v22  ;;  %v2062_v33 = vsel %vm5181_vm8, %v4501_v53, %v2061_v29  ;;  %v4854_v7 = vld [vmem:[#allocation2 + $0x28] sm:$0xf]  ;;  %v4855_v15 = vld [vmem:[#allocation2 + $0x3c] sm:$0xf] }
  0xe0   :  { %v1958_v12 = vsel %vm5192_vm10, %v1953_v47, %v1957_v61  ;;  %v5785_v0 = vcombine.low %v2111_v19, %v2114_v24  ;;  %8071 = vst [vmem:[#allocation27_spill] sm:$0xff] %v5787_v25  ;;  %v2065_v36 = vsel %vm5181_vm8, %v2063_v17, %v2064_v49  ;;  %v5799_v31 = vcombine.low %v5549_v50, %v5558_v28  ;;  %v4853_v28 = vld [vmem:[#allocation2 + $0x24] sm:$0xf]  ;;  %v176_v19 = vld [vmem:[%s7964_s1 + $0x170] sm:$0xff] }
  0xe1   :  { %2390 = vrot.lane.b32.xlu0 %v5757_v62, %s4898_s5  ;;  %v5775_v45 = vcombine.low %v1948_v40, %v1958_v12  ;;  %8072 = vst [vmem:[#allocation28_spill] sm:$0xff] %v5791_v48  ;;  %v2089_v8 = vrot.slane %v5585_v30, 5  ;;  %v5806_v1 = vcombine.low %v5623_v2, %v5632_v23  ;;  %v224_v35 = vmax.f32 %v160_v38, 0.0  ;;  %v4856_v12 = vld [vmem:[#allocation2 + $0x40] sm:$0xf] }
  0xe2   :  { %8073 = vst [vmem:[#allocation29_spill] sm:$0xff] %v5799_v31  ;;  %v225_v4 = vmax.f32 %v161_v16, 0.0  ;;  %v2103_v29 = vrot.slane %v5656_v37, 5  ;;  %v5811_v50 = vcombine.low %v2062_v33, %v2065_v36  ;;  %v4505_v30 = vrot.slane %v5583_v44, 9 }
  0xe3   :  { %8070 = vst [vmem:[#allocation26_spill] sm:$0xff] %v5775_v45  ;;  %2316 = vrot.lane.b32.xlu1 %v5775_v45, %s4899_s8  ;;  %8074 = vst [vmem:[#allocation30_spill] sm:$0xff] %v5806_v1  ;;  %v288_v61 = vmin.f32 %v224_v35, 6.0  ;;  %v5814_v5 = vcombine.low %v4853_v28, %v4854_v7  ;;  %v2091_v26 = vrot.slane %v2089_v8, 4  ;;  %v2092_v2 = vrot.slane %v5587_v52, 5 }
  0xe4   :  { %v289_v10 = vmin.f32 %v225_v4, 6.0  ;;  %8075 = vst [vmem:[#allocation31_spill] sm:$0xff] %v5811_v50  ;;  %v4507_v53 = vrot.slane %v5653_v39, 9  ;;  %v2105_v49 = vrot.slane %v2103_v29, 4  ;;  %v2106_v40 = vrot.slane %v5658_v11, 5 }
  0xe5   :  { %2394 = vrot.lane.b32.xlu0 %v5785_v0, %s4898_s5  ;;  %8076 = vst [vmem:[#allocation32_spill] sm:$0xff] %v5814_v5  ;;  %v352_v23 = vmul.f32 42.5, %v288_v61  ;;  %v2117_v52 = vrot.slane %v5728_v56, 5  ;;  %v5827_v57 = vcombine.low %v4855_v15, %v4856_v12  ;;  %v2090_v22 = vsel %vm5181_vm8, %v4505_v30, %v2089_v8  ;;  %v162_v61 = vld [vmem:[%s7964_s1 + $0x100] sm:$0xff] }
  0xe6   :  { %v353_v47 = vmul.f32 42.5, %v289_v10  ;;  %v2093_v11 = vsel %vm5181_vm8, %v2091_v26, %v2092_v2  ;;  %v2104_v16 = vsel %vm5181_vm8, %v4507_v53, %v2103_v29  ;;  %v2107_v34 = vsel %vm5181_vm8, %v2105_v49, %v2106_v40  ;;  %v1400_v49 = vld [vmem:[#allocation2 + $0xc8] sm:$0x1] }
  0xe7   :  { %2376 = vrot.lane.b32.xlu1 %v5791_v48, %s4898_s5  ;;  %v4786_v17 = vround.rtne.f32 %v352_v23  ;;  %8077 = vst [vmem:[#allocation33_spill] sm:$0xff] %v5827_v57  ;;  %v240_v33 = vmax.f32 %v176_v19, 0.0  ;;  %v5847_v29 = vcombine.low %v2090_v22, %v2093_v11  ;;  %v4509_v10 = vrot.slane %v5721_v59, 9  ;;  %v1396_v23 = vld [vmem:[#allocation2 + $0xc0] sm:$0xf] }
  0xe8   :  { %v4787_v44 = vround.rtne.f32 %v353_v47  ;;  %v2119_v30 = vrot.slane %v2117_v52, 4  ;;  %v2120_v28 = vrot.slane %v5730_v55, 5  ;;  %v5855_v7 = vcombine.low %v5468_v41, %v5470_v42 }
  0xe9   :  { %2401 = vrot.lane.b32.xlu0 %v5787_v25, %s4900_s6  ;;  %v4670_v24 = vpack.c.bf16 %v4786_v17, %v4786_v17  ;;  %8078 = vst [vmem:[#allocation34_spill] sm:$0xff] %v5847_v29  ;;  %v241_v47 = vmax.f32 %v177_v46, 0.0  ;;  %v5857_v53 = vcombine.low %v2104_v16, %v2107_v34  ;;  %v304_v40 = vmin.f32 %v240_v33, 6.0  ;;  %v163_v17 = vld [vmem:[%s7964_s1 + $0x108] sm:$0xff] }
  0xea   :  { %v4671_v38 = vpack.c.bf16 %v4787_v44, %v4787_v44  ;;  %8079 = vst [vmem:[#allocation35_spill] sm:$0xff] %v5855_v7  ;;  %v226_v55 = vmax.f32 %v162_v61, 0.0  ;;  %v2118_v41 = vsel %vm5181_vm8, %v4509_v10, %v2117_v52  ;;  %v2121_v42 = vsel %vm5181_vm8, %v2119_v30, %v2120_v28 }
  0xeb   :  { %2380 = vrot.lane.b32.xlu1 %v5811_v50, %s4898_s5  ;;  %v901_v36 = vshrl.u32 %v4670_v24, 16  ;;  %v904_v8 = vshll.u32 %v4670_v24, 16  ;;  %8080 = vst [vmem:[#allocation36_spill] sm:$0xff] %v5857_v53  ;;  %v305_v22 = vmin.f32 %v241_v47, 6.0  ;;  %v368_v11 = vmul.f32 42.5, %v304_v40  ;;  %v179_v47 = vld [vmem:[%s7964_s1 + $0x188] sm:$0xff] }
  0xec   :  { %v909_v35 = vshrl.u32 %v4671_v38, 16  ;;  %v912_v4 = vshll.u32 %v4671_v38, 16  ;;  %v227_v34 = vmax.f32 %v163_v17, 0.0  ;;  %v290_v33 = vmin.f32 %v226_v55, 6.0  ;;  %v4858_v40 = vld [vmem:[#allocation2 + $0x1c] sm:$0xf] }
  0xed   :  { %2405 = vrot.lane.b32.xlu0 %v5814_v5, %s4900_s6  ;;  %v903_v26 = vrot.slane %v901_v36, 7  ;;  %v369_v52 = vmul.f32 42.5, %v305_v22  ;;  %v4802_v46 = vround.rtne.f32 %v368_v11  ;;  %v178_v36 = vld [vmem:[%s7964_s1 + $0x180] sm:$0xff]  ;;  %v4859_v11 = vld [vmem:[#allocation2 + $0x30] sm:$0xf]  ;;  %vm2822_vm5 = vcmask 228352  }
  0xee   :  { %v911_v2 = vrot.slane %v909_v35, 7  ;;  %v5882_v35 = vcombine.low %v2118_v41, %v2121_v42  ;;  %v354_v10 = vmul.f32 42.5, %v290_v33  ;;  %v242_v28 = vmax.f32 %v178_v36, 0.0 }
  0xef   :  { %2384 = vrot.lane.b32.xlu1 %v5747_v32, %s4898_s5  ;;  %v906_v44 = vor.u32 %v904_v8, %v903_v26  ;;  %v907_v19 = vrot.slane %v903_v26, 4  ;;  %v291_v8 = vmin.f32 %v227_v34, 6.0  ;;  %v4686_v61 = vpack.c.bf16 %v4802_v46, %v4802_v46 }
  0xf0   :  { %v914_v15 = vor.u32 %v912_v4, %v911_v2  ;;  %v916_v12 = vrot.slane %v911_v2, 4  ;;  %8081 = vst [vmem:[#allocation37_spill] sm:$0xff] %v5882_v35  ;;  %v4803_v4 = vround.rtne.f32 %v369_v52  ;;  %v243_v41 = vmax.f32 %v179_v47, 0.0 }
  0xf1   :  { %2409 = vrot.lane.b32.xlu0 %v5827_v57, %s4900_s6  ;;  %v1397_v38 = vsel %vm5209_vm12, %v906_v44, %v1396_v23  ;;  %v355_v30 = vmul.f32 42.5, %v291_v8  ;;  %v1037_v26 = vshrl.u32 %v4686_v61, 16  ;;  %v4788_v23 = vround.rtne.f32 %v354_v10  ;;  %v4861_v10 = vld [vmem:[#allocation2 + $0x48] sm:$0xf] }
  0xf2   :  { %v915_v24 = vsel %vm5199_vm11, %v907_v19, %v914_v15  ;;  %v1401_v16 = vsel %vm5215_vm13, %v916_v12, %v1400_v49  ;;  %1398 = vst [vmem:[#allocation2 + $0xc0] sm:$0xf] %v1397_v38  ;;  %v4687_v2 = vpack.c.bf16 %v4803_v4, %v4803_v4  ;;  %v4857_v49 = vld [vmem:[#allocation2 + $0x18] sm:$0xf]  ;;  %v5897_v44 = vcombine.low %v5653_v39, %v5656_v37 }
  0xf3   :  { %2388 = vrot.lane.b32.xlu1 %v5847_v29, %s4898_s5  ;;  %1399 = vst.msk [vmem:[#allocation2 + $0xc4] sm:$0xf] %vm20_vm0, %v915_v24  ;;  %1402 = vst [vmem:[#allocation2 + $0xc8] sm:$0x1] %v1401_v16  ;;  %v5891_v17 = vcombine.low %v4857_v49, %v4858_v40  ;;  %v4789_v55 = vround.rtne.f32 %v355_v30  ;;  %v1039_v19 = vrot.slane %v1037_v26, 7  ;;  %v1040_v15 = vshll.u32 %v4686_v61, 16 }
  0xf4   :  { %8083 = vst [vmem:[#allocation39_spill] sm:$0xff] %v5897_v44  ;;  %v306_v12 = vmin.f32 %v242_v28, 6.0  ;;  %v1045_v42 = vshrl.u32 %v4687_v2, 16  ;;  %v4672_v22 = vpack.c.bf16 %v4788_v23, %v4788_v23  ;;  %v4860_v24 = vld [vmem:[#allocation2 + $0x34] sm:$0xf]  ;;  %v5907_v39 = vcombine.low %v5721_v59, %v5728_v56 }
  0xf5   :  { %2413 = vrot.lane.b32.xlu0 %v5855_v7, %s4900_s6  ;;  %8082 = vst [vmem:[#allocation38_spill] sm:$0xff] %v5891_v17  ;;  %v5901_v38 = vcombine.low %v4859_v11, %v4860_v24  ;;  %v1452_v16 = vld [vmem:[#allocation2 + $0x138] sm:$0xf]  ;;  %v4673_v34 = vpack.c.bf16 %v4789_v55, %v4789_v55  ;;  %v1042_v37 = vor.u32 %v1040_v15, %v1039_v19  ;;  %v1048_v52 = vshll.u32 %v4687_v2, 16  ;;  %v4862_v30 = vld [vmem:[#allocation2 + $0x4c] sm:$0xf] }
  0xf6   :  { %8085 = vst [vmem:[#allocation41_spill] sm:$0xff] %v5907_v39  ;;  %v370_v46 = vmul.f32 42.5, %v306_v12  ;;  %v307_v33 = vmin.f32 %v243_v41, 6.0  ;;  %v1043_v36 = vrot.slane %v1039_v19, 4  ;;  %v1047_v8 = vrot.slane %v1045_v42, 7 }
  0xf7   :  { %2392 = vrot.lane.b32.xlu1 %v5857_v53, %s4898_s5  ;;  %8084 = vst [vmem:[#allocation40_spill] sm:$0xff] %v5901_v38  ;;  %v1453_v4 = vsel %vm5209_vm12, %v1042_v37, %v1452_v16  ;;  %v918_v61 = vshrl.u32 %v4672_v22, 16  ;;  %v5913_v28 = vcombine.low %v4861_v10, %v4862_v30  ;;  %v1456_v59 = vld [vmem:[#allocation2 + $0x140] sm:$0x1]  ;;  %v921_v56 = vshll.u32 %v4672_v22, 16  ;;  %v5928_v37 = vpop.permute.xlu0 %2366 }
  0xf8   :  { %1454 = vst [vmem:[#allocation2 + $0x138] sm:$0xf] %v1453_v4  ;;  %v926_v26 = vshrl.u32 %v4673_v34, 16  ;;  %v1050_v2 = vor.u32 %v1048_v52, %v1047_v8  ;;  %v1052_v23 = vrot.slane %v1047_v8, 4  ;;  %v4804_v47 = vround.rtne.f32 %v370_v46  ;;  %v1403_v12 = vld [vmem:[#allocation2 + $0xe4] sm:$0xf] }
  0xf9   :  { %2417 = vrot.lane.b32.xlu0 %v5666_v20, %s4900_s6  ;;  %8086 = vst [vmem:[#allocation42_spill] sm:$0xff] %v5913_v28  ;;  %v920_v49 = vrot.slane %v918_v61, 7  ;;  %v929_v55 = vshll.u32 %v4673_v34, 16  ;;  %v371_v41 = vmul.f32 42.5, %v307_v33  ;;  %v4863_v42 = vld [vmem:[#allocation2 + $0x60] sm:$0xf] }
  0xfa   :  { %v928_v40 = vrot.slane %v926_v26, 7  ;;  %v1051_v19 = vsel %vm5199_vm11, %v1043_v36, %v1050_v2  ;;  %v1457_v15 = vsel %vm5215_vm13, %v1052_v23, %v1456_v59  ;;  %v4864_v22 = vld [vmem:[#allocation2 + $0x64] sm:$0xf]  ;;  %v1407_v34 = vld [vmem:[#allocation2 + $0xec] sm:$0x1]  ;;  %8088 = vst [vmem:[#allocation44_spill] sm:$0xff] %v5928_v37  ;;  %v4688_v36 = vpack.c.bf16 %v4804_v47, %v4804_v47 }
  0xfb   :  { %2396 = vrot.lane.b32.xlu1 %v5882_v35, %s4898_s5  ;;  %v5923_v11 = vcombine.low %v4863_v42, %v4864_v22  ;;  %1455 = vst.msk [vmem:[#allocation2 + $0x13c] sm:$0xf] %vm20_vm0, %v1051_v19  ;;  %1458 = vst [vmem:[#allocation2 + $0x140] sm:$0x1] %v1457_v15  ;;  %v923_v24 = vor.u32 %v921_v56, %v920_v49  ;;  %v924_v16 = vrot.slane %v920_v49, 4  ;;  %v4805_v33 = vround.rtne.f32 %v371_v41  ;;  %v180_v49 = vld [vmem:[%s7964_s1 + $0x190] sm:$0xff] }
  0xfc   :  { %v931_v52 = vor.u32 %v929_v55, %v928_v40  ;;  %v933_v46 = vrot.slane %v928_v40, 4  ;;  %v1054_v30 = vshrl.u32 %v4688_v36, 16  ;;  %v4866_v59 = vld [vmem:[#allocation2 + $0x7c] sm:$0xf]  ;;  %v1057_v26 = vshll.u32 %v4688_v36, 16  ;;  %v5946_v40 = vpop.permute.xlu0 %2286 }
  0xfd   :  { %2421 = vrot.lane.b32.xlu0 %v5738_v51, %s4900_s6  ;;  %8087 = vst [vmem:[#allocation43_spill] sm:$0xff] %v5923_v11  ;;  %v1404_v8 = vsel %vm5209_vm12, %v923_v24, %v1403_v12  ;;  %v4689_v10 = vpack.c.bf16 %v4805_v33, %v4805_v33  ;;  %v1459_v47 = vld [vmem:[#allocation2 + $0x144] sm:$0xf]  ;;  %8089 = vst [vmem:[#allocation45_spill] sm:$0xff] %v5946_v40  ;;  %v181_v42 = vld [vmem:[%s7964_s1 + $0x198] sm:$0xff]  ;;  %v244_v22 = vmax.f32 %v180_v49, 0.0 }
  0xfe   :  { %v932_v4 = vsel %vm5199_vm11, %v924_v16, %v931_v52  ;;  %1405 = vst [vmem:[#allocation2 + $0xe4] sm:$0xf] %v1404_v8  ;;  %v1408_v61 = vsel %vm5215_vm13, %v933_v46, %v1407_v34  ;;  %v1056_v2 = vrot.slane %v1054_v30, 7  ;;  %v8090_v12 = vld [vmem:[#allocation13_spill] sm:$0xff]  ;;  %v245_v34 = vmax.f32 %v181_v42, 0.0  ;;  %v8091_v33 = vld [vmem:[#allocation15_spill] sm:$0xff] }
  0xff   :  { %2403 = vrot.lane.b32.xlu1 %v5891_v17, %s4900_s6  ;;  %1406 = vst.msk [vmem:[#allocation2 + $0xe8] sm:$0xf] %vm20_vm0, %v932_v4  ;;  %1409 = vst [vmem:[#allocation2 + $0xec] sm:$0x1] %v1408_v61  ;;  %v1062_v23 = vshrl.u32 %v4689_v10, 16  ;;  %v1065_v15 = vshll.u32 %v4689_v10, 16 }
 0x100   :  { %v1059_v55 = vor.u32 %v1057_v26, %v1056_v2  ;;  %v1060_v24 = vrot.slane %v1056_v2, 4  ;;  %v5959_v52 = vld [vmem:[#allocation2 + $0xc0] sm:$0xf]  ;;  %v5961_v46 = vld [vmem:[#allocation2 + $0xc4] sm:$0xf]  ;;  %v5965_v36 = vpop.permute.xlu0 %2370  ;;  %v308_v8 = vmin.f32 %v244_v22, 6.0 }
 0x101   :  { %2425 = vrot.lane.b32.xlu0 %v5897_v44, %s4900_s6  ;;  %v1064_v19 = vrot.slane %v1062_v23, 7  ;;  %8092 = vst [vmem:[#allocation46_spill] sm:$0xff] %v5965_v36  ;;  %v164_v4 = vld [vmem:[%s7964_s1 + $0x110] sm:$0xff]  ;;  %v165_v61 = vld [vmem:[%s7964_s1 + $0x118] sm:$0xff]  ;;  %v5979_v30 = vcombine.low %v5959_v52, %v5961_v46  ;;  %v8094_v26 = vld [vmem:[#allocation17_spill] sm:$0xff]  ;;  %vm2855_vm6 = vcmask 261120  }
 0x102   :  { %v1460_v41 = vsel %vm5209_vm12, %v1059_v55, %v1459_v47  ;;  %v372_v23 = vmul.f32 42.5, %v308_v8  ;;  %v228_v47 = vmax.f32 %v164_v4, 0.0  ;;  %v229_v49 = vmax.f32 %v165_v61, 0.0  ;;  %v8096_v42 = vld [vmem:[#allocation19_spill] sm:$0xff]  ;;  %v8097_v61 = vld [vmem:[#allocation10_spill] sm:$0xff]  ;;  %v8103_v20 = vld [vmem:[#allocation12_spill] sm:$0xff] }
 0x103   :  { %2407 = vrot.lane.b32.xlu1 %v5901_v38, %s4900_s6  ;;  %1461 = vst [vmem:[#allocation2 + $0x144] sm:$0xf] %v1460_v41  ;;  %v1067_v16 = vor.u32 %v1065_v15, %v1064_v19  ;;  %8093 = vst [vmem:[#allocation47_spill] sm:$0xff] %v5979_v30  ;;  %v1069_v2 = vrot.slane %v1064_v19, 4  ;;  %vm2888_vm7 = vcmask 293888  }
 0x104   :  { %v5984_v55 = vpop.permute.xlu0 %2288  ;;  %v4806_v22 = vround.rtne.f32 %v372_v23 }
 0x105   :  { %2429 = vrot.lane.b32.xlu0 %v5907_v39, %s4900_s6  ;;  %v1068_v10 = vsel %vm5199_vm11, %v1060_v24, %v1067_v16  ;;  %8095 = vst [vmem:[#allocation48_spill] sm:$0xff] %v5984_v55  ;;  %v292_v24 = vmin.f32 %v228_v47, 6.0  ;;  %v293_v16 = vmin.f32 %v229_v49, 6.0  ;;  %v2123_v47 = vshrl.u32 %v5959_v52, 16  ;;  %v1466_v39 = vld [vmem:[#allocation2 + $0x150] sm:$0xf] }
 0x106   :  { %1462 = vst.msk [vmem:[#allocation2 + $0x148] sm:$0xf] %vm20_vm0, %v1068_v10  ;;  %v5994_v10 = vpop.permute.xlu1 %2368  ;;  %v2126_v49 = vshll.u32 %v5959_v52, 16 }
 0x107   :  { %2411 = vrot.lane.b32.xlu1 %v5913_v28, %s4900_s6  ;;  %v356_v8 = vmul.f32 42.5, %v292_v24  ;;  %v357_v4 = vmul.f32 42.5, %v293_v16  ;;  %8098 = vst [vmem:[#allocation10_spill] sm:$0xff] %v5994_v10  ;;  %v2136_v24 = vshrl.u32 %v5961_v46, 16  ;;  %v8100_v16 = vld [vmem:[#allocation11_spill] sm:$0xff] }
 0x108   :  { %v1470_v10 = vld [vmem:[#allocation2 + $0x158] sm:$0x1] }
 0x109   :  { %2436 = vrot.lane.b32.xlu0 %v5284_v18, %s4901_s20  ;;  %v4865_v18 = vld [vmem:[#allocation2 + $0x78] sm:$0xf]  ;;  %v4790_v23 = vround.rtne.f32 %v356_v8 }
 0x10a   :  { %v5938_v56 = vcombine.low %v4865_v18, %v4866_v59  ;;  %v1463_v18 = vld [vmem:[#allocation2 + $0x14c] sm:$0x1]  ;;  %v309_v59 = vmin.f32 %v245_v34, 6.0  ;;  %v4690_v34 = vpack.c.bf16 %v4806_v22, %v4806_v22  ;;  %v4791_v22 = vround.rtne.f32 %v357_v4  ;;  %v6008_v8 = vpop.permute.xlu1 %2372 }
 0x10b   :  { %2415 = vrot.lane.b32.xlu1 %v5923_v11, %s4900_s6  ;;  %v1464_v15 = vsel %vm5215_vm13, %v1069_v2, %v1463_v18  ;;  %v5998_v18 = vpop.permute.xlu0 %2294  ;;  %8101 = vst [vmem:[#allocation50_spill] sm:$0xff] %v6008_v8  ;;  %v2125_v4 = vrot.slane %v2123_v47, 4  ;;  %v6024_v47 = vld [vmem:[#allocation2 + $0xc8] sm:$0x1] }
 0x10c   :  { %1465 = vst [vmem:[#allocation2 + $0x14c] sm:$0x1] %v1464_v15  ;;  %v373_v41 = vmul.f32 42.5, %v309_v59  ;;  %8099 = vst [vmem:[#allocation49_spill] sm:$0xff] %v5998_v18  ;;  %v1071_v2 = vshrl.u32 %v4690_v34, 16  ;;  %v1074_v15 = vshll.u32 %v4690_v34, 16 }
 0x10d   :  { %2440 = vrot.lane.b32.xlu0 %v5335_v27, %s4901_s20  ;;  %v2142_v28 = vshll.u32 %v6024_v47, 16 }
 0x10e   :  { %v4807_v19 = vround.rtne.f32 %v373_v41  ;;  %v1073_v41 = vrot.slane %v1071_v2, 7  ;;  %v4674_v2 = vpack.c.bf16 %v4790_v23, %v4790_v23  ;;  %v167_v23 = vld [vmem:[%s7964_s1 + $0x128] sm:$0xff] }
 0x10f   :  { %2419 = vrot.lane.b32.xlu1 %v5938_v56, %s4900_s6  ;;  %v6010_v7 = vpop.permute.xlu0 %2298 }
 0x110   :  { %v4691_v59 = vpack.c.bf16 %v4807_v19, %v4807_v19  ;;  %v2132_v19 = vshll.u32 %v5961_v46, 16  ;;  %v1076_v34 = vor.u32 %v1074_v15, %v1073_v41  ;;  %v1077_v18 = vrot.slane %v1073_v41, 4  ;;  %8102 = vst [vmem:[#allocation51_spill] sm:$0xff] %v6010_v7  ;;  %v6028_v41 = vld [vmem:[#allocation2 + $0xd8] sm:$0xf] }
 0x111   :  { %2444 = vrot.lane.b32.xlu0 %v8090_v12, %s4901_s20  ;;  %v935_v8 = vshrl.u32 %v4674_v2, 16 }
 0x113   :  { %2423 = vrot.lane.b32.xlu1 %v5799_v31, %s4900_s6 }
 0x115   :  { %2448 = vrot.lane.b32.xlu0 %v8091_v33, %s4901_s20  ;;  %v2128_v33 = vrot.slane %v2126_v49, 5  ;;  %v6026_v49 = vrot.slane %v2132_v19, 5  ;;  %v231_v19 = vmax.f32 %v167_v23, 0.0 }
 0x117   :  { %2427 = vrot.lane.b32.xlu1 %v5806_v1, %s4900_s6  ;;  %v1467_v1 = vsel %vm5209_vm12, %v1076_v34, %v1466_v39  ;;  %v8104_v39 = vld [vmem:[#allocation7_spill] sm:$0xff] }
 0x118   :  { %1468 = vst [vmem:[#allocation2 + $0x150] sm:$0xf] %v1467_v1 }
 0x119   :  { %2452 = vrot.lane.b32.xlu0 %v8094_v26, %s4901_s20  ;;  %v1079_v26 = vshrl.u32 %v4691_v59, 16 }
 0x11b   :  { %2431 = vrot.lane.b32.xlu1 %v5979_v30, %s4900_s6  ;;  %v1082_v30 = vshll.u32 %v4691_v59, 16  ;;  %v1081_v36 = vrot.slane %v1079_v26, 7  ;;  %v4675_v59 = vpack.c.bf16 %v4791_v22, %v4791_v22  ;;  %v166_v26 = vld [vmem:[%s7964_s1 + $0x120] sm:$0xff] }
 0x11c   :  { %v230_v55 = vmax.f32 %v166_v26, 0.0  ;;  %v2979_v26 = vld [vmem:[#allocation2 + $0xdc] sm:$0xf] }
 0x11d   :  { %2456 = vrot.lane.b32.xlu0 %v8096_v42, %s4901_s20  ;;  %v1084_v25 = vor.u32 %v1082_v30, %v1081_v36  ;;  %v1086_v15 = vrot.slane %v1081_v36, 4  ;;  %v938_v30 = vshll.u32 %v4674_v2, 16  ;;  %v943_v36 = vshrl.u32 %v4675_v59, 16  ;;  %v8105_v2 = vld [vmem:[#allocation14_spill] sm:$0xff] }
 0x11e   :  { %v946_v1 = vshll.u32 %v4675_v59, 16  ;;  %v6037_v59 = vpop.permute.xlu1 %2290 }
 0x11f   :  { %2438 = vrot.lane.b32.xlu1 %v8097_v61, %s4901_s20  ;;  %v1085_v22 = vsel %vm5199_vm11, %v1077_v18, %v1084_v25  ;;  %v1471_v34 = vsel %vm5215_vm13, %v1086_v15, %v1470_v10  ;;  %v945_v7 = vrot.slane %v943_v36, 7  ;;  %8106 = vst [vmem:[#allocation7_spill] sm:$0xff] %v6037_v59  ;;  %v8107_v15 = vld [vmem:[#allocation9_spill] sm:$0xff]  ;;  %v6043_v36 = vpop.permute.xlu0 %2302 }
 0x120   :  { %1469 = vst.msk [vmem:[#allocation2 + $0x154] sm:$0xf] %vm20_vm0, %v1085_v22  ;;  %1472 = vst [vmem:[#allocation2 + $0x158] sm:$0x1] %v1471_v34  ;;  %v294_v34 = vmin.f32 %v230_v55, 6.0  ;;  %v8109_v55 = vld [vmem:[#allocation16_spill] sm:$0xff] }
 0x121   :  { %2460 = vrot.lane.b32.xlu0 %v5702_v58, %s4901_s20  ;;  %8108 = vst [vmem:[#allocation52_spill] sm:$0xff] %v6043_v36  ;;  %v948_v23 = vor.u32 %v946_v1, %v945_v7  ;;  %v950_v22 = vrot.slane %v945_v7, 4  ;;  %v182_v7 = vld [vmem:[%s7964_s1 + $0x1a0] sm:$0xff]  ;;  %v3042_v1 = vshll.u32 %v2979_v26, 16 }
 0x122   :  { %v358_v59 = vmul.f32 42.5, %v294_v34  ;;  %v183_v34 = vld [vmem:[%s7964_s1 + $0x1a8] sm:$0xff]  ;;  %v1421_v36 = vld [vmem:[#allocation2 + $0x104] sm:$0x1] }
 0x123   :  { %2442 = vrot.lane.b32.xlu1 %v8100_v16, %s4901_s20  ;;  %v6066_v58 = vpop.permute.xlu0 %2306 }
 0x124   :  { %8111 = vst [vmem:[#allocation53_spill] sm:$0xff] %v6066_v58 }
 0x125   :  { %2464 = vrot.lane.b32.xlu0 %v5775_v45, %s4901_s20  ;;  %v2138_v45 = vrot.slane %v2136_v24, 4  ;;  %v937_v24 = vrot.slane %v935_v8, 7  ;;  %v1414_v8 = vld [vmem:[#allocation2 + $0xf8] sm:$0x1] }
 0x127   :  { %2446 = vrot.lane.b32.xlu1 %v8103_v20, %s4901_s20  ;;  %v2129_v20 = vor.u32 %v2128_v33, %v2125_v4  ;;  %v940_v25 = vor.u32 %v938_v30, %v937_v24  ;;  %v941_v18 = vrot.slane %v937_v24, 4  ;;  %v2139_v10 = vor.u32 %v2138_v45, %v6026_v49 }
 0x128   :  { %v295_v4 = vmin.f32 %v231_v19, 6.0  ;;  %v3036_v30 = vshll.u32 %v6028_v41, 16  ;;  %v1415_v24 = vsel %vm5215_vm13, %v950_v22, %v1414_v8  ;;  %v4792_v8 = vround.rtne.f32 %v358_v59 }
 0x129   :  { %2471 = vrot.lane.b32.xlu0 %v8104_v39, %s4902_s10  ;;  %v1410_v39 = vld [vmem:[#allocation2 + $0xf0] sm:$0xf]  ;;  %v949_v45 = vsel %vm5199_vm11, %v941_v18, %v948_v23  ;;  %1416 = vst [vmem:[#allocation2 + $0xf8] sm:$0x1] %v1415_v24  ;;  %v2130_v19 = vrot.slane %v2129_v20, 4  ;;  %v2144_v18 = vrot.slane %v2142_v28, 5  ;;  %v6061_v23 = vpop.permute.xlu1 %2292 }
 0x12a   :  { %v1411_v33 = vsel %vm5209_vm12, %v940_v25, %v1410_v39  ;;  %v3046_v39 = vshrl.u32 %v2979_v26, 16  ;;  %1413 = vst.msk [vmem:[#allocation2 + $0xf4] sm:$0xf] %vm20_vm0, %v949_v45  ;;  %v2140_v25 = vrot.slane %v2139_v10, 4  ;;  %8110 = vst [vmem:[#allocation16_spill] sm:$0xff] %v6061_v23  ;;  %v359_v22 = vmul.f32 42.5, %v295_v4 }
 0x12b   :  { %2450 = vrot.lane.b32.xlu1 %v8105_v2, %s4901_s20  ;;  %v3033_v2 = vshrl.u32 %v6028_v41, 16  ;;  %1412 = vst [vmem:[#allocation2 + $0xf0] sm:$0xf] %v1411_v33  ;;  %v246_v33 = vmax.f32 %v182_v7, 0.0  ;;  %v3038_v45 = vrot.slane %v3036_v30, 5  ;;  %v8112_v20 = vld [vmem:[#allocation18_spill] sm:$0xff]  ;;  %v2135_v4 = vsel %vm5192_vm10, %v2130_v19, %v6026_v49 }
 0x12c   :  { %v2980_v28 = vld [vmem:[#allocation2 + $0xe0] sm:$0x1]  ;;  %v6070_v10 = vrot.slane %v3042_v1, 5  ;;  %v3048_v24 = vrot.slane %v3046_v39, 4  ;;  %v3466_v59 = vrot.slane %v2979_v26, 5  ;;  %v2145_v23 = vsel %vm5192_vm10, %v2140_v25, %v2144_v18 }
 0x12d   :  { %2475 = vrot.lane.b32.xlu0 %v8107_v15, %s4902_s10  ;;  %v3035_v44 = vrot.slane %v3033_v2, 4  ;;  %v4676_v2 = vpack.c.bf16 %v4792_v8, %v4792_v8  ;;  %v247_v30 = vmax.f32 %v183_v34, 0.0  ;;  %v4793_v7 = vround.rtne.f32 %v359_v22  ;;  %v6084_v49 = vpop.permute.xlu1 %2296  ;;  %v6087_v18 = vld [vmem:[#allocation2 + $0x138] sm:$0xf] }
 0x12e   :  { %v310_v58 = vmin.f32 %v246_v33, 6.0  ;;  %v4567_v1 = vrot.slane %v6028_v41, 9  ;;  %v6082_v26 = vcombine.low %v2135_v4, %v2145_v23  ;;  %8114 = vst [vmem:[#allocation55_spill] sm:$0xff] %v6084_v49  ;;  %v3049_v39 = vor.u32 %v3048_v24, %v6070_v10 }
 0x12f   :  { %2454 = vrot.lane.b32.xlu1 %v8109_v55, %s4901_s20  ;;  %v3039_v37 = vor.u32 %v3038_v45, %v3035_v44  ;;  %v3468_v19 = vrot.slane %v3466_v59, 4  ;;  %v3469_v25 = vrot.slane %v2980_v28, 5  ;;  %v6091_v44 = vpop.permute.xlu0 %2310  ;;  %v952_v8 = vshrl.u32 %v4676_v2, 16 }
 0x130   :  { %8113 = vst [vmem:[#allocation54_spill] sm:$0xff] %v6082_v26  ;;  %8115 = vst [vmem:[#allocation56_spill] sm:$0xff] %v6091_v44  ;;  %v311_v41 = vmin.f32 %v247_v30, 6.0  ;;  %v4677_v34 = vpack.c.bf16 %v4793_v7, %v4793_v7  ;;  %v374_v23 = vmul.f32 42.5, %v310_v58  ;;  %v6098_v45 = vsel %vm5181_vm8, %v4567_v1, %v3466_v59  ;;  %v6117_v7 = vld [vmem:[#allocation2 + $0xe4] sm:$0xf] }
 0x131   :  { %2479 = vrot.lane.b32.xlu0 %v5791_v48, %s4902_s10  ;;  %v3052_v48 = vshll.u32 %v2980_v28, 16  ;;  %v3225_v28 = vshrl.u32 %v6087_v18, 16  ;;  %v6104_v4 = vrot.slane %v3039_v37, 4  ;;  %v6106_v30 = vrot.slane %v3049_v39, 4  ;;  %v6119_v37 = vpop.permute.xlu1 %2300 }
 0x132   :  { %v6110_v58 = vsel %vm5181_vm8, %v3468_v19, %v3469_v25  ;;  %v954_v1 = vrot.slane %v952_v8, 7  ;;  %v955_v22 = vshll.u32 %v4676_v2, 16  ;;  %v375_v24 = vmul.f32 42.5, %v311_v41  ;;  %8116 = vst [vmem:[#allocation57_spill] sm:$0xff] %v6119_v37  ;;  %v184_v41 = vld [vmem:[%s7964_s1 + $0x1b0] sm:$0xff] }
 0x133   :  { %2458 = vrot.lane.b32.xlu1 %v8112_v20, %s4901_s20  ;;  %v6094_v33 = vrot.slane %v3052_v48, 5  ;;  %v6112_v48 = vld [vmem:[#allocation2 + $0x13c] sm:$0xf]  ;;  %v8117_v39 = vrot.slane %v5961_v46, 5  ;;  %v960_v19 = vshrl.u32 %v4677_v34, 16  ;;  %v963_v25 = vshll.u32 %v4677_v34, 16 }
 0x134   :  { %v4808_v44 = vround.rtne.f32 %v374_v23  ;;  %v3228_v59 = vshll.u32 %v6087_v18, 16  ;;  %v3234_v8 = vshll.u32 %v6112_v48, 16  ;;  %v957_v2 = vor.u32 %v955_v22, %v954_v1  ;;  %v8119_v34 = vld [vmem:[#allocation8_spill] sm:$0xff] }
 0x135   :  { %2483 = vrot.lane.b32.xlu0 %v5811_v50, %s4902_s10  ;;  %v6123_v49 = vrot.slane %v8117_v39, 4  ;;  %v6127_v50 = vrot.slane %v3225_v28, 4  ;;  %v185_v39 = vld [vmem:[%s7964_s1 + $0x1b8] sm:$0xff]  ;;  %v3238_v23 = vshrl.u32 %v6112_v48, 16  ;;  %v6140_v28 = vld [vmem:[#allocation2 + $0xe8] sm:$0xf]  ;;  %v4809_v12 = vround.rtne.f32 %v375_v24  ;;  %v6153_v15 = vpop.permute.xlu1 %2304 }
 0x136   :  { %v3057_v37 = vshrl.u32 %v6117_v7, 16  ;;  %v3060_v22 = vshll.u32 %v6117_v7, 16  ;;  %v4692_v11 = vpack.c.bf16 %v4808_v44, %v4808_v44  ;;  %v248_v31 = vmax.f32 %v184_v41, 0.0  ;;  %8121 = vst [vmem:[#allocation59_spill] sm:$0xff] %v6153_v15 }
 0x137   :  { %2462 = vrot.lane.b32.xlu1 %v5673_v60, %s4901_s20  ;;  %v962_v60 = vrot.slane %v960_v19, 7  ;;  %v4693_v19 = vpack.c.bf16 %v4809_v12, %v4809_v12  ;;  %v6163_v41 = vrot.slane %v3234_v8, 5 }
 0x138   :  { %v1088_v51 = vshrl.u32 %v4692_v11, 16  ;;  %v312_v44 = vmin.f32 %v248_v31, 6.0  ;;  %v3059_v31 = vrot.slane %v3057_v37, 4 }
 0x139   :  { %2487 = vrot.lane.b32.xlu0 %v5747_v32, %s4902_s10  ;;  %v1417_v32 = vld [vmem:[#allocation2 + $0xfc] sm:$0xf]  ;;  %v965_v16 = vor.u32 %v963_v25, %v962_v60  ;;  %v967_v20 = vrot.slane %v962_v60, 4  ;;  %v1096_v12 = vshrl.u32 %v4693_v19, 16  ;;  %v1099_v24 = vshll.u32 %v4693_v19, 16 }
 0x13a   :  { %v1418_v40 = vsel %vm5209_vm12, %v957_v2, %v1417_v32  ;;  %v3066_v32 = vshll.u32 %v6140_v28, 16  ;;  %v3230_v2 = vrot.slane %v3228_v59, 5  ;;  %v1477_v59 = vld [vmem:[#allocation2 + $0x164] sm:$0x1] }
 0x13b   :  { %2466 = vrot.lane.b32.xlu1 %v6082_v26, %s4901_s20  ;;  %1419 = vst [vmem:[#allocation2 + $0xfc] sm:$0xf] %v1418_v40  ;;  %v1422_v60 = vsel %vm5215_vm13, %v967_v20, %v1421_v36  ;;  %v6167_v36 = vld [vmem:[#allocation2 + $0x140] sm:$0x1]  ;;  %v1098_v15 = vrot.slane %v1096_v12, 7 }
 0x13c   :  { %1423 = vst [vmem:[#allocation2 + $0x104] sm:$0x1] %v1422_v60  ;;  %v6171_v19 = vrot.slane %v3066_v32, 5  ;;  %v3231_v32 = vor.u32 %v3230_v2, %v6127_v50  ;;  %v8125_v50 = vrot.slane %v5959_v52, 9 }
 0x13d   :  { %2491 = vrot.lane.b32.xlu0 %v5847_v29, %s4902_s10  ;;  %v249_v29 = vmax.f32 %v185_v39, 0.0  ;;  %v3240_v39 = vrot.slane %v3238_v23, 4  ;;  %v6175_v23 = vld [vmem:[#allocation2 + $0xec] sm:$0x1]  ;;  %v1103_v37 = vrot.slane %v1098_v15, 4 }
 0x13e   :  { %v3076_v2 = vshll.u32 %v6175_v23, 16 }
 0x13f   :  { %v6125_v26 = vpop.permute.xlu0 %2314  ;;  %2473 = vrot.lane.b32.xlu1 %v8119_v34, %s4902_s10  ;;  %v313_v25 = vmin.f32 %v249_v29, 6.0 }
 0x140   :  { %8118 = vst [vmem:[#allocation58_spill] sm:$0xff] %v6125_v26  ;;  %v958_v26 = vrot.slane %v954_v1, 4  ;;  %v3070_v1 = vshrl.u32 %v6140_v28, 16 }
 0x141   :  { %2495 = vrot.lane.b32.xlu0 %v5857_v53, %s4902_s10  ;;  %v1091_v53 = vshll.u32 %v4692_v11, 16  ;;  %v1090_v11 = vrot.slane %v1088_v51, 7  ;;  %v3062_v51 = vrot.slane %v3060_v22, 5  ;;  %v377_v60 = vmul.f32 42.5, %v313_v25 }
 0x142   :  { %v966_v40 = vsel %vm5199_vm11, %v958_v26, %v965_v16  ;;  %v376_v16 = vmul.f32 42.5, %v312_v44  ;;  %v3072_v29 = vrot.slane %v3070_v1, 4  ;;  %v6179_v44 = vpop.permute.xlu1 %2308  ;;  %v3045_v22 = vsel %vm5192_vm10, %v6104_v4, %v6070_v10 }
 0x143   :  { %v6148_v42 = vpop.permute.xlu0 %2374  ;;  %2477 = vrot.lane.b32.xlu1 %v5648_v9, %s4902_s10  ;;  %1420 = vst.msk [vmem:[#allocation2 + $0x100] sm:$0xf] %vm20_vm0, %v966_v40  ;;  %v1093_v20 = vor.u32 %v1091_v53, %v1090_v11  ;;  %v1101_v40 = vor.u32 %v1099_v24, %v1098_v15  ;;  %8123 = vst [vmem:[#allocation61_spill] sm:$0xff] %v6179_v44  ;;  %v3055_v1 = vsel %vm5192_vm10, %v6106_v30, %v6094_v33 }
 0x144   :  { %8120 = vst [vmem:[#allocation8_spill] sm:$0xff] %v6148_v42  ;;  %v1473_v42 = vld [vmem:[#allocation2 + $0x15c] sm:$0xf]  ;;  %v4810_v8 = vround.rtne.f32 %v376_v16  ;;  %v3241_v15 = vor.u32 %v3240_v39, %v6163_v41  ;;  %v1478_v10 = vsel %vm5215_vm13, %v1103_v37, %v1477_v59  ;;  %v8124_v33 = vrot.slane %v5961_v46, 5 }
 0x145   :  { %2499 = vrot.lane.b32.xlu0 %v5882_v35, %s4902_s10  ;;  %v1094_v35 = vrot.slane %v1090_v11, 4  ;;  %v1474_v53 = vsel %vm5209_vm12, %v1093_v20, %v1473_v42  ;;  %v3244_v11 = vshll.u32 %v6167_v36, 16  ;;  %v8126_v24 = vrot.slane %v6024_v47, 5  ;;  %1479 = vst [vmem:[#allocation2 + $0x164] sm:$0x1] %v1478_v10 }
 0x146   :  { %1475 = vst [vmem:[#allocation2 + $0x15c] sm:$0xf] %v1474_v53  ;;  %v4694_v4 = vpack.c.bf16 %v4810_v8, %v4810_v8  ;;  %v2152_v30 = vsel %vm5181_vm8, %v8125_v50, %v8124_v33  ;;  %v3063_v25 = vor.u32 %v3062_v51, %v3059_v31  ;;  %v4601_v46 = vcombine.low %v3045_v22, %v3055_v1 }
 0x147   :  { %v6165_v26 = vpop.permute.xlu0 %2378  ;;  %2481 = vrot.lane.b32.xlu1 %v5692_v3, %s4902_s10  ;;  %v1102_v12 = vsel %vm5199_vm11, %v1094_v35, %v1101_v40  ;;  %v2155_v35 = vsel %vm5181_vm8, %v6123_v49, %v8126_v24  ;;  %v3073_v52 = vor.u32 %v3072_v29, %v6171_v19  ;;  %v4811_v39 = vround.rtne.f32 %v377_v60  ;;  %v168_v29 = vld [vmem:[%s7964_s1 + $0x130] sm:$0xff]  ;;  %v6235_v60 = vld [vmem:[#allocation2 + $0x144] sm:$0xf] }
 0x148   :  { %8122 = vst [vmem:[#allocation60_spill] sm:$0xff] %v6165_v26  ;;  %1476 = vst.msk [vmem:[#allocation2 + $0x160] sm:$0xf] %vm20_vm0, %v1102_v12  ;;  %v4617_v47 = vcombine.low %v6098_v45, %v6110_v58  ;;  %v3232_v16 = vrot.slane %v3231_v32, 4  ;;  %v3522_v20 = vrot.slane %v6112_v48, 5  ;;  %v1105_v49 = vshrl.u32 %v4694_v4, 16  ;;  %v6232_v58 = vpop.permute.xlu1 %2312 }
 0x149   :  { %2506 = vrot.lane.b32.xlu0 %v5891_v17, %s4903_s19  ;;  %v6219_v31 = vcombine.low %v2152_v30, %v2155_v35  ;;  %v3242_v59 = vrot.slane %v3241_v15, 4  ;;  %v3246_v8 = vrot.slane %v3244_v11, 5  ;;  %v4575_v40 = vrot.slane %v6087_v18, 9  ;;  %v169_v45 = vld [vmem:[%s7964_s1 + $0x138] sm:$0xff]  ;;  %8129 = vst [vmem:[#allocation64_spill] sm:$0xff] %v6232_v58 }
 0x14a   :  { %v3525_v48 = vrot.slane %v6167_v36, 5  ;;  %v3064_v53 = vrot.slane %v3063_v25, 4  ;;  %v3078_v37 = vrot.slane %v3076_v2, 5  ;;  %v3473_v18 = vrot.slane %v6140_v28, 5 }
 0x14b   :  { %v6191_v42 = vpop.permute.xlu0 %2382  ;;  %2485 = vrot.lane.b32.xlu1 %v5712_v13, %s4902_s10  ;;  %8127 = vst [vmem:[#allocation62_spill] sm:$0xff] %v6219_v31  ;;  %v3074_v22 = vrot.slane %v3073_v52, 4  ;;  %v4695_v1 = vpack.c.bf16 %v4811_v39, %v4811_v39  ;;  %v6239_v32 = vrot.slane %v1105_v49, 7  ;;  %v1108_v11 = vshll.u32 %v4694_v4, 16 }
 0x14c   :  { %v3237_v15 = vsel %vm5192_vm10, %v3232_v16, %v6163_v41  ;;  %v3524_v12 = vrot.slane %v3522_v20, 4  ;;  %v232_v10 = vmax.f32 %v168_v29, 0.0  ;;  %v233_v36 = vmax.f32 %v169_v45, 0.0 }
 0x14d   :  { %2510 = vrot.lane.b32.xlu0 %v5901_v38, %s4903_s19  ;;  %v3247_v50 = vsel %vm5192_vm10, %v3242_v59, %v3246_v8  ;;  %v3249_v30 = vshrl.u32 %v6235_v60, 16  ;;  %v3252_v24 = vshll.u32 %v6235_v60, 16  ;;  %v4568_v35 = vrot.slane %v6117_v7, 9  ;;  %v1480_v59 = vld [vmem:[#allocation2 + $0x168] sm:$0xf] }
 0x14e   :  { %v6255_v41 = vcombine.low %v6117_v7, %v6140_v28  ;;  %v6259_v4 = vsel %vm5181_vm8, %v4575_v40, %v3522_v20  ;;  %v3475_v25 = vrot.slane %v3473_v18, 4  ;;  %v3476_v2 = vrot.slane %v6175_v23, 5  ;;  %v6270_v7 = vld [vmem:[#allocation2 + $0x148] sm:$0xf] }
 0x14f   :  { %v6221_v51 = vpop.permute.xlu0 %2386  ;;  %2489 = vrot.lane.b32.xlu1 %v5723_v43, %s4902_s10  ;;  %v3069_v52 = vsel %vm5192_vm10, %v3064_v53, %v6171_v19  ;;  %v3079_v39 = vsel %vm5192_vm10, %v3074_v22, %v3078_v37  ;;  %v1110_v28 = vor.u32 %v1108_v11, %v6239_v32  ;;  %v1113_v16 = vshrl.u32 %v4695_v1, 16 }
 0x150   :  { %8128 = vst [vmem:[#allocation63_spill] sm:$0xff] %v6221_v51  ;;  %v6275_v49 = vcombine.low %v3237_v15, %v3247_v50  ;;  %v6279_v23 = vsel %vm5181_vm8, %v3524_v12, %v3525_v48  ;;  %v296_v19 = vmin.f32 %v232_v10, 6.0  ;;  %v297_v8 = vmin.f32 %v233_v36, 6.0 }
 0x151   :  { %3740 = vrot.lane.b32.xlu0 %v4601_v46, %s4899_s8  ;;  %v6262_v46 = vld [vmem:[#allocation2 + $0x150] sm:$0xf]  ;;  %v3474_v29 = vsel %vm5181_vm8, %v4568_v35, %v3473_v18  ;;  %v3251_v45 = vrot.slane %v3249_v30, 4  ;;  %v3254_v53 = vrot.slane %v3252_v24, 5  ;;  %v6290_v22 = vcombine.low %v3069_v52, %v3079_v39 }
 0x152   :  { %8132 = vst [vmem:[#allocation67_spill] sm:$0xff] %v6275_v49  ;;  %v3273_v37 = vshrl.u32 %v6262_v46, 16  ;;  %v3477_v48 = vsel %vm5181_vm8, %v3475_v25, %v3476_v2  ;;  %v3276_v11 = vshll.u32 %v6262_v46, 16  ;;  %v1116_v15 = vshll.u32 %v4695_v1, 16  ;;  %v170_v25 = vld [vmem:[%s7964_s1 + $0x140] sm:$0xff] }
 0x153   :  { %v6244_v33 = vpop.permute.xlu0 %2390  ;;  %2493 = vrot.lane.b32.xlu1 %v5757_v62, %s4902_s10  ;;  %v3262_v18 = vshrl.u32 %v6270_v7, 16  ;;  %v1115_v10 = vrot.slane %v1113_v16, 7  ;;  %v1481_v36 = vsel %vm5209_vm12, %v1110_v28, %v1480_v59  ;;  %v1111_v24 = vrot.slane %v6239_v32, 4 }
 0x154   :  { %8130 = vst [vmem:[#allocation65_spill] sm:$0xff] %v6244_v33  ;;  %1482 = vst [vmem:[#allocation2 + $0x168] sm:$0xf] %v1481_v36  ;;  %v360_v35 = vmul.f32 42.5, %v296_v19  ;;  %v361_v1 = vmul.f32 42.5, %v297_v8  ;;  %v6310_v52 = vcombine.low %v3474_v29, %v3477_v48  ;;  %v3255_v39 = vor.u32 %v3254_v53, %v3251_v45 }
 0x155   :  { %3820 = vrot.lane.b32.xlu0 %v4617_v47, %s4898_s5  ;;  %v6273_v20 = vpop.permute.xlu1 %2316  ;;  %v6281_v47 = vld [vmem:[#allocation2 + $0x154] sm:$0xf]  ;;  %v3258_v28 = vshll.u32 %v6270_v7, 16  ;;  %v3275_v16 = vrot.slane %v3273_v37, 4  ;;  %v3278_v59 = vrot.slane %v3276_v11, 5  ;;  %v1118_v32 = vor.u32 %v1116_v15, %v1115_v10 }
 0x156   :  { %8131 = vst [vmem:[#allocation66_spill] sm:$0xff] %v6273_v20  ;;  %v3282_v12 = vshll.u32 %v6281_v47, 16  ;;  %v3286_v30 = vshrl.u32 %v6281_v47, 16  ;;  %v4794_v36 = vround.rtne.f32 %v360_v35  ;;  %v4795_v19 = vround.rtne.f32 %v361_v1  ;;  %v1484_v8 = vld [vmem:[#allocation2 + $0x170] sm:$0x1]  ;;  %v171_v20 = vld [vmem:[%s7964_s1 + $0x148] sm:$0xff] }
 0x157   :  { %v6283_v40 = vpop.permute.xlu0 %2394  ;;  %2497 = vrot.lane.b32.xlu1 %v5785_v0, %s4902_s10  ;;  %v3264_v29 = vrot.slane %v3262_v18, 4  ;;  %v1120_v53 = vrot.slane %v1115_v10, 4  ;;  %v234_v37 = vmax.f32 %v170_v25, 0.0  ;;  %v6324_v11 = vld [vmem:[#allocation2 + $0x158] sm:$0x1]  ;;  %v1119_v15 = vsel %vm5199_vm11, %v1111_v24, %v1118_v32 }
 0x158   :  { %8133 = vst [vmem:[#allocation68_spill] sm:$0xff] %v6283_v40  ;;  %v6320_v45 = vrot.slane %v3282_v12, 5  ;;  %v3288_v40 = vrot.slane %v3286_v30, 4  ;;  %v4678_v35 = vpack.c.bf16 %v4794_v36, %v4794_v36  ;;  %v4679_v1 = vpack.c.bf16 %v4795_v19, %v4795_v19  ;;  %1483 = vst.msk [vmem:[#allocation2 + $0x16c] sm:$0xf] %vm20_vm0, %v1119_v15 }
 0x159   :  { %3855 = vrot.lane.b32.xlu0 %v6255_v41, %s4900_s6  ;;  %v6301_v50 = vpop.permute.xlu1 %2376  ;;  %v6330_v58 = vrot.slane %v3258_v28, 5  ;;  %v1485_v18 = vsel %vm5215_vm13, %v1120_v53, %v1484_v8  ;;  %v235_v12 = vmax.f32 %v171_v20, 0.0  ;;  %v298_v10 = vmin.f32 %v234_v37, 6.0  ;;  %v6337_v30 = vld [vmem:[#allocation2 + $0x14c] sm:$0x1] }
 0x15a   :  { %8134 = vst [vmem:[#allocation69_spill] sm:$0xff] %v6301_v50  ;;  %v3279_v25 = vor.u32 %v3278_v59, %v3275_v16  ;;  %v969_v24 = vshrl.u32 %v4678_v35, 16  ;;  %v972_v32 = vshll.u32 %v4678_v35, 16  ;;  %v977_v36 = vshrl.u32 %v4679_v1, 16  ;;  %1486 = vst [vmem:[#allocation2 + $0x170] sm:$0x1] %v1485_v18 }
 0x15b   :  { %v6308_v2 = vpop.permute.xlu0 %2401  ;;  %2501 = vrot.lane.b32.xlu1 %v6219_v31, %s4902_s10  ;;  %v3292_v28 = vshll.u32 %v6324_v11, 16  ;;  %v980_v19 = vshll.u32 %v4679_v1, 16  ;;  %v299_v15 = vmin.f32 %v235_v12, 6.0  ;;  %v362_v8 = vmul.f32 42.5, %v298_v10  ;;  %v1424_v33 = vld [vmem:[#allocation2 + $0x108] sm:$0xf] }
 0x15c   :  { %v6344_v53 = vrot.slane %v3255_v39, 4  ;;  %v3289_v37 = vor.u32 %v3288_v40, %v6320_v45  ;;  %v979_v16 = vrot.slane %v977_v36, 7  ;;  %v3265_v35 = vor.u32 %v3264_v29, %v6330_v58 }
 0x15d   :  { %3890 = vrot.lane.b32.xlu0 %v6290_v22, %s4901_s20  ;;  %v6322_v48 = vpop.permute.xlu1 %2380  ;;  %v3268_v18 = vshll.u32 %v6337_v30, 16  ;;  %v4796_v1 = vround.rtne.f32 %v362_v8  ;;  %v6356_v39 = vcombine.low %v6262_v46, %v6281_v47  ;;  %v3280_v29 = vrot.slane %v3279_v25, 4 }
 0x15e   :  { %8135 = vst [vmem:[#allocation70_spill] sm:$0xff] %v6322_v48  ;;  %v971_v48 = vrot.slane %v969_v24, 7  ;;  %v982_v10 = vor.u32 %v980_v19, %v979_v16  ;;  %v3294_v24 = vrot.slane %v3292_v28, 5  ;;  %v984_v36 = vrot.slane %v979_v16, 4  ;;  %v6388_v16 = vld [vmem:[#allocation2 + $0xf0] sm:$0xf] }
 0x15f   :  { %v6328_v26 = vpop.permute.xlu0 %2405  ;;  %2508 = vrot.lane.b32.xlu1 %v5814_v5, %s4903_s19  ;;  %8138 = vst [vmem:[#allocation73_spill] sm:$0xff] %v6356_v39  ;;  %v363_v50 = vmul.f32 42.5, %v299_v15  ;;  %v3290_v8 = vrot.slane %v3289_v37, 4  ;;  %v3270_v19 = vrot.slane %v3268_v18, 5  ;;  %v3536_v25 = vrot.slane %v6281_v47, 5 }
 0x160   :  { %8136 = vst [vmem:[#allocation71_spill] sm:$0xff] %v6328_v26  ;;  %v974_v40 = vor.u32 %v972_v32, %v971_v48  ;;  %v975_v12 = vrot.slane %v971_v48, 4  ;;  %v4680_v32 = vpack.c.bf16 %v4796_v1, %v4796_v1  ;;  %v3266_v48 = vrot.slane %v3265_v35, 4 }
 0x161   :  { %3925 = vrot.lane.b32.xlu0 %v6310_v52, %s4902_s10  ;;  %v6342_v20 = vpop.permute.xlu1 %2384  ;;  %v6374_v28 = vcombine.low %v6259_v4, %v6279_v23  ;;  %v4576_v15 = vrot.slane %v6235_v60, 9  ;;  %v6381_v37 = vcombine.low %v6235_v60, %v6270_v7  ;;  %v6390_v4 = vld [vmem:[#allocation2 + $0xf4] sm:$0xf]  ;;  %v4797_v23 = vround.rtne.f32 %v363_v50 }
 0x162   :  { %v1425_v31 = vsel %vm5209_vm12, %v974_v40, %v1424_v33  ;;  %v3261_v60 = vsel %vm5192_vm10, %v6344_v53, %v6330_v58  ;;  %v986_v18 = vshrl.u32 %v4680_v32, 16  ;;  %v3271_v1 = vsel %vm5192_vm10, %v3266_v48, %v3270_v19  ;;  %v186_v58 = vld [vmem:[%s7964_s1 + $0x1c0] sm:$0xff] }
 0x163   :  { %v6347_v59 = vpop.permute.xlu0 %2409  ;;  %2512 = vrot.lane.b32.xlu1 %v5827_v57, %s4903_s19  ;;  %v983_v57 = vsel %vm5199_vm11, %v975_v12, %v982_v10  ;;  %1426 = vst [vmem:[#allocation2 + $0x108] sm:$0xf] %v1425_v31  ;;  %8141 = vst [vmem:[#allocation76_spill] sm:$0xff] %v6374_v28  ;;  %v8142_v31 = vrot.slane %v6270_v7, 5  ;;  %v4577_v50 = vrot.slane %v6262_v46, 9  ;;  %v3538_v12 = vrot.slane %v3536_v25, 4 }
 0x164   :  { %8137 = vst [vmem:[#allocation72_spill] sm:$0xff] %v6347_v59  ;;  %v1428_v59 = vld [vmem:[#allocation2 + $0x110] sm:$0x1]  ;;  %1427 = vst.msk [vmem:[#allocation2 + $0x10c] sm:$0xf] %vm20_vm0, %v983_v57  ;;  %v3532_v57 = vrot.slane %v6337_v30, 5  ;;  %v3285_v30 = vsel %vm5192_vm10, %v3280_v29, %v6320_v45 }
 0x165   :  { %2522 = vrot.lane.b32.xlu0 %v5938_v56, %s4903_s19  ;;  %v6360_v38 = vpop.permute.xlu1 %2388  ;;  %v1429_v33 = vsel %vm5215_vm13, %v984_v36, %v1428_v59  ;;  %v3531_v47 = vrot.slane %v8142_v31, 4  ;;  %v3295_v59 = vsel %vm5192_vm10, %v3290_v8, %v3294_v24  ;;  %v3539_v10 = vrot.slane %v6324_v11, 5 }
 0x166   :  { %8139 = vst [vmem:[#allocation74_spill] sm:$0xff] %v6360_v38  ;;  %1430 = vst [vmem:[#allocation2 + $0x110] sm:$0x1] %v1429_v33  ;;  %v3081_v45 = vshrl.u32 %v6388_v16, 16  ;;  %v3084_v53 = vshll.u32 %v6388_v16, 16  ;;  %v3090_v29 = vshll.u32 %v6390_v4, 16  ;;  %v6420_v11 = vcombine.low %v3285_v30, %v3295_v59 }
 0x167   :  { %v6366_v13 = vpop.permute.xlu0 %2413  ;;  %3756 = vrot.lane.b32.xlu1 %v6275_v49, %s4899_s8  ;;  %v3094_v46 = vshrl.u32 %v6390_v4, 16  ;;  %v4681_v24 = vpack.c.bf16 %v4797_v23, %v4797_v23  ;;  %v988_v36 = vrot.slane %v986_v18, 7  ;;  %v989_v8 = vshll.u32 %v4680_v32, 16  ;;  %v1442_v38 = vld [vmem:[#allocation2 + $0x128] sm:$0x1] }
 0x168   :  { %8140 = vst [vmem:[#allocation75_spill] sm:$0xff] %v6366_v13  ;;  %v250_v19 = vmax.f32 %v186_v58, 0.0  ;;  %v6424_v33 = vcombine.low %v3261_v60, %v3271_v1  ;;  %v3530_v13 = vsel %vm5181_vm8, %v4576_v15, %v8142_v31  ;;  %v3083_v32 = vrot.slane %v3081_v45, 4  ;;  %v1431_v1 = vld [vmem:[#allocation2 + $0x114] sm:$0xf] }
 0x169   :  { %3976 = vrot.lane.b32.xlu0 %v6356_v39, %s4903_s19  ;;  %v6392_v35 = vpop.permute.xlu1 %2392  ;;  %v3086_v23 = vrot.slane %v3084_v53, 5  ;;  %v6439_v60 = vrot.slane %v3090_v29, 5  ;;  %v3537_v7 = vsel %vm5181_vm8, %v4577_v50, %v3536_v25  ;;  %v3096_v15 = vrot.slane %v3094_v46, 4 }
 0x16a   :  { %8143 = vst [vmem:[#allocation77_spill] sm:$0xff] %v6392_v35  ;;  %8145 = vst [vmem:[#allocation79_spill] sm:$0xff] %v6424_v33  ;;  %v3533_v35 = vsel %vm5181_vm8, %v3531_v47, %v3532_v57  ;;  %v6445_v47 = vld [vmem:[#allocation2 + $0xf8] sm:$0x1]  ;;  %v3540_v57 = vsel %vm5181_vm8, %v3538_v12, %v3539_v10  ;;  %v991_v30 = vor.u32 %v989_v8, %v988_v36  ;;  %v994_v59 = vshrl.u32 %v4681_v24, 16 }
 0x16b   :  { %v6406_v40 = vpop.permute.xlu0 %2417  ;;  %3836 = vrot.lane.b32.xlu1 %v6374_v28, %s4898_s5  ;;  %v314_v45 = vmin.f32 %v250_v19, 6.0  ;;  %v997_v29 = vshll.u32 %v4681_v24, 16  ;;  %v6455_v25 = vcombine.low %v3530_v13, %v3533_v35  ;;  %v3087_v50 = vor.u32 %v3086_v23, %v3083_v32 }
 0x16c   :  { %v3100_v46 = vshll.u32 %v6445_v47, 16  ;;  %v6458_v31 = vcombine.low %v3537_v7, %v3540_v57  ;;  %v3097_v12 = vor.u32 %v3096_v15, %v6439_v60  ;;  %v992_v10 = vrot.slane %v988_v36, 4 }
 0x16d   :  { %2557 = vrot.lane.b32.xlu0 %v8109_v55, %s4904_s7  ;;  %v6422_v48 = vpop.permute.xlu1 %2396  ;;  %v187_v55 = vld [vmem:[%s7964_s1 + $0x1c8] sm:$0xff]  ;;  %8148 = vst [vmem:[#allocation82_spill] sm:$0xff] %v6455_v25  ;;  %v996_v8 = vrot.slane %v994_v59, 7  ;;  %v1432_v24 = vsel %vm5209_vm12, %v991_v30, %v1431_v1  ;;  %v378_v35 = vmul.f32 42.5, %v314_v45  ;;  %v6473_v23 = vcombine.low %v6388_v16, %v6390_v4  ;;  %v1435_v59 = vld [vmem:[#allocation2 + $0x11c] sm:$0x1] }
 0x16e   :  { %8144 = vst [vmem:[#allocation78_spill] sm:$0xff] %v6422_v48  ;;  %v251_v58 = vmax.f32 %v187_v55, 0.0  ;;  %1433 = vst [vmem:[#allocation2 + $0x114] sm:$0xf] %v1432_v24  ;;  %v3102_v36 = vrot.slane %v3100_v46, 5  ;;  %v3098_v7 = vrot.slane %v3097_v12, 4 }
 0x16f   :  { %v6432_v28 = vpop.permute.xlu0 %2421  ;;  %3871 = vrot.lane.b32.xlu1 %v6381_v37, %s4900_s6  ;;  %v999_v32 = vor.u32 %v997_v29, %v996_v8  ;;  %8151 = vst [vmem:[#allocation85_spill] sm:$0xff] %v6473_v23  ;;  %v4812_v30 = vround.rtne.f32 %v378_v35  ;;  %v3480_v46 = vrot.slane %v6390_v4, 5 }
 0x170   :  { %8146 = vst [vmem:[#allocation80_spill] sm:$0xff] %v6432_v28  ;;  %v315_v13 = vmin.f32 %v251_v58, 6.0  ;;  %v1001_v58 = vrot.slane %v996_v8, 4  ;;  %v3103_v24 = vsel %vm5192_vm10, %v3098_v7, %v3102_v36  ;;  %v6496_v8 = vld [vmem:[#allocation2 + $0xfc] sm:$0xf] }
 0x171   :  { %4011 = vrot.lane.b32.xlu0 %v6420_v11, %s4904_s7  ;;  %v6449_v18 = vpop.permute.xlu1 %2403  ;;  %v1000_v15 = vsel %vm5199_vm11, %v992_v10, %v999_v32 }
 0x172   :  { %v379_v57 = vmul.f32 42.5, %v315_v13  ;;  %1434 = vst.msk [vmem:[#allocation2 + $0x118] sm:$0xf] %vm20_vm0, %v1000_v15  ;;  %v1436_v10 = vsel %vm5215_vm13, %v1001_v58, %v1435_v59  ;;  %v4569_v15 = vrot.slane %v6388_v16, 9  ;;  %v3482_v59 = vrot.slane %v3480_v46, 4 }
 0x173   :  { %v6451_v53 = vpop.permute.xlu0 %2425  ;;  %3906 = vrot.lane.b32.xlu1 %v6424_v33, %s4901_s20  ;;  %1437 = vst [vmem:[#allocation2 + $0x11c] sm:$0x1] %v1436_v10  ;;  %v3483_v58 = vrot.slane %v6445_v47, 5  ;;  %v3108_v16 = vshll.u32 %v6496_v8, 16 }
 0x174   :  { %8147 = vst [vmem:[#allocation81_spill] sm:$0xff] %v6451_v53  ;;  %v4813_v29 = vround.rtne.f32 %v379_v57 }
 0x175   :  { %2592 = vrot.lane.b32.xlu0 %v5723_v43, %s4905_s12  ;;  %v6465_v19 = vpop.permute.xlu1 %2407  ;;  %v3088_v43 = vrot.slane %v3087_v50, 4  ;;  %v4696_v50 = vpack.c.bf16 %v4812_v30, %v4812_v30 }
 0x176   :  { %8149 = vst [vmem:[#allocation83_spill] sm:$0xff] %v6465_v19  ;;  %v4697_v13 = vpack.c.bf16 %v4813_v29, %v4813_v29  ;;  %v3105_v29 = vshrl.u32 %v6496_v8, 16 }
 0x177   :  { %v6467_v55 = vpop.permute.xlu0 %2429  ;;  %3941 = vrot.lane.b32.xlu1 %v6455_v25, %s4902_s10  ;;  %v3093_v12 = vsel %vm5192_vm10, %v3088_v43, %v6439_v60  ;;  %v1122_v4 = vshrl.u32 %v4696_v50, 16  ;;  %v1125_v35 = vshll.u32 %v4696_v50, 16  ;;  %v6503_v43 = vld [vmem:[#allocation2 + $0x100] sm:$0xf]  ;;  %v1487_v50 = vld [vmem:[#allocation2 + $0x174] sm:$0xf] }
 0x178   :  { %8150 = vst [vmem:[#allocation84_spill] sm:$0xff] %v6467_v55  ;;  %v1130_v30 = vshrl.u32 %v4697_v13, 16  ;;  %v1133_v36 = vshll.u32 %v4697_v13, 16  ;;  %v6507_v7 = vcombine.low %v3093_v12, %v3103_v24  ;;  %v3114_v12 = vshll.u32 %v6503_v43, 16  ;;  %v1491_v24 = vld [vmem:[#allocation2 + $0x17c] sm:$0x1] }
 0x179   :  { %4046 = vrot.lane.b32.xlu0 %v6458_v31, %s4905_s12  ;;  %v6479_v1 = vpop.permute.xlu1 %2411  ;;  %v1124_v57 = vrot.slane %v1122_v4, 7 }
 0x17a   :  { %8152 = vst [vmem:[#allocation86_spill] sm:$0xff] %v6479_v1  ;;  %v1132_v48 = vrot.slane %v1130_v30, 7  ;;  %v3484_v30 = vsel %vm5181_vm8, %v3482_v59, %v3483_v58 }
 0x17b   :  { %v6482_v45 = vpop.permute.xlu0 %2436  ;;  %3960 = vrot.lane.b32.xlu1 %v6473_v23, %s4903_s19  ;;  %v1127_v10 = vor.u32 %v1125_v35, %v1124_v57  ;;  %v1128_v4 = vrot.slane %v1124_v57, 4  ;;  %v172_v35 = vld [vmem:[%s7964_s1 + $0x150] sm:$0xff]  ;;  %v3481_v57 = vsel %vm5181_vm8, %v4569_v15, %v3480_v46  ;;  %v3116_v15 = vrot.slane %v3114_v12, 5 }
 0x17c   :  { %v1135_v47 = vor.u32 %v1133_v36, %v1132_v48  ;;  %v1137_v1 = vrot.slane %v1132_v48, 4  ;;  %v3107_v36 = vrot.slane %v3105_v29, 4  ;;  %v2989_v29 = vld [vmem:[#allocation2 + $0x104] sm:$0x1] }
 0x17d   :  { %3758 = vrot.lane.b32.xlu0 %v6424_v33, %s4899_s8  ;;  %v6498_v32 = vpop.permute.xlu1 %2415  ;;  %v1488_v55 = vsel %vm5209_vm12, %v1127_v10, %v1487_v50  ;;  %v3110_v50 = vrot.slane %v3108_v16, 5  ;;  %v6547_v16 = vcombine.low %v3481_v57, %v3484_v30 }
 0x17e   :  { %8153 = vst [vmem:[#allocation87_spill] sm:$0xff] %v6498_v32  ;;  %1489 = vst [vmem:[#allocation2 + $0x174] sm:$0xf] %v1488_v55  ;;  %v1136_v48 = vsel %vm5199_vm11, %v1128_v4, %v1135_v47  ;;  %v1492_v10 = vsel %vm5215_vm13, %v1137_v1, %v1491_v24  ;;  %v236_v55 = vmax.f32 %v172_v35, 0.0  ;;  %v3124_v47 = vshll.u32 %v2989_v29, 16 }
 0x17f   :  { %v6501_v60 = vpop.permute.xlu0 %2440  ;;  %2541 = vrot.lane.b32.xlu1 %v8097_v61, %s4904_s7  ;;  %v3118_v61 = vshrl.u32 %v6503_v43, 16  ;;  %1490 = vst.msk [vmem:[#allocation2 + $0x178] sm:$0xf] %vm20_vm0, %v1136_v48  ;;  %1493 = vst [vmem:[#allocation2 + $0x17c] sm:$0x1] %v1492_v10  ;;  %v3111_v24 = vor.u32 %v3110_v50, %v3107_v36 }
 0x180   :  { %8154 = vst [vmem:[#allocation88_spill] sm:$0xff] %v6501_v60  ;;  %v300_v4 = vmin.f32 %v236_v55, 6.0  ;;  %v3126_v50 = vrot.slane %v3124_v47, 5 }
 0x181   :  { %3838 = vrot.lane.b32.xlu0 %v6455_v25, %s4898_s5  ;;  %v6514_v13 = vpop.permute.xlu1 %2419  ;;  %v173_v25 = vld [vmem:[%s7964_s1 + $0x158] sm:$0xff]  ;;  %v3120_v59 = vrot.slane %v3118_v61, 4  ;;  %v3112_v57 = vrot.slane %v3111_v24, 4  ;;  %v4570_v24 = vrot.slane %v6496_v8, 9 }
 0x182   :  { %v237_v1 = vmax.f32 %v173_v25, 0.0  ;;  %v364_v35 = vmul.f32 42.5, %v300_v4  ;;  %v6564_v25 = vcombine.low %v6496_v8, %v6503_v43  ;;  %v3487_v4 = vrot.slane %v6503_v43, 5 }
 0x183   :  { %v6518_v32 = vpop.permute.xlu0 %2444  ;;  %3995 = vrot.lane.b32.xlu1 %v6507_v7, %s4904_s7  ;;  %v3121_v61 = vor.u32 %v3120_v59, %v3116_v15  ;;  %v3490_v8 = vrot.slane %v2989_v29, 5 }
 0x184   :  { %8155 = vst [vmem:[#allocation89_spill] sm:$0xff] %v6518_v32  ;;  %v301_v48 = vmin.f32 %v237_v1, 6.0  ;;  %8159 = vst [vmem:[#allocation93_spill] sm:$0xff] %v6564_v25  ;;  %v4798_v55 = vround.rtne.f32 %v364_v35  ;;  %v6587_v32 = vld [vmem:[#allocation2 + $0x15c] sm:$0xf] }
 0x185   :  { %3873 = vrot.lane.b32.xlu0 %v6356_v39, %s4900_s6  ;;  %v6540_v46 = vpop.permute.xlu1 %2423  ;;  %v3122_v36 = vrot.slane %v3121_v61, 4  ;;  %v3117_v61 = vsel %vm5192_vm10, %v3112_v57, %v3116_v15  ;;  %v3488_v15 = vsel %vm5181_vm8, %v4570_v24, %v3487_v4  ;;  %v3297_v29 = vshrl.u32 %v6587_v32, 16 }
 0x186   :  { %8156 = vst [vmem:[#allocation90_spill] sm:$0xff] %v6540_v46  ;;  %v365_v59 = vmul.f32 42.5, %v301_v48  ;;  %v4682_v35 = vpack.c.bf16 %v4798_v55, %v4798_v55 }
 0x187   :  { %v6543_v58 = vpop.permute.xlu0 %2448  ;;  %2576 = vrot.lane.b32.xlu1 %v8119_v34, %s4905_s12  ;;  %v188_v34 = vld [vmem:[%s7964_s1 + $0x1d0] sm:$0xff]  ;;  %v3127_v43 = vsel %vm5192_vm10, %v3122_v36, %v3126_v50  ;;  %v6595_v36 = vld [vmem:[#allocation2 + $0x160] sm:$0xf] }
 0x188   :  { %8157 = vst [vmem:[#allocation91_spill] sm:$0xff] %v6543_v58  ;;  %v189_v58 = vld [vmem:[%s7964_s1 + $0x1d8] sm:$0xff]  ;;  %v4799_v48 = vround.rtne.f32 %v365_v59  ;;  %v1003_v50 = vshrl.u32 %v4682_v35, 16  ;;  %v1006_v59 = vshll.u32 %v4682_v35, 16 }
 0x189   :  { %3908 = vrot.lane.b32.xlu0 %v6420_v11, %s4901_s20  ;;  %v6551_v12 = vpop.permute.xlu1 %2427 }
 0x18a   :  { %8158 = vst [vmem:[#allocation92_spill] sm:$0xff] %v6551_v12  ;;  %v252_v12 = vmax.f32 %v188_v34, 0.0  ;;  %v4683_v57 = vpack.c.bf16 %v4799_v48, %v4799_v48  ;;  %v1005_v24 = vrot.slane %v1003_v50, 7  ;;  %v1438_v48 = vld [vmem:[#allocation2 + $0x120] sm:$0xf] }
 0x18b   :  { %v6553_v10 = vpop.permute.xlu0 %2452  ;;  %4030 = vrot.lane.b32.xlu1 %v6547_v16, %s4905_s12 }
 0x18c   :  { %v316_v53 = vmin.f32 %v252_v12, 6.0  ;;  %v1011_v12 = vshrl.u32 %v4683_v57, 16 }
 0x18d   :  { %3943 = vrot.lane.b32.xlu0 %v6458_v31, %s4902_s10  ;;  %v6566_v30 = vpop.permute.xlu1 %2431 }
 0x18e   :  { %8160 = vst [vmem:[#allocation94_spill] sm:$0xff] %v6566_v30  ;;  %v253_v30 = vmax.f32 %v189_v58, 0.0  ;;  %v6597_v58 = vcombine.low %v3117_v61, %v3127_v43  ;;  %v380_v33 = vmul.f32 42.5, %v316_v53  ;;  %v1013_v43 = vrot.slane %v1011_v12, 7 }
 0x18f   :  { %v6568_v1 = vpop.permute.xlu0 %2456  ;;  %3742 = vrot.lane.b32.xlu1 %v6290_v22, %s4899_s8  ;;  %v3489_v22 = vrot.slane %v3487_v4, 4  ;;  %v3300_v4 = vshll.u32 %v6587_v32, 16  ;;  %v3306_v53 = vshll.u32 %v6595_v36, 16  ;;  %v3299_v12 = vrot.slane %v3297_v29, 4 }
 0x190   :  { %8161 = vst [vmem:[#allocation95_spill] sm:$0xff] %v6568_v1  ;;  %v317_v55 = vmin.f32 %v253_v30, 6.0  ;;  %v3310_v30 = vshrl.u32 %v6595_v36, 16  ;;  %v4814_v35 = vround.rtne.f32 %v380_v33 }
 0x191   :  { %3962 = vrot.lane.b32.xlu0 %v6564_v25, %s4903_s19  ;;  %v6581_v47 = vpop.permute.xlu1 %2438  ;;  %v3302_v33 = vrot.slane %v3300_v4, 5  ;;  %v3308_v29 = vrot.slane %v3306_v53, 5 }
 0x192   :  { %v381_v61 = vmul.f32 42.5, %v317_v55  ;;  %v4698_v50 = vpack.c.bf16 %v4814_v35, %v4814_v35  ;;  %v1018_v55 = vrot.slane %v1013_v43, 4  ;;  %v1494_v35 = vld [vmem:[#allocation2 + $0x180] sm:$0xf] }
 0x193   :  { %v6585_v34 = vpop.permute.xlu0 %2460  ;;  %3822 = vrot.lane.b32.xlu1 %v6310_v52, %s4898_s5  ;;  %v1014_v52 = vshll.u32 %v4683_v57, 16  ;;  %v1008_v57 = vor.u32 %v1006_v59, %v1005_v24  ;;  %v3312_v59 = vrot.slane %v3310_v30, 4 }
 0x194   :  { %8162 = vst [vmem:[#allocation96_spill] sm:$0xff] %v6585_v34 }
 0x195   :  { %2543 = vrot.lane.b32.xlu0 %v5335_v27, %s4904_s7  ;;  %v6599_v34 = vpop.permute.xlu1 %2442  ;;  %v3491_v27 = vsel %vm5181_vm8, %v3489_v22, %v3490_v8  ;;  %v1016_v8 = vor.u32 %v1014_v52, %v1013_v43  ;;  %v1439_v44 = vsel %vm5209_vm12, %v1008_v57, %v1438_v48  ;;  %v1139_v52 = vshrl.u32 %v4698_v50, 16 }
 0x196   :  { %8163 = vst [vmem:[#allocation97_spill] sm:$0xff] %v6599_v34  ;;  %v4815_v34 = vround.rtne.f32 %v381_v61  ;;  %v6615_v22 = vcombine.low %v3488_v15, %v3491_v27  ;;  %1440 = vst [vmem:[#allocation2 + $0x120] sm:$0xf] %v1439_v44  ;;  %v1142_v27 = vshll.u32 %v4698_v50, 16  ;;  %v6627_v61 = vld [vmem:[#allocation2 + $0x164] sm:$0x1]  ;;  %v1443_v43 = vsel %vm5215_vm13, %v1018_v55, %v1442_v38 }
 0x197   :  { %v6602_v46 = vpop.permute.xlu0 %2464  ;;  %3857 = vrot.lane.b32.xlu1 %v6473_v23, %s4900_s6  ;;  %v1141_v48 = vrot.slane %v1139_v52, 7  ;;  %1444 = vst [vmem:[#allocation2 + $0x128] sm:$0x1] %v1443_v43  ;;  %v3316_v53 = vshll.u32 %v6627_v61, 16  ;;  %v1498_v50 = vld [vmem:[#allocation2 + $0x188] sm:$0x1] }
 0x198   :  { %8164 = vst [vmem:[#allocation98_spill] sm:$0xff] %v6602_v46  ;;  %v1009_v46 = vrot.slane %v1005_v24, 4  ;;  %v4699_v5 = vpack.c.bf16 %v4815_v34, %v4815_v34  ;;  %v8166_v24 = vld [vmem:[#allocation9_spill] sm:$0xff] }
 0x199   :  { %3997 = vrot.lane.b32.xlu0 %v6597_v58, %s4904_s7  ;;  %v6613_v19 = vpop.permute.xlu1 %2446  ;;  %v1144_v57 = vor.u32 %v1142_v27, %v1141_v48 }
 0x19a   :  { %8165 = vst [vmem:[#allocation99_spill] sm:$0xff] %v6613_v19  ;;  %v1017_v15 = vsel %vm5199_vm11, %v1009_v46, %v1016_v8  ;;  %v1147_v4 = vshrl.u32 %v4699_v5, 16  ;;  %v1150_v34 = vshll.u32 %v4699_v5, 16  ;;  %v1145_v8 = vrot.slane %v1141_v48, 4 }
 0x19b   :  { %v6617_v49 = vpop.permute.xlu0 %2471  ;;  %3892 = vrot.lane.b32.xlu1 %v6507_v7, %s4901_s20  ;;  %1441 = vst.msk [vmem:[#allocation2 + $0x124] sm:$0xf] %vm20_vm0, %v1017_v15  ;;  %v3303_v5 = vor.u32 %v3302_v33, %v3299_v12  ;;  %v3313_v15 = vor.u32 %v3312_v59, %v3308_v29  ;;  %v8170_v33 = vld [vmem:[#allocation24_spill] sm:$0xff]  ;;  %v6655_v59 = vcombine.low %v6587_v32, %v6595_v36  ;;  %v3318_v48 = vrot.slane %v3316_v53, 5 }
 0x19c   :  { %v1149_v46 = vrot.slane %v1147_v4, 7 }
 0x19d   :  { %2578 = vrot.lane.b32.xlu0 %v8166_v24, %s4905_s12  ;;  %v6632_v30 = vpop.permute.xlu1 %2450  ;;  %v1495_v24 = vsel %vm5209_vm12, %v1144_v57, %v1494_v35  ;;  %8171 = vst [vmem:[#allocation102_spill] sm:$0xff] %v6655_v59  ;;  %v3304_v27 = vrot.slane %v3303_v5, 4 }
 0x19e   :  { %8167 = vst [vmem:[#allocation9_spill] sm:$0xff] %v6632_v30  ;;  %v1152_v38 = vor.u32 %v1150_v34, %v1149_v46  ;;  %v1154_v55 = vrot.slane %v1149_v46, 4  ;;  %1496 = vst [vmem:[#allocation2 + $0x180] sm:$0xf] %v1495_v24  ;;  %v3314_v34 = vrot.slane %v3313_v15, 4 }
 0x19f   :  { %v6634_v44 = vpop.permute.xlu0 %2475  ;;  %3927 = vrot.lane.b32.xlu1 %v6547_v16, %s4902_s10  ;;  %v3309_v57 = vsel %vm5192_vm10, %v3304_v27, %v3308_v29  ;;  %v6679_v15 = vld [vmem:[#allocation2 + $0x16c] sm:$0xf] }
 0x1a0   :  { %8168 = vst [vmem:[#allocation100_spill] sm:$0xff] %v6634_v44  ;;  %v1153_v43 = vsel %vm5199_vm11, %v1145_v8, %v1152_v38  ;;  %v1499_v12 = vsel %vm5215_vm13, %v1154_v55, %v1498_v50  ;;  %v3319_v8 = vsel %vm5192_vm10, %v3314_v34, %v3318_v48  ;;  %v3543_v50 = vrot.slane %v6595_v36, 5  ;;  %v8175_v38 = vld [vmem:[#allocation19_spill] sm:$0xff] }
 0x1a1   :  { %4032 = vrot.lane.b32.xlu0 %v6615_v22, %s4905_s12  ;;  %v6641_v52 = vpop.permute.xlu1 %2454  ;;  %1497 = vst.msk [vmem:[#allocation2 + $0x184] sm:$0xf] %vm20_vm0, %v1153_v43  ;;  %1500 = vst [vmem:[#allocation2 + $0x188] sm:$0x1] %v1499_v12  ;;  %v6683_v29 = vcombine.low %v3309_v57, %v3319_v8  ;;  %v4578_v55 = vrot.slane %v6587_v32, 9  ;;  %v3546_v36 = vrot.slane %v6627_v61, 5 }
 0x1a2   :  { %v3545_v24 = vrot.slane %v3543_v50, 4  ;;  %v3334_v27 = vshrl.u32 %v6679_v15, 16  ;;  %v3330_v34 = vshll.u32 %v6679_v15, 16  ;;  %v174_v32 = vld [vmem:[%s7964_s1 + $0x160] sm:$0xff]  ;;  %v175_v61 = vld [vmem:[%s7964_s1 + $0x168] sm:$0xff] }
 0x1a3   :  { %v6645_v4 = vpop.permute.xlu0 %2479  ;;  %2524 = vrot.lane.b32.xlu1 %v8170_v33, %s4903_s19  ;;  %v3544_v57 = vsel %vm5181_vm8, %v4578_v55, %v3543_v50  ;;  %v238_v30 = vmax.f32 %v174_v32, 0.0  ;;  %v8179_v50 = vld [vmem:[#allocation34_spill] sm:$0xff] }
 0x1a4   :  { %8169 = vst [vmem:[#allocation101_spill] sm:$0xff] %v6645_v4  ;;  %v3547_v8 = vsel %vm5181_vm8, %v3545_v24, %v3546_v36  ;;  %v3336_v19 = vrot.slane %v3334_v27, 4  ;;  %v239_v4 = vmax.f32 %v175_v61, 0.0 }
 0x1a5   :  { %3744 = vrot.lane.b32.xlu0 %v6507_v7, %s4899_s8  ;;  %v6660_v46 = vpop.permute.xlu1 %2458  ;;  %v6675_v7 = vld [vmem:[#allocation2 + $0x168] sm:$0xf]  ;;  %v6721_v55 = vcombine.low %v3544_v57, %v3547_v8  ;;  %v302_v36 = vmin.f32 %v238_v30, 6.0  ;;  %v190_v57 = vld [vmem:[%s7964_s1 + $0x1e0] sm:$0xff]  ;;  %v3550_v30 = vrot.slane %v6679_v15, 5 }
 0x1a6   :  { %8172 = vst [vmem:[#allocation103_spill] sm:$0xff] %v6660_v46  ;;  %v3324_v43 = vshll.u32 %v6675_v7, 16  ;;  %v8182_v8 = vld [vmem:[#allocation29_spill] sm:$0xff] }
 0x1a7   :  { %v6662_v35 = vpop.permute.xlu0 %2483  ;;  %3978 = vrot.lane.b32.xlu1 %v6655_v59, %s4903_s19  ;;  %v366_v61 = vmul.f32 42.5, %v302_v36 }
 0x1a8   :  { %8173 = vst [vmem:[#allocation104_spill] sm:$0xff] %v6662_v35 }
 0x1a9   :  { %3824 = vrot.lane.b32.xlu0 %v6547_v16, %s4898_s5  ;;  %v6673_v53 = vpop.permute.xlu1 %2462  ;;  %v3321_v16 = vshrl.u32 %v6675_v7, 16  ;;  %v4800_v36 = vround.rtne.f32 %v366_v61 }
 0x1aa   :  { %8174 = vst [vmem:[#allocation105_spill] sm:$0xff] %v6673_v53  ;;  %v6713_v53 = vrot.slane %v3330_v34, 5 }
 0x1ab   :  { %v6677_v5 = vpop.permute.xlu0 %2487  ;;  %2559 = vrot.lane.b32.xlu1 %v8175_v38, %s4904_s7  ;;  %v3323_v38 = vrot.slane %v3321_v16, 4  ;;  %v303_v16 = vmin.f32 %v239_v4, 6.0 }
 0x1ac   :  { %v3337_v27 = vor.u32 %v3336_v19, %v6713_v53  ;;  %v254_v19 = vmax.f32 %v190_v57, 0.0  ;;  %v4579_v57 = vrot.slane %v6675_v7, 9 }
 0x1ad   :  { %3859 = vrot.lane.b32.xlu0 %v6564_v25, %s4900_s6  ;;  %v6691_v12 = vpop.permute.xlu1 %2466  ;;  %v6717_v25 = vld [vmem:[#allocation2 + $0x170] sm:$0x1] }
 0x1ae   :  { %8176 = vst [vmem:[#allocation19_spill] sm:$0xff] %v6691_v12  ;;  %v3326_v12 = vrot.slane %v3324_v43, 5  ;;  %v3340_v34 = vshll.u32 %v6717_v25, 16  ;;  %v318_v44 = vmin.f32 %v254_v19, 6.0 }
 0x1af   :  { %v6695_v48 = vpop.permute.xlu0 %2491  ;;  %4013 = vrot.lane.b32.xlu1 %v6683_v29, %s4904_s7 }
 0x1b0   :  { %8177 = vst [vmem:[#allocation106_spill] sm:$0xff] %v6695_v48  ;;  %v3327_v24 = vor.u32 %v3326_v12, %v3323_v38  ;;  %v191_v12 = vld [vmem:[%s7964_s1 + $0x1e8] sm:$0xff]  ;;  %v6744_v38 = vcombine.low %v6675_v7, %v6679_v15  ;;  %v3342_v33 = vrot.slane %v3340_v34, 5  ;;  %v382_v61 = vmul.f32 42.5, %v318_v44 }
 0x1b1   :  { %3894 = vrot.lane.b32.xlu0 %v6597_v58, %s4901_s20  ;;  %v6711_v35 = vpop.permute.xlu1 %2473  ;;  %v255_v4 = vmax.f32 %v191_v12, 0.0  ;;  %v4684_v12 = vpack.c.bf16 %v4800_v36, %v4800_v36  ;;  %v6753_v15 = vld [vmem:[#allocation2 + $0x108] sm:$0xf] }
 0x1b2   :  { %8183 = vst [vmem:[#allocation109_spill] sm:$0xff] %v6744_v38  ;;  %v4816_v44 = vround.rtne.f32 %v382_v61  ;;  %v3132_v17 = vshll.u32 %v6753_v15, 16 }
 0x1b3   :  { %v6715_v46 = vpop.permute.xlu0 %2495  ;;  %2594 = vrot.lane.b32.xlu1 %v8179_v50, %s4905_s12  ;;  %v3328_v50 = vrot.slane %v3327_v24, 4  ;;  %v319_v60 = vmin.f32 %v255_v4, 6.0  ;;  %v3552_v24 = vrot.slane %v3550_v30, 4  ;;  %v1020_v34 = vshrl.u32 %v4684_v12, 16 }
 0x1b4   :  { %8178 = vst [vmem:[#allocation107_spill] sm:$0xff] %v6715_v46  ;;  %v367_v46 = vmul.f32 42.5, %v303_v16  ;;  %v1023_v19 = vshll.u32 %v4684_v12, 16 }
 0x1b5   :  { %3929 = vrot.lane.b32.xlu0 %v6615_v22, %s4902_s10  ;;  %v6725_v43 = vpop.permute.xlu1 %2477  ;;  %v1022_v12 = vrot.slane %v1020_v34, 7 }
 0x1b6   :  { %8180 = vst [vmem:[#allocation34_spill] sm:$0xff] %v6725_v43  ;;  %v4801_v16 = vround.rtne.f32 %v367_v46  ;;  %v3338_v43 = vrot.slane %v3337_v27, 4  ;;  %v3553_v46 = vrot.slane %v6717_v25, 5  ;;  %v6758_v27 = vld [vmem:[#allocation2 + $0x10c] sm:$0xf] }
 0x1b7   :  { %v6729_v32 = vpop.permute.xlu0 %2499  ;;  %4048 = vrot.lane.b32.xlu1 %v6721_v55, %s4905_s12  ;;  %v1025_v61 = vor.u32 %v1023_v19, %v1022_v12 }
 0x1b8   :  { %8181 = vst [vmem:[#allocation108_spill] sm:$0xff] %v6729_v32  ;;  %v4685_v23 = vpack.c.bf16 %v4801_v16, %v4801_v16  ;;  %v3343_v25 = vsel %vm5192_vm10, %v3338_v43, %v3342_v33  ;;  %v8187_v43 = vld [vmem:[#allocation18_spill] sm:$0xff] }
 0x1b9   :  { %2526 = vrot.lane.b32.xlu0 %v8182_v8, %s4903_s19  ;;  %v6746_v32 = vpop.permute.xlu1 %2481  ;;  %v3129_v8 = vshrl.u32 %v6753_v15, 16 }
 0x1ba   :  { %8184 = vst [vmem:[#allocation110_spill] sm:$0xff] %v6746_v32  ;;  %v383_v32 = vmul.f32 42.5, %v319_v60  ;;  %v1028_v7 = vshrl.u32 %v4685_v23, 16  ;;  %v1031_v4 = vshll.u32 %v4685_v23, 16  ;;  %v3142_v23 = vshrl.u32 %v6758_v27, 16 }
 0x1bb   :  { %v6748_v26 = vpop.permute.xlu0 %2506  ;;  %3760 = vrot.lane.b32.xlu1 %v6420_v11, %s4899_s8  ;;  %v3333_v11 = vsel %vm5192_vm10, %v3328_v50, %v6713_v53  ;;  %v3138_v53 = vshll.u32 %v6758_v27, 16  ;;  %v1445_v50 = vld [vmem:[#allocation2 + $0x12c] sm:$0xf] }
 0x1bc   :  { %v4817_v60 = vround.rtne.f32 %v383_v32  ;;  %v1030_v39 = vrot.slane %v1028_v7, 7  ;;  %v6777_v32 = vcombine.low %v3333_v11, %v3343_v25  ;;  %v1446_v19 = vsel %vm5209_vm12, %v1025_v61, %v1445_v50 }
 0x1bd   :  { %3980 = vrot.lane.b32.xlu0 %v6744_v38, %s4903_s19  ;;  %v6760_v36 = vpop.permute.xlu1 %2485  ;;  %1447 = vst [vmem:[#allocation2 + $0x12c] sm:$0xf] %v1446_v19 }
 0x1be   :  { %8185 = vst [vmem:[#allocation111_spill] sm:$0xff] %v6760_v36  ;;  %v4700_v36 = vpack.c.bf16 %v4816_v44, %v4816_v44  ;;  %v4701_v33 = vpack.c.bf16 %v4817_v60, %v4817_v60  ;;  %v1033_v48 = vor.u32 %v1031_v4, %v1030_v39  ;;  %v1035_v28 = vrot.slane %v1030_v39, 4  ;;  %v1449_v4 = vld [vmem:[#allocation2 + $0x134] sm:$0x1] }
 0x1bf   :  { %v6767_v16 = vpop.permute.xlu0 %2510  ;;  %3840 = vrot.lane.b32.xlu1 %v6458_v31, %s4898_s5  ;;  %v3551_v31 = vsel %vm5181_vm8, %v4579_v57, %v3550_v30  ;;  %v3131_v44 = vrot.slane %v3129_v8, 4  ;;  %v3554_v60 = vsel %vm5181_vm8, %v3552_v24, %v3553_v46  ;;  %v3134_v30 = vrot.slane %v3132_v17, 5 }
 0x1c0   :  { %8186 = vst [vmem:[#allocation112_spill] sm:$0xff] %v6767_v16  ;;  %v1026_v16 = vrot.slane %v1022_v12, 4  ;;  %v1156_v7 = vshrl.u32 %v4700_v36, 16  ;;  %v1164_v1 = vshrl.u32 %v4701_v33, 16  ;;  %v1159_v57 = vshll.u32 %v4700_v36, 16 }
 0x1c1   :  { %2561 = vrot.lane.b32.xlu0 %v8187_v43, %s4904_s7  ;;  %v6779_v34 = vpop.permute.xlu1 %2489  ;;  %v3140_v24 = vrot.slane %v3138_v53, 5  ;;  %v3144_v46 = vrot.slane %v3142_v23, 4  ;;  %v1450_v25 = vsel %vm5215_vm13, %v1035_v28, %v1449_v4  ;;  %v2992_v12 = vld [vmem:[#allocation2 + $0x110] sm:$0x1]  ;;  %v1501_v36 = vld [vmem:[#allocation2 + $0x18c] sm:$0xf]  ;;  %v3135_v53 = vor.u32 %v3134_v30, %v3131_v44 }
 0x1c2   :  { %v1034_v11 = vsel %vm5199_vm11, %v1026_v16, %v1033_v48  ;;  %v1158_v39 = vrot.slane %v1156_v7, 7  ;;  %v1166_v8 = vrot.slane %v1164_v1, 7  ;;  %v1167_v48 = vshll.u32 %v4701_v33, 16  ;;  %1451 = vst [vmem:[#allocation2 + $0x134] sm:$0x1] %v1450_v25 }
 0x1c3   :  { %v6783_v51 = vpop.permute.xlu0 %3740  ;;  %3875 = vrot.lane.b32.xlu1 %v6655_v59, %s4900_s6  ;;  %1448 = vst.msk [vmem:[#allocation2 + $0x130] sm:$0xf] %vm20_vm0, %v1034_v11  ;;  %v6804_v1 = vcombine.low %v3551_v31, %v3554_v60  ;;  %v3145_v28 = vor.u32 %v3144_v46, %v3140_v24  ;;  %v3148_v33 = vshll.u32 %v2992_v12, 16  ;;  %v1505_v60 = vld [vmem:[#allocation2 + $0x194] sm:$0x1]  ;;  %v6821_v44 = vcombine.low %v6753_v15, %v6758_v27 }
 0x1c4   :  { %v1161_v50 = vor.u32 %v1159_v57, %v1158_v39  ;;  %v1162_v17 = vrot.slane %v1158_v39, 4  ;;  %v1169_v61 = vor.u32 %v1167_v48, %v1166_v8  ;;  %v1171_v19 = vrot.slane %v1166_v8, 4 }
 0x1c5   :  { %4015 = vrot.lane.b32.xlu0 %v6777_v32, %s4904_s7  ;;  %v6798_v16 = vpop.permute.xlu1 %2493  ;;  %8190 = vst [vmem:[#allocation114_spill] sm:$0xff] %v6821_v44  ;;  %v3146_v4 = vrot.slane %v3145_v28, 4  ;;  %v3150_v30 = vrot.slane %v3148_v33, 5  ;;  %v3494_v25 = vrot.slane %v6758_v27, 5  ;;  %v3497_v27 = vrot.slane %v2992_v12, 5 }
 0x1c6   :  { %8188 = vst [vmem:[#allocation18_spill] sm:$0xff] %v6798_v16  ;;  %v1502_v23 = vsel %vm5209_vm12, %v1161_v50, %v1501_v36  ;;  %v1170_v7 = vsel %vm5199_vm11, %v1162_v17, %v1169_v61  ;;  %v1506_v39 = vsel %vm5215_vm13, %v1171_v19, %v1505_v60  ;;  %v6842_v17 = vld [vmem:[#allocation2 + $0x114] sm:$0xf]  ;;  %v6846_v36 = vld [vmem:[#allocation2 + $0x118] sm:$0xf] }
 0x1c7   :  { %v6800_v43 = vpop.permute.xlu0 %3820  ;;  %3910 = vrot.lane.b32.xlu1 %v6683_v29, %s4901_s20  ;;  %1503 = vst [vmem:[#allocation2 + $0x18c] sm:$0xf] %v1502_v23  ;;  %1504 = vst.msk [vmem:[#allocation2 + $0x190] sm:$0xf] %vm20_vm0, %v1170_v7  ;;  %v3151_v48 = vsel %vm5192_vm10, %v3146_v4, %v3150_v30  ;;  %v8192_v23 = vld [vmem:[#allocation11_spill] sm:$0xff]  ;;  %v3496_v28 = vrot.slane %v3494_v25, 4 }
 0x1c8   :  { %1507 = vst [vmem:[#allocation2 + $0x194] sm:$0x1] %v1506_v39  ;;  %v3156_v33 = vshll.u32 %v6842_v17, 16  ;;  %v3166_v19 = vshrl.u32 %v6846_v36, 16  ;;  %v3162_v60 = vshll.u32 %v6846_v36, 16  ;;  %v3501_v59 = vrot.slane %v6846_v36, 5 }
 0x1c9   :  { %2596 = vrot.lane.b32.xlu0 %v5757_v62, %s4905_s12  ;;  %v6812_v11 = vpop.permute.xlu1 %2497  ;;  %v3136_v62 = vrot.slane %v3135_v53, 4  ;;  %v4571_v53 = vrot.slane %v6753_v15, 9 }
 0x1ca   :  { %8189 = vst [vmem:[#allocation113_spill] sm:$0xff] %v6812_v11  ;;  %v3158_v4 = vrot.slane %v3156_v33, 5  ;;  %v6869_v39 = vrot.slane %v3162_v60, 5  ;;  %v8195_v60 = vld [vmem:[#allocation43_spill] sm:$0xff]  ;;  %v4867_v11 = vld [vmem:[#allocation2 + $0x138] sm:$0xf] }
 0x1cb   :  { %v6815_v31 = vpop.permute.xlu0 %3855  ;;  %3945 = vrot.lane.b32.xlu1 %v6721_v55, %s4902_s10  ;;  %v3141_v46 = vsel %vm5192_vm10, %v3136_v62, %v3140_v24  ;;  %v3495_v15 = vsel %vm5181_vm8, %v4571_v53, %v3494_v25 }
 0x1cc   :  { %v6850_v24 = vcombine.low %v3141_v46, %v3151_v48  ;;  %v3168_v46 = vrot.slane %v3166_v19, 4  ;;  %v8194_v19 = vld [vmem:[#allocation52_spill] sm:$0xff] }
 0x1cd   :  { %4050 = vrot.lane.b32.xlu0 %v6804_v1, %s4905_s12  ;;  %v6827_v57 = vpop.permute.xlu1 %2501 }
 0x1ce   :  { %8191 = vst [vmem:[#allocation115_spill] sm:$0xff] %v6827_v57  ;;  %v2635_v57 = vsel %vm2608_vm14, %v8195_v60, %v8194_v19 }
 0x1cf   :  { %v6829_v8 = vpop.permute.xlu0 %3890  ;;  %3964 = vrot.lane.b32.xlu1 %v6821_v44, %s4903_s19 }
 0x1d1   :  { %3762 = vrot.lane.b32.xlu0 %v6683_v29, %s4899_s8  ;;  %v6840_v50 = vpop.permute.xlu1 %2508  ;;  %v3153_v29 = vshrl.u32 %v6842_v17, 16 }
 0x1d3   :  { %v6844_v61 = vpop.permute.xlu0 %3925  ;;  %2545 = vrot.lane.b32.xlu1 %v8192_v23, %s4904_s7  ;;  %v3155_v12 = vrot.slane %v3153_v29, 4  ;;  %v6873_v23 = vld [vmem:[#allocation2 + $0x11c] sm:$0x1] }
 0x1d4   :  { %v3172_v29 = vshll.u32 %v6873_v23, 16  ;;  %v3504_v60 = vrot.slane %v6873_v23, 5 }
 0x1d5   :  { %3842 = vrot.lane.b32.xlu0 %v6721_v55, %s4898_s5  ;;  %v6857_v7 = vpop.permute.xlu1 %2512  ;;  %v3498_v55 = vsel %vm5181_vm8, %v3496_v28, %v3497_v27  ;;  %v3159_v53 = vor.u32 %v3158_v4, %v3155_v12  ;;  %v3169_v27 = vor.u32 %v3168_v46, %v6869_v39 }
 0x1d6   :  { %8193 = vst [vmem:[#allocation11_spill] sm:$0xff] %v6857_v7  ;;  %v6877_v25 = vcombine.low %v3495_v15, %v3498_v55  ;;  %v2675_v55 = vsel %vm2657_vm15, %v2635_v57, %v6191_v42  ;;  %v3174_v46 = vrot.slane %v3172_v29, 5  ;;  %v193_v42 = vld [vmem:[%s7964_s1 + $0x1f8] sm:$0xff] }
 0x1d7   :  { %v2523_v62 = vpop.permute.xlu0 %2522  ;;  %3999 = vrot.lane.b32.xlu1 %v6850_v24, %s4904_s7  ;;  %v3160_v15 = vrot.slane %v3159_v53, 4  ;;  %v3170_v4 = vrot.slane %v3169_v27, 4  ;;  %v2708_v19 = vsel %vm2690_vm1, %v2675_v55, %v6406_v40  ;;  %v192_v53 = vld [vmem:[%s7964_s1 + $0x1f0] sm:$0xff]  ;;  %v4572_v27 = vrot.slane %v6842_v17, 9 }
 0x1d8   :  { %v2741_v57 = vsel %vm2723_vm2, %v2708_v19, %v6553_v10  ;;  %v256_v40 = vmax.f32 %v192_v53, 0.0 }
 0x1d9   :  { %3877 = vrot.lane.b32.xlu0 %v6744_v38, %s4900_s6  ;;  %v3757_v30 = vpop.permute.xlu1 %3756  ;;  %v4868_v38 = vld [vmem:[#allocation2 + $0x13c] sm:$0xf] }
 0x1da   :  { %v6898_v7 = vcombine.low %v4867_v11, %v4868_v38  ;;  %v257_v38 = vmax.f32 %v193_v42, 0.0  ;;  %v2774_v11 = vsel %vm2756_vm3, %v2741_v57, %v6677_v5  ;;  %v320_v55 = vmin.f32 %v256_v40, 6.0  ;;  %v6939_v40 = vld [vmem:[#allocation2 + $0x178] sm:$0xf] }
 0x1db   :  { %v6871_v48 = vpop.permute.xlu0 %3976  ;;  %2580 = vrot.lane.b32.xlu1 %v5648_v9, %s4905_s12  ;;  %v6892_v9 = vcombine.low %v6842_v17, %v6846_v36  ;;  %v3165_v36 = vsel %vm5192_vm10, %v3160_v15, %v6869_v39  ;;  %v2807_v29 = vsel %vm2789_vm4, %v2774_v11, %v2523_v62  ;;  %v3503_v57 = vrot.slane %v3501_v59, 4  ;;  %v4869_v11 = vld [vmem:[#allocation2] sm:$0xf] }
 0x1dc   :  { %v321_v19 = vmin.f32 %v257_v38, 6.0  ;;  %v4088_v5 = vsel %vm2608_vm14, %v6898_v7, %v3757_v30  ;;  %v384_v62 = vmul.f32 42.5, %v320_v55  ;;  %v6934_v30 = vld [vmem:[#allocation2 + $0x174] sm:$0xf] }
 0x1dd   :  { %3912 = vrot.lane.b32.xlu0 %v6777_v32, %s4901_s20  ;;  %v3837_v28 = vpop.permute.xlu1 %3836 }
 0x1de   :  { %v4127_v39 = vsel %vm2657_vm15, %v4088_v5, %v3837_v28  ;;  %v385_v15 = vmul.f32 42.5, %v321_v19  ;;  %v3502_v5 = vsel %vm5181_vm8, %v4572_v27, %v3501_v59  ;;  %v3354_v59 = vshll.u32 %v6939_v40, 16 }
 0x1df   :  { %v2558_v33 = vpop.permute.xlu0 %2557  ;;  %4034 = vrot.lane.b32.xlu1 %v6877_v25, %s4905_s12 }
 0x1e0   :  { %v2840_v53 = vsel %vm2822_vm5, %v2807_v29, %v2558_v33  ;;  %v4819_v38 = vround.rtne.f32 %v385_v15  ;;  %v4870_v29 = vld [vmem:[#allocation2 + $0x4] sm:$0xf] }
 0x1e1   :  { %3947 = vrot.lane.b32.xlu0 %v6804_v1, %s4902_s10  ;;  %v3872_v12 = vpop.permute.xlu1 %3871  ;;  %v4512_v55 = vcombine.low %v4869_v11, %v4870_v29 }
 0x1e3   :  { %v4012_v16 = vpop.permute.xlu0 %4011  ;;  %3746 = vrot.lane.b32.xlu1 %v6597_v58, %s4899_s8  ;;  %v3175_v58 = vsel %vm5192_vm10, %v3170_v4, %v3174_v46  ;;  %v4159_v4 = vsel %vm2690_vm1, %v4127_v39, %v3872_v12  ;;  %v8196_v46 = vld [vmem:[#allocation13_spill] sm:$0xff] }
 0x1e4   :  { %v6936_v33 = vcombine.low %v3165_v36, %v3175_v58  ;;  %v3505_v36 = vsel %vm5181_vm8, %v3503_v57, %v3504_v60  ;;  %v3345_v58 = vshrl.u32 %v6934_v30, 16  ;;  %v4871_v60 = vld [vmem:[#allocation2 + $0xd8] sm:$0xf] }
 0x1e5   :  { %3966 = vrot.lane.b32.xlu0 %v6892_v9, %s4903_s19  ;;  %v3907_v10 = vpop.permute.xlu1 %3906 }
 0x1e6   :  { %v4191_v23 = vsel %vm2723_vm2, %v4159_v4, %v3907_v10 }
 0x1e7   :  { %v2593_v42 = vpop.permute.xlu0 %2592  ;;  %3826 = vrot.lane.b32.xlu1 %v6615_v22, %s4898_s5  ;;  %v4818_v22 = vround.rtne.f32 %v384_v62  ;;  %v3358_v62 = vshrl.u32 %v6939_v40, 16 }
 0x1e8   :  { %v2873_v17 = vsel %vm2855_vm6, %v2840_v53, %v2593_v42  ;;  %v4703_v42 = vpack.c.bf16 %v4819_v38, %v4819_v38  ;;  %v3347_v38 = vrot.slane %v3345_v58, 4 }
 0x1e9   :  { %2547 = vrot.lane.b32.xlu0 %v8196_v46, %s4904_s7  ;;  %4740 = vmatprep.subr.msk.bf16.mxu0 %vm2888_vm7, %v2873_v17  ;;  %v3942_v28 = vpop.permute.xlu1 %3941  ;;  %v4702_v53 = vpack.c.bf16 %v4818_v22, %v4818_v22  ;;  %v3348_v17 = vshll.u32 %v6934_v30, 16  ;;  %v6965_v22 = vcombine.low %v3502_v5, %v3505_v36 }
 0x1ea   :  { %v4223_v12 = vsel %vm2756_vm3, %v4191_v23, %v3942_v28  ;;  %v1181_v46 = vshrl.u32 %v4703_v42, 16  ;;  %v8197_v23 = vld [vmem:[#allocation45_spill] sm:$0xff] }
 0x1eb   :  { %v4047_v19 = vpop.permute.xlu0 %4046  ;;  %v4255_v10 = vsel %vm2789_vm4, %v4223_v12, %v6871_v48  ;;  %3861 = vrot.lane.b32.xlu1 %v6821_v44, %s4900_s6  ;;  %v4872_v48 = vld [vmem:[#allocation2 + $0xdc] sm:$0xf]  ;;  %v1173_v4 = vshrl.u32 %v4702_v53, 16  ;;  %v1176_v29 = vshll.u32 %v4702_v53, 16  ;;  %v1508_v53 = vld [vmem:[#allocation2 + $0x198] sm:$0xf] }
 0x1ec   :  { %v4287_v39 = vsel %vm2822_vm5, %v4255_v10, %v4012_v16  ;;  %v4585_v27 = vcombine.low %v4871_v60, %v4872_v48  ;;  %v2611_v16 = vsel %vm2608_vm14, %v4512_v55, %v8197_v23  ;;  %v1183_v12 = vrot.slane %v1181_v46, 7  ;;  %v6971_v10 = vld [vmem:[#allocation2 + $0x17c] sm:$0x1] }
 0x1ed   :  { %4001 = vrot.lane.b32.xlu0 %v6936_v33, %s4904_s7  ;;  %v6957_v57 = vpop.permute.xlu1 %3960  ;;  %v4319_v15 = vsel %vm2855_vm6, %v4287_v39, %v4047_v19  ;;  %v1175_v11 = vrot.slane %v1173_v4, 7  ;;  %v8198_v19 = vld [vmem:[#allocation28_spill] sm:$0xff]  ;;  %v3350_v39 = vrot.slane %v3348_v17, 5  ;;  %v3356_v55 = vrot.slane %v3354_v59, 5 }
 0x1ee   :  { %4748 = vmatprep.subr.msk.bf16.mxu1 %vm2888_vm7, %v4319_v15  ;;  %v3360_v60 = vrot.slane %v3358_v62, 4  ;;  %v1184_v48 = vshll.u32 %v4703_v42, 16  ;;  %v4064_v5 = vsel %vm2608_vm14, %v4585_v27, %v6783_v51  ;;  %v8199_v4 = vld [vmem:[#allocation44_spill] sm:$0xff]  ;;  %v3364_v17 = vshll.u32 %v6971_v10, 16 }
 0x1ef   :  { %v6963_v28 = vpop.permute.xlu0 %3758  ;;  %3896 = vrot.lane.b32.xlu1 %v6850_v24, %s4901_s20  ;;  %v1178_v15 = vor.u32 %v1176_v29, %v1175_v11  ;;  %v1179_v23 = vrot.slane %v1175_v11, 4  ;;  %v2659_v46 = vsel %vm2657_vm15, %v2611_v16, %v8199_v4  ;;  %v4111_v51 = vsel %vm2657_vm15, %v4064_v5, %v6800_v43 }
 0x1f0   :  { %v1186_v58 = vor.u32 %v1184_v48, %v1183_v12  ;;  %v3351_v62 = vor.u32 %v3350_v39, %v3347_v38  ;;  %v3361_v59 = vor.u32 %v3360_v60, %v3356_v55  ;;  %v2692_v16 = vsel %vm2690_vm1, %v2659_v46, %v6308_v2  ;;  %v1512_v38 = vld [vmem:[#allocation2 + $0x1a0] sm:$0x1]  ;;  %v8200_v39 = vld [vmem:[#allocation39_spill] sm:$0xff] }
 0x1f1   :  { %2582 = vrot.lane.b32.xlu0 %v8198_v19, %s4905_s12  ;;  %v2542_v36 = vpop.permute.xlu1 %2541  ;;  %v1509_v42 = vsel %vm5209_vm12, %v1178_v15, %v1508_v53  ;;  %v1188_v6 = vrot.slane %v1183_v12, 4  ;;  %v2725_v29 = vsel %vm2723_vm2, %v2692_v16, %v6482_v45  ;;  %v4143_v63 = vsel %vm2690_vm1, %v4111_v51, %v6815_v31 }
 0x1f2   :  { %v1187_v27 = vsel %vm5199_vm11, %v1179_v23, %v1186_v58  ;;  %1510 = vst [vmem:[#allocation2 + $0x198] sm:$0xf] %v1509_v42  ;;  %v2758_v19 = vsel %vm2756_vm3, %v2725_v29, %v6617_v49  ;;  %v7005_v2 = vcombine.low %v6934_v30, %v6939_v40  ;;  %v3352_v60 = vrot.slane %v3351_v62, 4  ;;  %v7039_v42 = vld [vmem:[#allocation2 + $0x124] sm:$0xf] }
 0x1f3   :  { %v6975_v44 = vpop.permute.xlu0 %3838  ;;  %3931 = vrot.lane.b32.xlu1 %v6877_v25, %s4902_s10  ;;  %1511 = vst.msk [vmem:[#allocation2 + $0x19c] sm:$0xf] %vm20_vm0, %v1187_v27  ;;  %v1513_v12 = vsel %vm5215_vm13, %v1188_v6, %v1512_v38  ;;  %v2791_v45 = vsel %vm2789_vm4, %v2758_v19, %v6748_v26  ;;  %v3362_v48 = vrot.slane %v3361_v59, 4  ;;  %v3366_v5 = vrot.slane %v3364_v17, 5 }
 0x1f4   :  { %1514 = vst [vmem:[#allocation2 + $0x1a0] sm:$0x1] %v1513_v12  ;;  %v2824_v49 = vsel %vm2822_vm5, %v2791_v45, %v2542_v36  ;;  %v4175_v15 = vsel %vm2723_vm2, %v4143_v63, %v6829_v8  ;;  %v3357_v36 = vsel %vm5192_vm10, %v3352_v60, %v3356_v55  ;;  %v3557_v53 = vrot.slane %v6939_v40, 5  ;;  %v8201_v55 = vld [vmem:[#allocation22_spill] sm:$0xff] }
 0x1f5   :  { %4036 = vrot.lane.b32.xlu0 %v6965_v22, %s4905_s12  ;;  %v3996_v11 = vpop.permute.xlu1 %3995  ;;  %v4207_v26 = vsel %vm2756_vm3, %v4175_v15, %v6844_v61  ;;  %v3367_v8 = vsel %vm5192_vm10, %v3362_v48, %v3366_v5  ;;  %v3560_v59 = vrot.slane %v6971_v10, 5  ;;  %v3190_v6 = vshrl.u32 %v7039_v42, 16  ;;  %v2998_v5 = vld [vmem:[#allocation2 + $0x128] sm:$0x1] }
 0x1f6   :  { %v7044_v40 = vcombine.low %v3357_v36, %v3367_v8  ;;  %v3559_v62 = vrot.slane %v3557_v53, 4  ;;  %v3186_v29 = vshll.u32 %v7039_v42, 16  ;;  %v8203_v36 = vld [vmem:[#allocation42_spill] sm:$0xff] }
 0x1f7   :  { %v6995_v43 = vpop.permute.xlu0 %3873  ;;  %2528 = vrot.lane.b32.xlu1 %v8200_v39, %s4903_s19  ;;  %v3192_v60 = vrot.slane %v3190_v6, 4 }
 0x1f8   :  { %v3561_v10 = vsel %vm5181_vm8, %v3559_v62, %v3560_v59  ;;  %v3188_v45 = vrot.slane %v3186_v29, 5  ;;  %v3508_v59 = vrot.slane %v7039_v42, 5 }
 0x1f9   :  { %3748 = vrot.lane.b32.xlu0 %v6850_v24, %s4899_s8  ;;  %v2577_v31 = vpop.permute.xlu1 %2576  ;;  %v4239_v24 = vsel %vm2789_vm4, %v4207_v26, %v6957_v57  ;;  %v7037_v57 = vld [vmem:[#allocation2 + $0x120] sm:$0xf] }
 0x1fa   :  { %v2857_v23 = vsel %vm2855_vm6, %v2824_v49, %v2577_v31  ;;  %v4271_v61 = vsel %vm2822_vm5, %v4239_v24, %v3996_v11  ;;  %v3177_v16 = vshrl.u32 %v7037_v57, 16  ;;  %v3180_v11 = vshll.u32 %v7037_v57, 16  ;;  %v8202_v49 = vld [vmem:[#allocation36_spill] sm:$0xff] }
 0x1fb   :  { %v7017_v14 = vpop.permute.xlu0 %3908  ;;  %3982 = vrot.lane.b32.xlu1 %v7005_v2, %s4903_s19  ;;  %v2892_v58 = vsel %vm2888_vm7, %v2857_v23, 0  ;;  %v3193_v26 = vor.u32 %v3192_v60, %v3188_v45  ;;  %v7086_v8 = vcombine.low %v7037_v57, %v7039_v42 }
 0x1fc   :  { %4705 = vmatpush3.bf16.xpose.msra.mxu0 %v2892_v58  ;;  %v3179_v63 = vrot.slane %v3177_v16, 4  ;;  %v3182_v12 = vrot.slane %v3180_v11, 5  ;;  %v3196_v58 = vshll.u32 %v2998_v5, 16  ;;  %v7107_v11 = vld [vmem:[#allocation2 + $0x180] sm:$0xf] }
 0x1fd   :  { %3828 = vrot.lane.b32.xlu0 %v6877_v25, %s4898_s5  ;;  %v4031_v4 = vpop.permute.xlu1 %4030  ;;  %v4580_v25 = vrot.slane %v6934_v30, 9 }
 0x1fe   :  { %v4303_v46 = vsel %vm2855_vm6, %v4271_v61, %v4031_v4  ;;  %v3183_v23 = vor.u32 %v3182_v12, %v3179_v63  ;;  %v3194_v4 = vrot.slane %v3193_v26, 4  ;;  %v3510_v63 = vrot.slane %v3508_v59, 4  ;;  %v8205_v26 = vld [vmem:[#allocation48_spill] sm:$0xff] }
 0x1ff   :  { %v7035_v17 = vpop.permute.xlu0 %3943  ;;  %2563 = vrot.lane.b32.xlu1 %v8201_v55, %s4904_s7  ;;  %v4334_v51 = vsel %vm2888_vm7, %v4303_v46, 0  ;;  %v3558_v30 = vsel %vm5181_vm8, %v4580_v25, %v3557_v53  ;;  %v3198_v46 = vrot.slane %v3196_v58, 5  ;;  %v3511_v12 = vrot.slane %v2998_v5, 5  ;;  %v8206_v58 = vld [vmem:[#allocation27_spill] sm:$0xff] }
 0x200   :  { %4723 = vmatpush3.bf16.xpose.msra.mxu1 %v4334_v51  ;;  %v7072_v31 = vcombine.low %v3558_v30, %v3561_v10  ;;  %v3184_v61 = vrot.slane %v3183_v23, 4  ;;  %v7113_v30 = vld [vmem:[#allocation2 + $0x184] sm:$0xf]  ;;  %v4573_v10 = vrot.slane %v7037_v57, 9 }
 0x201   :  { %3863 = vrot.lane.b32.xlu0 %v6892_v9, %s4900_s6  ;;  %v7050_v27 = vpop.permute.xlu1 %3742  ;;  %v3199_v62 = vsel %vm5192_vm10, %v3194_v4, %v3198_v46  ;;  %v3382_v60 = vshrl.u32 %v7113_v30, 16  ;;  %v3512_v5 = vsel %vm5181_vm8, %v3510_v63, %v3511_v12  ;;  %v8208_v63 = vld [vmem:[#allocation20_spill] sm:$0xff] }
 0x202   :  { %v3189_v25 = vsel %vm5192_vm10, %v3184_v61, %v3188_v45  ;;  %v3369_v45 = vshrl.u32 %v7107_v11, 16  ;;  %v3509_v57 = vsel %vm5181_vm8, %v4573_v10, %v3508_v59  ;;  %v2614_v61 = vsel %vm2608_vm14, %v8206_v58, %v8205_v26  ;;  %v8207_v10 = vld [vmem:[#allocation59_spill] sm:$0xff]  ;;  %v8209_v26 = vld [vmem:[#allocation10_spill] sm:$0xff] }
 0x203   :  { %v7056_v38 = vpop.permute.xlu0 %3962  ;;  %4017 = vrot.lane.b32.xlu1 %v7044_v40, %s4904_s7  ;;  %v7111_v6 = vcombine.low %v3189_v25, %v3199_v62  ;;  %v3384_v59 = vrot.slane %v3382_v60, 4  ;;  %v2638_v12 = vsel %vm2608_vm14, %v8208_v63, %v8207_v10  ;;  %v2661_v58 = vsel %vm2657_vm15, %v2614_v61, %v8209_v26 }
 0x204   :  { %v3371_v46 = vrot.slane %v3369_v45, 4  ;;  %v4091_v45 = vsel %vm2608_vm14, %v6381_v37, %v6963_v28  ;;  %v2694_v60 = vsel %vm2690_vm1, %v2661_v58, %v6449_v18  ;;  %v4067_v28 = vsel %vm2608_vm14, %v6255_v41, %v7050_v27 }
 0x205   :  { %3898 = vrot.lane.b32.xlu0 %v6936_v33, %s4901_s20  ;;  %v7066_v19 = vpop.permute.xlu1 %3822  ;;  %v2727_v61 = vsel %vm2723_vm2, %v2694_v60, %v6581_v47 }
 0x206   :  { %v4113_v18 = vsel %vm2657_vm15, %v4067_v28, %v7066_v19  ;;  %v2760_v41 = vsel %vm2756_vm3, %v2727_v61, %v6711_v35 }
 0x207   :  { %v7068_v48 = vpop.permute.xlu0 %2543  ;;  %2598 = vrot.lane.b32.xlu1 %v8202_v49, %s4905_s12  ;;  %v3378_v49 = vshll.u32 %v7113_v30, 16  ;;  %v2793_v19 = vsel %vm2789_vm4, %v2760_v41, %v6840_v50 }
 0x208   :  { %v2826_v50 = vsel %vm2822_vm5, %v2793_v19, %v7068_v48 }
 0x209   :  { %3933 = vrot.lane.b32.xlu0 %v6965_v22, %s4902_s10  ;;  %v7076_v15 = vpop.permute.xlu1 %3857  ;;  %v7139_v62 = vrot.slane %v3378_v49, 5 }
 0x20a   :  { %v4145_v27 = vsel %vm2690_vm1, %v4113_v18, %v7076_v15 }
 0x20b   :  { %v7078_v24 = vpop.permute.xlu0 %3997  ;;  %4052 = vrot.lane.b32.xlu1 %v7072_v31, %s4905_s12 }
 0x20d   :  { %2514 = vrot.lane.b32.xlu0 %v8203_v36, %s4903_s19  ;;  %v7088_v53 = vpop.permute.xlu1 %3892  ;;  %v7151_v36 = vld [vmem:[#allocation2 + $0x188] sm:$0x1] }
 0x20f   :  { %v7090_v55 = vpop.permute.xlu0 %2578  ;;  %3764 = vrot.lane.b32.xlu1 %v6777_v32, %s4899_s8  ;;  %v8204_v32 = vld [vmem:[#allocation12_spill] sm:$0xff] }
 0x210   :  { %v2859_v58 = vsel %vm2855_vm6, %v2826_v50, %v7090_v55 }
 0x211   :  { %3968 = vrot.lane.b32.xlu0 %v7086_v8, %s4903_s19  ;;  %v7096_v51 = vpop.permute.xlu1 %3927 }
 0x213   :  { %v7103_v16 = vpop.permute.xlu0 %4032  ;;  %3844 = vrot.lane.b32.xlu1 %v6804_v1, %s4898_s5  ;;  %v3372_v1 = vshll.u32 %v7107_v11, 16 }
 0x215   :  { %2549 = vrot.lane.b32.xlu0 %v8204_v32, %s4904_s7  ;;  %v2525_v29 = vpop.permute.xlu1 %2524  ;;  %v3374_v25 = vrot.slane %v3372_v1, 5  ;;  %v7141_v32 = vcombine.low %v3509_v57, %v3512_v5 }
 0x217   :  { %v7116_v42 = vpop.permute.xlu0 %3744  ;;  %3879 = vrot.lane.b32.xlu1 %v7005_v2, %s4900_s6  ;;  %v3375_v57 = vor.u32 %v3374_v25, %v3371_v46  ;;  %v3385_v46 = vor.u32 %v3384_v59, %v7139_v62  ;;  %v4177_v25 = vsel %vm2723_vm2, %v4145_v27, %v7088_v53  ;;  %v7188_v59 = vcombine.low %v7107_v11, %v7113_v30  ;;  %v8210_v53 = vld [vmem:[#allocation30_spill] sm:$0xff] }
 0x218   :  { %v4209_v15 = vsel %vm2756_vm3, %v4177_v25, %v7096_v51 }
 0x219   :  { %4003 = vrot.lane.b32.xlu0 %v7111_v6, %s4904_s7  ;;  %v3979_v23 = vpop.permute.xlu1 %3978  ;;  %v3376_v10 = vrot.slane %v3375_v57, 4  ;;  %v4241_v48 = vsel %vm2789_vm4, %v4209_v15, %v7056_v38 }
 0x21a   :  { %v4273_v57 = vsel %vm2822_vm5, %v4241_v48, %v7078_v24  ;;  %v3564_v24 = vrot.slane %v7113_v30, 5 }
 0x21b   :  { %v7133_v4 = vpop.permute.xlu0 %3824  ;;  %3914 = vrot.lane.b32.xlu1 %v7044_v40, %s4901_s20 }
 0x21d   :  { %2584 = vrot.lane.b32.xlu0 %v5692_v3, %s4905_s12  ;;  %v2560_v1 = vpop.permute.xlu1 %2559  ;;  %v2677_v3 = vsel %vm2657_vm15, %v2638_v12, %v6342_v20  ;;  %v4129_v20 = vsel %vm2657_vm15, %v4091_v45, %v6975_v44  ;;  %v3386_v45 = vrot.slane %v3385_v46, 4  ;;  %v3566_v46 = vrot.slane %v3564_v24, 4 }
 0x21e   :  { %v2710_v5 = vsel %vm2690_vm1, %v2677_v3, %v6514_v13  ;;  %v3388_v13 = vshll.u32 %v7151_v36, 16  ;;  %v4161_v35 = vsel %vm2690_vm1, %v4129_v20, %v6995_v43  ;;  %v7236_v20 = vld [vmem:[#allocation2 + $0x12c] sm:$0xf] }
 0x21f   :  { %v7157_v49 = vpop.permute.xlu0 %3859  ;;  %3949 = vrot.lane.b32.xlu1 %v7072_v31, %s4902_s10  ;;  %v2743_v47 = vsel %vm2723_vm2, %v2710_v5, %v6641_v52  ;;  %v4193_v51 = vsel %vm2723_vm2, %v4161_v35, %v7017_v14  ;;  %v3381_v14 = vsel %vm5192_vm10, %v3376_v10, %v7139_v62  ;;  %v3201_v41 = vshrl.u32 %v7236_v20, 16 }
 0x220   :  { %v2776_v52 = vsel %vm2756_vm3, %v2743_v47, %v6779_v34  ;;  %v3390_v3 = vrot.slane %v3388_v13, 5  ;;  %v4225_v55 = vsel %vm2756_vm3, %v4193_v51, %v7035_v17  ;;  %v3567_v13 = vrot.slane %v7151_v36, 5 }
 0x221   :  { %4038 = vrot.lane.b32.xlu0 %v7141_v32, %s4905_s12  ;;  %v4014_v44 = vpop.permute.xlu1 %4013  ;;  %v2809_v26 = vsel %vm2789_vm4, %v2776_v52, %v2525_v29  ;;  %v4257_v38 = vsel %vm2789_vm4, %v4225_v55, %v3979_v23  ;;  %v7238_v23 = vld [vmem:[#allocation2 + $0x130] sm:$0xf]  ;;  %v3204_v27 = vshll.u32 %v7236_v20, 16  ;;  %v3203_v52 = vrot.slane %v3201_v41, 4 }
 0x222   :  { %v2842_v34 = vsel %vm2822_vm5, %v2809_v26, %v2560_v1  ;;  %v4305_v1 = vsel %vm2855_vm6, %v4273_v57, %v7103_v16  ;;  %v3391_v17 = vsel %vm5192_vm10, %v3386_v45, %v3390_v3  ;;  %v4289_v5 = vsel %vm2822_vm5, %v4257_v38, %v4014_v44  ;;  %v8211_v16 = vld [vmem:[#allocation21_spill] sm:$0xff]  ;;  %v8215_v38 = vld [vmem:[#allocation95_spill] sm:$0xff] }
 0x223   :  { %v7190_v12 = vpop.permute.xlu0 %3894  ;;  %2530 = vrot.lane.b32.xlu1 %v8210_v53, %s4903_s19  ;;  %v4336_v30 = vsel %vm2888_vm7, %v4305_v1, 0  ;;  %v7244_v18 = vcombine.low %v3381_v14, %v3391_v17  ;;  %v3214_v44 = vshrl.u32 %v7238_v23, 16  ;;  %v3210_v19 = vshll.u32 %v7238_v23, 16  ;;  %v8212_v3 = vld [vmem:[#allocation53_spill] sm:$0xff] }
 0x224   :  { %v3568_v36 = vsel %vm5181_vm8, %v3566_v46, %v3567_v13  ;;  %v3206_v35 = vrot.slane %v3204_v27, 5  ;;  %v8218_v46 = vld [vmem:[#allocation73_spill] sm:$0xff] }
 0x225   :  { %3750 = vrot.lane.b32.xlu0 %v6936_v33, %s4899_s8  ;;  %v2595_v43 = vpop.permute.xlu1 %2594  ;;  %v2894_v33 = vsel %vm2888_vm7, %v2859_v58, 0  ;;  %v3212_v15 = vrot.slane %v3210_v19, 5  ;;  %v3216_v50 = vrot.slane %v3214_v44, 4  ;;  %v7262_v58 = vld [vmem:[#allocation2 + $0x134] sm:$0x1] }
 0x226   :  { %v2875_v60 = vsel %vm2855_vm6, %v2842_v34, %v2595_v43  ;;  %v2641_v34 = vsel %vm2608_vm14, %v5938_v56, %v8212_v3  ;;  %v8213_v43 = vld [vmem:[#allocation63_spill] sm:$0xff]  ;;  %v3220_v57 = vshll.u32 %v7262_v58, 16  ;;  %v8216_v56 = vld [vmem:[#allocation106_spill] sm:$0xff] }
 0x227   :  { %v7213_v29 = vpop.permute.xlu0 %3929  ;;  %3984 = vrot.lane.b32.xlu1 %v7188_v59, %s4903_s19  ;;  %4741 = vmatprep.subr.msk.bf16.mxu0 %vm2888_vm7, %v2875_v60  ;;  %v2679_v51 = vsel %vm2657_vm15, %v2641_v34, %v8213_v43  ;;  %v3207_v60 = vor.u32 %v3206_v35, %v3203_v52  ;;  %v3217_v55 = vor.u32 %v3216_v50, %v3212_v15  ;;  %v8219_v3 = vld [vmem:[#allocation15_spill] sm:$0xff]  ;;  %v7315_v34 = vld [vmem:[#allocation2 + $0x18c] sm:$0xf] }
 0x228   :  { %4707 = vmatpush3.bf16.xpose.msra.mxu0 %v2894_v33  ;;  %v8214_v33 = vld [vmem:[#allocation80_spill] sm:$0xff] }
 0x229   :  { %3830 = vrot.lane.b32.xlu0 %v6965_v22, %s4898_s5  ;;  %v4049_v61 = vpop.permute.xlu1 %4048  ;;  %v4581_v22 = vrot.slane %v7107_v11, 9 }
 0x22a   :  { %v4321_v28 = vsel %vm2855_vm6, %v4289_v5, %v4049_v61  ;;  %v7288_v5 = vcombine.low %v7236_v20, %v7238_v23 }
 0x22b   :  { %v2527_v62 = vpop.permute.xlu0 %2526  ;;  %2565 = vrot.lane.b32.xlu1 %v8211_v16, %s4904_s7  ;;  %4749 = vmatprep.subr.msk.bf16.mxu1 %vm2888_vm7, %v4321_v28  ;;  %v3565_v11 = vsel %vm5181_vm8, %v4581_v22, %v3564_v24  ;;  %v8217_v24 = vld [vmem:[#allocation35_spill] sm:$0xff]  ;;  %v3208_v16 = vrot.slane %v3207_v60, 4  ;;  %v3222_v22 = vrot.slane %v3220_v57, 5  ;;  %v3518_v60 = vrot.slane %v7262_v58, 5 }
 0x22c   :  { %4725 = vmatpush3.bf16.xpose.msra.mxu1 %v4336_v30  ;;  %v7266_v45 = vcombine.low %v3565_v11, %v3568_v36  ;;  %v3218_v30 = vrot.slane %v3217_v55, 4  ;;  %v3393_v55 = vshrl.u32 %v7315_v34, 16  ;;  %v3396_v57 = vshll.u32 %v7315_v34, 16 }
 0x22d   :  { %3865 = vrot.lane.b32.xlu0 %v7086_v8, %s4900_s6  ;;  %v3761_v47 = vpop.permute.xlu1 %3760  ;;  %v3213_v36 = vsel %vm5192_vm10, %v3208_v16, %v3212_v15  ;;  %v8223_v16 = vld [vmem:[#allocation46_spill] sm:$0xff] }
 0x22e   :  { %v4094_v13 = vsel %vm2608_vm14, %v8218_v46, %v3761_v47  ;;  %v3398_v46 = vrot.slane %v3396_v57, 5 }
 0x22f   :  { %v3981_v25 = vpop.permute.xlu0 %3980  ;;  %4019 = vrot.lane.b32.xlu1 %v7244_v18, %s4904_s7 }
 0x231   :  { %3900 = vrot.lane.b32.xlu0 %v7111_v6, %s4901_s20  ;;  %v3841_v10 = vpop.permute.xlu1 %3840 }
 0x232   :  { %v4131_v44 = vsel %vm2657_vm15, %v4094_v13, %v3841_v10  ;;  %v3223_v10 = vsel %vm5192_vm10, %v3218_v30, %v3222_v22  ;;  %v3395_v22 = vrot.slane %v3393_v55, 4  ;;  %v8224_v13 = vld [vmem:[#allocation31_spill] sm:$0xff] }
 0x233   :  { %v2562_v26 = vpop.permute.xlu0 %2561  ;;  %2600 = vrot.lane.b32.xlu1 %v5785_v0, %s4905_s12  ;;  %v2712_v0 = vsel %vm2690_vm1, %v2679_v51, %v8214_v33  ;;  %v7317_v15 = vcombine.low %v3213_v36, %v3223_v10  ;;  %v7320_v51 = vld [vmem:[#allocation2 + $0x190] sm:$0xf]  ;;  %v8226_v36 = vld [vmem:[#allocation88_spill] sm:$0xff] }
 0x234   :  { %v2745_v1 = vsel %vm2723_vm2, %v2712_v0, %v8215_v38  ;;  %v8220_v33 = vld [vmem:[#allocation7_spill] sm:$0xff]  ;;  %v8221_v0 = vld [vmem:[#allocation38_spill] sm:$0xff]  ;;  %v3402_v58 = vshll.u32 %v7320_v51, 16  ;;  %v8222_v38 = vld [vmem:[#allocation85_spill] sm:$0xff] }
 0x235   :  { %3935 = vrot.lane.b32.xlu0 %v7141_v32, %s4902_s10  ;;  %v3876_v48 = vpop.permute.xlu1 %3875  ;;  %v2778_v17 = vsel %vm2756_vm3, %v2745_v1, %v8216_v56  ;;  %v4070_v1 = vsel %vm2608_vm14, %v8222_v38, %v7116_v42 }
 0x236   :  { %v2811_v28 = vsel %vm2789_vm4, %v2778_v17, %v2527_v62  ;;  %v4163_v11 = vsel %vm2690_vm1, %v4131_v44, %v3876_v48  ;;  %v4574_v48 = vrot.slane %v7236_v20, 9  ;;  %v3406_v20 = vshrl.u32 %v7320_v51, 16 }
 0x237   :  { %v4016_v14 = vpop.permute.xlu0 %4015  ;;  %4054 = vrot.lane.b32.xlu1 %v7266_v45, %s4905_s12  ;;  %v2844_v41 = vsel %vm2822_vm5, %v2811_v28, %v2562_v26  ;;  %v4115_v42 = vsel %vm2657_vm15, %v4070_v1, %v7133_v4 }
 0x239   :  { %2516 = vrot.lane.b32.xlu0 %v8217_v24, %s4903_s19  ;;  %v3911_v61 = vpop.permute.xlu1 %3910 }
 0x23a   :  { %v4195_v62 = vsel %vm2723_vm2, %v4163_v11, %v3911_v61 }
 0x23b   :  { %v2597_v27 = vpop.permute.xlu0 %2596  ;;  %3766 = vrot.lane.b32.xlu1 %v7044_v40, %s4899_s8  ;;  %v3515_v40 = vrot.slane %v7238_v23, 5 }
 0x23c   :  { %v2877_v19 = vsel %vm2855_vm6, %v2844_v41, %v2597_v27  ;;  %v3404_v41 = vrot.slane %v3402_v58, 5  ;;  %v3408_v27 = vrot.slane %v3406_v20, 4  ;;  %v7386_v20 = vcombine.low %v7315_v34, %v7320_v51 }
 0x23d   :  { %3970 = vrot.lane.b32.xlu0 %v7288_v5, %s4903_s19  ;;  %4742 = vmatprep.subr.msk.bf16.mxu0 %vm2888_vm7, %v2877_v19  ;;  %v3946_v47 = vpop.permute.xlu1 %3945  ;;  %v3516_v17 = vsel %vm5181_vm8, %v4574_v48, %v3515_v40  ;;  %v8225_v19 = vld [vmem:[#allocation71_spill] sm:$0xff] }
 0x23e   :  { %v4227_v52 = vsel %vm2756_vm3, %v4195_v62, %v3946_v47  ;;  %v3025_v47 = vld [vmem:[#allocation2 + $0x194] sm:$0x1] }
 0x23f   :  { %v4051_v35 = vpop.permute.xlu0 %4050  ;;  %v4259_v50 = vsel %vm2789_vm4, %v4227_v52, %v3981_v25  ;;  %3846 = vrot.lane.b32.xlu1 %v7072_v31, %s4898_s5  ;;  %v3517_v25 = vrot.slane %v3515_v40, 4  ;;  %v8227_v52 = vld [vmem:[#allocation100_spill] sm:$0xff]  ;;  %v3412_v48 = vshll.u32 %v3025_v47, 16 }
 0x240   :  { %v4291_v26 = vsel %vm2822_vm5, %v4259_v50, %v4016_v14  ;;  %v2617_v14 = vsel %vm2608_vm14, %v8221_v0, %v8220_v33  ;;  %v8228_v50 = vld [vmem:[#allocation112_spill] sm:$0xff]  ;;  %v8229_v0 = vld [vmem:[#allocation41_spill] sm:$0xff] }
 0x241   :  { %2551 = vrot.lane.b32.xlu0 %v8219_v3, %s4904_s7  ;;  %v3965_v43 = vpop.permute.xlu1 %3964  ;;  %v4323_v23 = vsel %vm2855_vm6, %v4291_v26, %v4051_v35  ;;  %v3519_v61 = vsel %vm5181_vm8, %v3517_v25, %v3518_v60  ;;  %v2663_v30 = vsel %vm2657_vm15, %v2617_v14, %v8223_v16  ;;  %v4147_v35 = vsel %vm2690_vm1, %v4115_v42, %v7157_v49  ;;  %v8230_v42 = vld [vmem:[#allocation26_spill] sm:$0xff] }
 0x242   :  { %4750 = vmatprep.subr.msk.bf16.mxu1 %vm2888_vm7, %v4323_v23  ;;  %v7355_v44 = vcombine.low %v3516_v17, %v3519_v61  ;;  %v2696_v11 = vsel %vm2690_vm1, %v2663_v30, %v8225_v19  ;;  %v3399_v3 = vor.u32 %v3398_v46, %v3395_v22  ;;  %v3409_v23 = vor.u32 %v3408_v27, %v3404_v41 }
 0x243   :  { %v7325_v31 = vpop.permute.xlu0 %3762  ;;  %3881 = vrot.lane.b32.xlu1 %v7188_v59, %s4900_s6  ;;  %v2729_v10 = vsel %vm2723_vm2, %v2696_v11, %v8226_v36  ;;  %v4179_v55 = vsel %vm2723_vm2, %v4147_v35, %v7190_v12  ;;  %v3414_v1 = vrot.slane %v3412_v48, 5  ;;  %v4582_v27 = vrot.slane %v7315_v34, 9  ;;  %v8231_v36 = vld [vmem:[#allocation37_spill] sm:$0xff]  ;;  %v8232_v35 = vld [vmem:[#allocation43_spill] sm:$0xff]  ;;  %v8233_v48 = vld [vmem:[#allocation14_spill] sm:$0xff] }
 0x244   :  { %v2762_v4 = vsel %vm2756_vm3, %v2729_v10, %v8227_v52  ;;  %v4211_v33 = vsel %vm2756_vm3, %v4179_v55, %v7213_v29  ;;  %v3400_v12 = vrot.slane %v3399_v3, 4  ;;  %v3410_v38 = vrot.slane %v3409_v23, 4  ;;  %v7450_v55 = vld [vmem:[#allocation2 + $0x19c] sm:$0xf] }
 0x245   :  { %4005 = vrot.lane.b32.xlu0 %v7317_v15, %s4904_s7  ;;  %v2546_v56 = vpop.permute.xlu1 %2545  ;;  %v2795_v26 = vsel %vm2789_vm4, %v2762_v4, %v8228_v50  ;;  %v4243_v58 = vsel %vm2789_vm4, %v4211_v33, %v3965_v43  ;;  %v8235_v33 = vld [vmem:[#allocation32_spill] sm:$0xff] }
 0x246   :  { %v2828_v25 = vsel %vm2822_vm5, %v2795_v26, %v2546_v56  ;;  %v3405_v43 = vsel %vm5192_vm10, %v3400_v12, %v3404_v41  ;;  %v3415_v30 = vsel %vm5192_vm10, %v3410_v38, %v3414_v1  ;;  %v3574_v41 = vrot.slane %v3025_v47, 5  ;;  %v8236_v12 = vld [vmem:[#allocation61_spill] sm:$0xff]  ;;  %v8237_v38 = vld [vmem:[#allocation24_spill] sm:$0xff] }
 0x247   :  { %v7345_v28 = vpop.permute.xlu0 %3842  ;;  %3916 = vrot.lane.b32.xlu1 %v7244_v18, %s4901_s20  ;;  %v2644_v1 = vsel %vm2608_vm14, %v8237_v38, %v8236_v12 }
 0x249   :  { %2586 = vrot.lane.b32.xlu0 %v8224_v13, %s4905_s12  ;;  %v4000_v62 = vpop.permute.xlu1 %3999  ;;  %v7409_v13 = vcombine.low %v3405_v43, %v3415_v30  ;;  %v8240_v30 = vld [vmem:[#allocation50_spill] sm:$0xff] }
 0x24a   :  { %v4275_v29 = vsel %vm2822_vm5, %v4243_v58, %v4000_v62 }
 0x24b   :  { %v7361_v40 = vpop.permute.xlu0 %3877  ;;  %3951 = vrot.lane.b32.xlu1 %v7266_v45, %s4902_s10 }
 0x24d   :  { %4040 = vrot.lane.b32.xlu0 %v7355_v44, %s4905_s12  ;;  %v2581_v60 = vpop.permute.xlu1 %2580 }
 0x24e   :  { %v2861_v49 = vsel %vm2855_vm6, %v2828_v25, %v2581_v60  ;;  %v7448_v25 = vld [vmem:[#allocation2 + $0x198] sm:$0xf] }
 0x24f   :  { %v7377_v57 = vpop.permute.xlu0 %3912  ;;  %2532 = vrot.lane.b32.xlu1 %v8229_v0, %s4903_s19  ;;  %v2896_v14 = vsel %vm2888_vm7, %v2861_v49, 0  ;;  %v8234_v49 = vld [vmem:[#allocation16_spill] sm:$0xff]  ;;  %v3577_v58 = vshrl.u32 %v7448_v25, 16 }
 0x250   :  { %4709 = vmatpush3.bf16.xpose.msra.mxu0 %v2896_v14 }
 0x251   :  { %3752 = vrot.lane.b32.xlu0 %v7111_v6, %s4899_s8  ;;  %v4035_v56 = vpop.permute.xlu1 %4034  ;;  %v3571_v6 = vrot.slane %v7320_v51, 5 }
 0x252   :  { %v4307_v17 = vsel %vm2855_vm6, %v4275_v29, %v4035_v56  ;;  %v3590_v29 = vshrl.u32 %v7450_v55, 16  ;;  %v8238_v56 = vld [vmem:[#allocation67_spill] sm:$0xff] }
 0x253   :  { %v7393_v61 = vpop.permute.xlu0 %3947  ;;  %3986 = vrot.lane.b32.xlu1 %v7386_v20, %s4903_s19  ;;  %v4338_v16 = vsel %vm2888_vm7, %v4307_v17, 0  ;;  %v3573_v19 = vrot.slane %v3571_v6, 4  ;;  %v3586_v17 = vshll.u32 %v7450_v55, 16 }
 0x254   :  { %4727 = vmatpush3.bf16.xpose.msra.mxu1 %v4338_v16  ;;  %v8239_v16 = vld [vmem:[#allocation74_spill] sm:$0xff] }
 0x255   :  { %3832 = vrot.lane.b32.xlu0 %v7141_v32, %s4898_s5  ;;  %v3747_v22 = vpop.permute.xlu1 %3746  ;;  %v3572_v32 = vsel %vm5181_vm8, %v4582_v27, %v3571_v6  ;;  %v3575_v62 = vsel %vm5181_vm8, %v3573_v19, %v3574_v41  ;;  %v2681_v43 = vsel %vm2657_vm15, %v2644_v1, %v8239_v16  ;;  %v8242_v41 = vld [vmem:[#allocation83_spill] sm:$0xff] }
 0x256   :  { %v7428_v10 = vcombine.low %v3572_v32, %v3575_v62  ;;  %v8243_v62 = vld [vmem:[#allocation90_spill] sm:$0xff]  ;;  %v8246_v16 = vld [vmem:[#allocation23_spill] sm:$0xff] }
 0x257   :  { %v7405_v46 = vpop.permute.xlu0 %3966  ;;  %2567 = vrot.lane.b32.xlu1 %v8230_v42, %s4904_s7  ;;  %v8241_v42 = vld [vmem:[#allocation102_spill] sm:$0xff] }
 0x258   :  { %v4097_v27 = vsel %vm2608_vm14, %v8241_v42, %v7325_v31 }
 0x259   :  { %3867 = vrot.lane.b32.xlu0 %v7288_v5, %s4900_s6  ;;  %v3827_v11 = vpop.permute.xlu1 %3826  ;;  %v4133_v38 = vsel %vm2657_vm15, %v4097_v27, %v7345_v28  ;;  %v8250_v27 = vld [vmem:[#allocation11_spill] sm:$0xff] }
 0x25b   :  { %v7414_v51 = vpop.permute.xlu0 %2547  ;;  %4021 = vrot.lane.b32.xlu1 %v7409_v13, %s4904_s7 }
 0x25d   :  { %3902 = vrot.lane.b32.xlu0 %v7317_v15, %s4901_s20  ;;  %v3862_v34 = vpop.permute.xlu1 %3861 }
 0x25f   :  { %v7424_v47 = vpop.permute.xlu0 %4001  ;;  %2602 = vrot.lane.b32.xlu1 %v8231_v36, %s4905_s12  ;;  %v2714_v36 = vsel %vm2690_vm1, %v2681_v43, %v8243_v62  ;;  %v3588_v43 = vrot.slane %v3586_v17, 5  ;;  %v8249_v62 = vld [vmem:[#allocation18_spill] sm:$0xff] }
 0x261   :  { %3937 = vrot.lane.b32.xlu0 %v7355_v44, %s4902_s10  ;;  %v3897_v52 = vpop.permute.xlu1 %3896 }
 0x263   :  { %v2583_v4 = vpop.permute.xlu0 %2582  ;;  %4056 = vrot.lane.b32.xlu1 %v7428_v10, %s4905_s12 }
 0x265   :  { %2518 = vrot.lane.b32.xlu0 %v8232_v35, %s4903_s19  ;;  %v3932_v50 = vpop.permute.xlu1 %3931 }
 0x267   :  { %v7436_v26 = vpop.permute.xlu0 %4036  ;;  %3768 = vrot.lane.b32.xlu1 %v7244_v18, %s4899_s8  ;;  %v2620_v18 = vsel %vm2608_vm14, %v8235_v33, %v8234_v49  ;;  %v8245_v33 = vld [vmem:[#allocation93_spill] sm:$0xff] }
 0x268   :  { %v2665_v6 = vsel %vm2657_vm15, %v2620_v18, %v8240_v30  ;;  %v4073_v12 = vsel %vm2608_vm14, %v8245_v33, %v3747_v22  ;;  %v3579_v18 = vrot.slane %v3577_v58, 4  ;;  %v3592_v30 = vrot.slane %v3590_v29, 4 }
 0x269   :  { %3972 = vrot.lane.b32.xlu0 %v6898_v7, %s4903_s19  ;;  %v2529_v3 = vpop.permute.xlu1 %2528  ;;  %v2698_v32 = vsel %vm2690_vm1, %v2665_v6, %v8242_v41  ;;  %v4117_v1 = vsel %vm2657_vm15, %v4073_v12, %v3827_v11  ;;  %v8247_v6 = vld [vmem:[#allocation103_spill] sm:$0xff]  ;;  %v8248_v41 = vld [vmem:[#allocation34_spill] sm:$0xff]  ;;  %v4165_v29 = vsel %vm2690_vm1, %v4133_v38, %v7361_v40 }
 0x26a   :  { %v2747_v42 = vsel %vm2723_vm2, %v2714_v36, %v8247_v6 }
 0x26b   :  { %v7442_v23 = vpop.permute.xlu0 %3748  ;;  %3848 = vrot.lane.b32.xlu1 %v7266_v45, %s4898_s5  ;;  %v3580_v45 = vshll.u32 %v7448_v25, 16  ;;  %v2780_v28 = vsel %vm2756_vm3, %v2747_v42, %v8249_v62 }
 0x26c   :  { %v2813_v33 = vsel %vm2789_vm4, %v2780_v28, %v2529_v3  ;;  %v7523_v3 = vcombine.low %v7448_v25, %v7450_v55 }
 0x26d   :  { %2553 = vrot.lane.b32.xlu0 %v8233_v48, %s4904_s7  ;;  %v3983_v60 = vpop.permute.xlu1 %3982  ;;  %v8244_v48 = vld [vmem:[#allocation97_spill] sm:$0xff]  ;;  %v3582_v31 = vrot.slane %v3580_v45, 5 }
 0x26e   :  { %v2731_v49 = vsel %vm2723_vm2, %v2698_v32, %v8244_v48  ;;  %v4149_v32 = vsel %vm2690_vm1, %v4117_v1, %v3862_v34  ;;  %v3028_v45 = vld [vmem:[#allocation2 + $0x1a0] sm:$0x1]  ;;  %v3593_v1 = vor.u32 %v3592_v30, %v3588_v43  ;;  %v8252_v30 = vld [vmem:[#allocation47_spill] sm:$0xff] }
 0x26f   :  { %v7455_v14 = vpop.permute.xlu0 %3828  ;;  %3883 = vrot.lane.b32.xlu1 %v7386_v20, %s4900_s6  ;;  %v2764_v22 = vsel %vm2756_vm3, %v2731_v49, %v8248_v41  ;;  %v4181_v48 = vsel %vm2723_vm2, %v4149_v32, %v3897_v52  ;;  %v3583_v49 = vor.u32 %v3582_v31, %v3579_v18  ;;  %v3596_v52 = vshll.u32 %v3028_v45, 16 }
 0x270   :  { %v2797_v11 = vsel %vm2789_vm4, %v2764_v22, %v8250_v27  ;;  %v4213_v36 = vsel %vm2756_vm3, %v4181_v48, %v3932_v50  ;;  %v4197_v50 = vsel %vm2723_vm2, %v4165_v29, %v7377_v57  ;;  %v3594_v41 = vrot.slane %v3593_v1, 4 }
 0x271   :  { %4007 = vrot.lane.b32.xlu0 %v8238_v56, %s4904_s7  ;;  %v2564_v19 = vpop.permute.xlu1 %2563  ;;  %v2830_v34 = vsel %vm2822_vm5, %v2797_v11, %v7414_v51  ;;  %v4245_v51 = vsel %vm2789_vm4, %v4213_v36, %v7405_v46  ;;  %v4229_v31 = vsel %vm2756_vm3, %v4197_v50, %v7393_v61  ;;  %v3584_v46 = vrot.slane %v3583_v49, 4  ;;  %v8253_v11 = vld [vmem:[#allocation54_spill] sm:$0xff]  ;;  %v7606_v50 = vld [vmem:[#allocation2 + $0xd0] sm:$0xf] }
 0x272   :  { %v2863_v12 = vsel %vm2855_vm6, %v2830_v34, %v2583_v4  ;;  %v2846_v40 = vsel %vm2822_vm5, %v2813_v33, %v2564_v19  ;;  %v4277_v19 = vsel %vm2822_vm5, %v4245_v51, %v7424_v47  ;;  %v4261_v6 = vsel %vm2789_vm4, %v4229_v31, %v3983_v60 }
 0x273   :  { %v7479_v35 = vpop.permute.xlu0 %3863  ;;  %3918 = vrot.lane.b32.xlu1 %v7409_v13, %s4901_s20  ;;  %v2898_v57 = vsel %vm2888_vm7, %v2863_v12, 0  ;;  %v4309_v42 = vsel %vm2855_vm6, %v4277_v19, %v7436_v26  ;;  %v3598_v22 = vrot.slane %v3596_v52, 5  ;;  %v3589_v60 = vsel %vm5192_vm10, %v3584_v46, %v3588_v43  ;;  %v7622_v46 = vld [vmem:[#allocation2 + $0x1a8] sm:$0xf] }
 0x274   :  { %v4340_v26 = vsel %vm2888_vm7, %v4309_v42, 0  ;;  %v4583_v29 = vrot.slane %v7448_v25, 9  ;;  %v3608_v36 = vrot.slane %v3028_v45, 5 }
 0x275   :  { %2588 = vrot.lane.b32.xlu0 %v8246_v16, %s4905_s12  ;;  %v4018_v58 = vpop.permute.xlu1 %4017  ;;  %v8251_v16 = vld [vmem:[#allocation76_spill] sm:$0xff] }
 0x276   :  { %v4293_v61 = vsel %vm2822_vm5, %v4261_v6, %v4018_v58  ;;  %v3605_v58 = vrot.slane %v7450_v55, 5 }
 0x277   :  { %v7502_v17 = vpop.permute.xlu0 %3898  ;;  %3953 = vrot.lane.b32.xlu1 %v7428_v10, %s4902_s10 }
 0x278   :  { %v3607_v43 = vrot.slane %v3605_v58, 4 }
 0x279   :  { %4042 = vrot.lane.b32.xlu0 %v8251_v16, %s4905_s12  ;;  %v2599_v38 = vpop.permute.xlu1 %2598 }
 0x27a   :  { %v2879_v18 = vsel %vm2855_vm6, %v2846_v40, %v2599_v38  ;;  %v3609_v49 = vsel %vm5181_vm8, %v3607_v43, %v3608_v36  ;;  %v7644_v43 = vld [vmem:[#allocation2 + $0xd4] sm:$0x1] }
 0x27b   :  { %v7525_v4 = vpop.permute.xlu0 %3933  ;;  %2534 = vrot.lane.b32.xlu1 %v8252_v30, %s4903_s19  ;;  %4743 = vmatprep.subr.msk.bf16.mxu0 %vm2888_vm7, %v2879_v18  ;;  %v2166_v30 = vshll.u32 %v7606_v50, 16 }
 0x27c   :  { %4711 = vmatpush3.bf16.xpose.msra.mxu0 %v2898_v57  ;;  %v8255_v57 = vld [vmem:[#allocation17_spill] sm:$0xff] }
 0x27d   :  { %3754 = vrot.lane.b32.xlu0 %v7317_v15, %s4899_s8  ;;  %v4053_v47 = vpop.permute.xlu1 %4052  ;;  %v3599_v15 = vsel %vm5192_vm10, %v3594_v41, %v3598_v22  ;;  %v8256_v41 = vld [vmem:[#allocation49_spill] sm:$0xff]  ;;  %v8257_v22 = vld [vmem:[#allocation40_spill] sm:$0xff] }
 0x27e   :  { %v4325_v32 = vsel %vm2855_vm6, %v4293_v61, %v4053_v47  ;;  %v7561_v48 = vcombine.low %v3589_v60, %v3599_v15  ;;  %v2623_v61 = vsel %vm2608_vm14, %v8257_v22, %v8256_v41  ;;  %v8258_v47 = vld [vmem:[#allocation56_spill] sm:$0xff]  ;;  %v7636_v15 = vrot.slane %v2166_v30, 5  ;;  %v8266_v22 = vld [vmem:[#allocation89_spill] sm:$0xff] }
 0x27f   :  { %v7542_v62 = vpop.permute.xlu0 %2514  ;;  %3988 = vrot.lane.b32.xlu1 %v7523_v3, %s4903_s19  ;;  %4751 = vmatprep.subr.msk.bf16.mxu1 %vm2888_vm7, %v4325_v32  ;;  %v8259_v32 = vld [vmem:[#allocation29_spill] sm:$0xff] }
 0x280   :  { %4729 = vmatpush3.bf16.xpose.msra.mxu1 %v4340_v26 }
 0x281   :  { %3834 = vrot.lane.b32.xlu0 %v7355_v44, %s4898_s5  ;;  %v7555_v28 = vpop.permute.xlu1 %3764  ;;  %v3606_v44 = vsel %vm5181_vm8, %v4583_v29, %v3605_v58  ;;  %v8260_v58 = vld [vmem:[#allocation114_spill] sm:$0xff]  ;;  %v3624_v29 = vshrl.u32 %v7622_v46, 16 }
 0x282   :  { %v7584_v33 = vcombine.low %v3606_v44, %v3609_v49  ;;  %v3620_v44 = vshll.u32 %v7622_v46, 16  ;;  %v8261_v49 = vld [vmem:[#allocation8_spill] sm:$0xff] }
 0x283   :  { %v7557_v27 = vpop.permute.xlu0 %3968  ;;  %2569 = vrot.lane.b32.xlu1 %v8253_v11, %s4904_s7  ;;  %v4076_v11 = vsel %vm2608_vm14, %v8260_v58, %v7442_v23  ;;  %v8264_v23 = vld [vmem:[#allocation72_spill] sm:$0xff]  ;;  %v2176_v58 = vshll.u32 %v7644_v43, 16 }
 0x285   :  { %3869 = vrot.lane.b32.xlu0 %v6898_v7, %s4900_s6  ;;  %v7566_v55 = vpop.permute.xlu1 %3844  ;;  %v8254_v7 = vld [vmem:[#allocation62_spill] sm:$0xff] }
 0x287   :  { %v7568_v34 = vpop.permute.xlu0 %2549  ;;  %4023 = vrot.lane.b32.xlu1 %v7561_v48, %s4904_s7 }
 0x289   :  { %3904 = vrot.lane.b32.xlu0 %v8238_v56, %s4901_s20  ;;  %v7578_v25 = vpop.permute.xlu1 %3879  ;;  %v7594_v56 = vld [vmem:[#allocation2 + $0xcc] sm:$0xf] }
 0x28a   :  { %v2157_v38 = vshrl.u32 %v7594_v56, 16 }
 0x28b   :  { %v7580_v45 = vpop.permute.xlu0 %4003  ;;  %2604 = vrot.lane.b32.xlu1 %v8254_v7, %s4905_s12  ;;  %v2667_v7 = vsel %vm2657_vm15, %v2623_v61, %v8261_v49  ;;  %v4119_v61 = vsel %vm2657_vm15, %v4076_v11, %v7455_v14  ;;  %v8267_v49 = vld [vmem:[#allocation96_spill] sm:$0xff]  ;;  %v8269_v11 = vld [vmem:[#allocation107_spill] sm:$0xff] }
 0x28c   :  { %v2159_v31 = vrot.slane %v2157_v38, 4  ;;  %v8262_v38 = vld [vmem:[#allocation65_spill] sm:$0xff] }
 0x28d   :  { %3939 = vrot.lane.b32.xlu0 %v8251_v16, %s4902_s10  ;;  %v7588_v12 = vpop.permute.xlu1 %3914  ;;  %v2160_v16 = vshll.u32 %v7594_v56, 16 }
 0x28f   :  { %v7590_v1 = vpop.permute.xlu0 %2584  ;;  %4058 = vrot.lane.b32.xlu1 %v7584_v33, %s4905_s12  ;;  %v2162_v19 = vrot.slane %v2160_v16, 5 }
 0x291   :  { %2520 = vrot.lane.b32.xlu0 %v8208_v63, %s4903_s19  ;;  %v7598_v52 = vpop.permute.xlu1 %3949  ;;  %v7614_v63 = vld [vmem:[#allocation2 + $0x1a4] sm:$0xf]  ;;  %v2163_v60 = vor.u32 %v2162_v19, %v2159_v31  ;;  %v8263_v31 = vld [vmem:[#allocation79_spill] sm:$0xff]  ;;  %v2700_v19 = vsel %vm2690_vm1, %v2667_v7, %v8264_v23 }
 0x292   :  { %v3611_v6 = vshrl.u32 %v7614_v63, 16  ;;  %v3614_v42 = vshll.u32 %v7614_v63, 16  ;;  %v8270_v23 = vld [vmem:[#allocation25_spill] sm:$0xff] }
 0x293   :  { %v7600_v40 = vpop.permute.xlu0 %4038  ;;  %3770 = vrot.lane.b32.xlu1 %v7409_v13, %s4899_s8  ;;  %v2170_v13 = vshrl.u32 %v7606_v50, 16 }
 0x294   :  { %v3613_v41 = vrot.slane %v3611_v6, 4 }
 0x295   :  { %3974 = vrot.lane.b32.xlu0 %v6381_v37, %s4903_s19  ;;  %v7610_v51 = vpop.permute.xlu1 %2530  ;;  %v2172_v36 = vrot.slane %v2170_v13, 4  ;;  %v3616_v13 = vrot.slane %v3614_v42, 5  ;;  %v7669_v42 = vld [vmem:[#allocation2 + $0x1ac] sm:$0x1] }
 0x297   :  { %v7612_v18 = vpop.permute.xlu0 %3750  ;;  %3850 = vrot.lane.b32.xlu1 %v7428_v10, %s4898_s5  ;;  %v2647_v10 = vsel %vm2608_vm14, %v8259_v32, %v8258_v47  ;;  %v2733_v47 = vsel %vm2723_vm2, %v2700_v19, %v8266_v22  ;;  %v2173_v6 = vor.u32 %v2172_v36, %v7636_v15  ;;  %v4151_v19 = vsel %vm2690_vm1, %v4119_v61, %v7479_v35  ;;  %v8271_v61 = vld [vmem:[#allocation109_spill] sm:$0xff] }
 0x298   :  { %v2683_v16 = vsel %vm2657_vm15, %v2647_v10, %v8262_v38  ;;  %v2164_v10 = vrot.slane %v2163_v60, 4  ;;  %v7671_v38 = vrot.slane %v3620_v44, 5  ;;  %v4563_v36 = vcombine.low %v7594_v56, %v7606_v50 }
 0x299   :  { %2555 = vrot.lane.b32.xlu0 %v8255_v57, %s4904_s7  ;;  %v7624_v37 = vpop.permute.xlu1 %3984  ;;  %v4636_v44 = vcombine.low %v7614_v63, %v7622_v46  ;;  %v2178_v22 = vrot.slane %v2176_v58, 5  ;;  %v3630_v35 = vshll.u32 %v7669_v42, 16 }
 0x29b   :  { %v7634_v26 = vpop.permute.xlu0 %3830  ;;  %3885 = vrot.lane.b32.xlu1 %v7523_v3, %s4900_s6  ;;  %v8265_v3 = vld [vmem:[#allocation81_spill] sm:$0xff] }
 0x29c   :  { %v2716_v30 = vsel %vm2690_vm1, %v2683_v16, %v8265_v3  ;;  %v3626_v16 = vrot.slane %v3624_v29, 4  ;;  %v3617_v29 = vor.u32 %v3616_v13, %v3613_v41  ;;  %v4183_v13 = vsel %vm2723_vm2, %v4151_v19, %v7502_v17 }
 0x29d   :  { %4009 = vrot.lane.b32.xlu0 %v8263_v31, %s4904_s7  ;;  %v2566_v57 = vpop.permute.xlu1 %2565  ;;  %v2749_v7 = vsel %vm2723_vm2, %v2716_v30, %v8267_v49  ;;  %v8268_v31 = vld [vmem:[#allocation101_spill] sm:$0xff]  ;;  %v2169_v30 = vsel %vm5192_vm10, %v2164_v10, %v7636_v15  ;;  %v4100_v49 = vsel %vm2608_vm14, %v8271_v61, %v7555_v28  ;;  %v4215_v58 = vsel %vm2756_vm3, %v4183_v13, %v7525_v4 }
 0x29e   :  { %v2766_v14 = vsel %vm2756_vm3, %v2733_v47, %v8268_v31  ;;  %v2782_v60 = vsel %vm2756_vm3, %v2749_v7, %v8269_v11  ;;  %v3627_v41 = vor.u32 %v3626_v16, %v7671_v38  ;;  %v4135_v15 = vsel %vm2657_vm15, %v4100_v49, %v7566_v55 }
 0x29f   :  { %v7661_v32 = vpop.permute.xlu0 %3865  ;;  %3920 = vrot.lane.b32.xlu1 %v7561_v48, %s4901_s20  ;;  %v2799_v3 = vsel %vm2789_vm4, %v2766_v14, %v7542_v62  ;;  %v2174_v62 = vrot.slane %v2173_v6, 4  ;;  %v2815_v10 = vsel %vm2789_vm4, %v2782_v60, %v7610_v51  ;;  %v3618_v16 = vrot.slane %v3617_v29, 4 }
 0x2a0   :  { %v2832_v7 = vsel %vm2822_vm5, %v2799_v3, %v7568_v34  ;;  %v8272_v34 = vld [vmem:[#allocation82_spill] sm:$0xff]  ;;  %v2848_v55 = vsel %vm2822_vm5, %v2815_v10, %v2566_v57  ;;  %v4247_v51 = vsel %vm2789_vm4, %v4215_v58, %v7557_v27  ;;  %v3632_v31 = vrot.slane %v3630_v35, 5 }
 0x2a1   :  { %2590 = vrot.lane.b32.xlu0 %v8270_v23, %s4905_s12  ;;  %v4020_v48 = vpop.permute.xlu1 %4019  ;;  %v2865_v28 = vsel %vm2855_vm6, %v2832_v7, %v7590_v1  ;;  %v4279_v4 = vsel %vm2822_vm5, %v4247_v51, %v7580_v45  ;;  %v2179_v27 = vsel %vm5192_vm10, %v2174_v62, %v2178_v22  ;;  %v2185_v60 = vrot.slane %v7606_v50, 5 }
 0x2a2   :  { %v4311_v11 = vsel %vm2855_vm6, %v4279_v4, %v7600_v40  ;;  %v3623_v40 = vsel %vm5192_vm10, %v3618_v16, %v7671_v38  ;;  %v4511_v3 = vrot.slane %v7594_v56, 9  ;;  %v2188_v22 = vrot.slane %v7644_v43, 5 }
 0x2a3   :  { %v7690_v47 = vpop.permute.xlu0 %3900  ;;  %3955 = vrot.lane.b32.xlu1 %v7584_v33, %s4902_s10  ;;  %v4167_v33 = vsel %vm2690_vm1, %v4135_v15, %v7578_v25  ;;  %v4342_v29 = vsel %vm2888_vm7, %v4311_v11, 0  ;;  %v4584_v38 = vrot.slane %v7614_v63, 9  ;;  %v3642_v7 = vrot.slane %v7669_v42, 5  ;;  %s4906_s10 = smov [#allocation4]  }
 0x2a4   :  { %v4199_v17 = vsel %vm2723_vm2, %v4167_v33, %v7588_v12  ;;  %v2900_v12 = vsel %vm2888_vm7, %v2865_v28, 0  ;;  %v2186_v49 = vsel %vm5181_vm8, %v4511_v3, %v2185_v60  ;;  %v1516_v28 = vld [vmem:[%s7966_s3] sm:$0xff]  ;;  %v4079_v51 = vsel %vm2608_vm14, %v6892_v9, %v7612_v18  ;;  %v8281_v3 = vld [vmem:[#allocation110_spill] sm:$0xff] }
 0x2a5   :  { %4044 = vrot.lane.b32.xlu0 %v8272_v34, %s4905_s12  ;;  %v2601_v6 = vpop.permute.xlu1 %2600  ;;  %v4231_v25 = vsel %vm2756_vm3, %v4199_v17, %v7598_v52  ;;  %v3628_v52 = vrot.slane %v3627_v41, 4  ;;  %v8278_v18 = vld [vmem:[#allocation77_spill] sm:$0xff] }
 0x2a6   :  { %v2881_v1 = vsel %vm2855_vm6, %v2848_v55, %v2601_v6  ;;  %v4263_v57 = vsel %vm2789_vm4, %v4231_v25, %v7624_v37  ;;  %v4564_v37 = vcombine.low %v2169_v30, %v2179_v27 }
 0x2a7   :  { %v7721_v14 = vpop.permute.xlu0 %3935  ;;  %2536 = vrot.lane.b32.xlu1 %v4563_v36, %s4903_s19  ;;  %4744 = vmatprep.subr.msk.bf16.mxu0 %vm2888_vm7, %v2881_v1  ;;  %v4295_v45 = vsel %vm2822_vm5, %v4263_v57, %v4020_v48  ;;  %v3633_v50 = vsel %vm5192_vm10, %v3628_v52, %v3632_v31  ;;  %v2187_v48 = vrot.slane %v2185_v60, 4  ;;  %v8273_v1 = vld [vmem:[#allocation55_spill] sm:$0xff]  ;;  %v8274_v31 = vld [vmem:[#allocation33_spill] sm:$0xff]  ;;  %v4121_v57 = vsel %vm2657_vm15, %v4079_v51, %v7634_v26  ;;  %v8276_v52 = vld [vmem:[#allocation64_spill] sm:$0xff] }
 0x2a8   :  { %4713 = vmatpush3.bf16.xpose.msra.mxu0 %v2900_v12  ;;  %v4637_v30 = vcombine.low %v3623_v40, %v3633_v50  ;;  %v2626_v25 = vsel %vm2608_vm14, %v8274_v31, %v8273_v1  ;;  %v8275_v12 = vld [vmem:[#allocation69_spill] sm:$0xff]  ;;  %v2650_v60 = vsel %vm2608_vm14, %v8200_v39, %v8276_v52  ;;  %v4153_v50 = vsel %vm2690_vm1, %v4121_v57, %v7661_v32 }
 0x2a9   :  { %v4055_v23 = vpop.permute.xlu1 %4054  ;;  %v2189_v56 = vsel %vm5181_vm8, %v2187_v48, %v2188_v22  ;;  %2970 = vperm.xlu0 %4831, %v1516_v28   ;;  %v2669_v27 = vsel %vm2657_vm15, %v2626_v25, %v8275_v12  ;;  %v8282_v39 = vld [vmem:[#allocation105_spill] sm:$0xff]  ;;  %v4185_v32 = vsel %vm2723_vm2, %v4153_v50, %v7690_v47 }
 0x2aa   :  { %v4327_v19 = vsel %vm2855_vm6, %v4295_v45, %v4055_v23  ;;  %v4565_v41 = vcombine.low %v2186_v49, %v2189_v56  ;;  %v8277_v45 = vld [vmem:[#allocation86_spill] sm:$0xff]  ;;  %v2685_v23 = vsel %vm2657_vm15, %v2650_v60, %v8278_v18  ;;  %v8283_v49 = vld [vmem:[#allocation113_spill] sm:$0xff] }
 0x2ab   :  { %v2517_v36 = vpop.permute.xlu0 %2516  ;;  %3990 = vrot.lane.b32.xlu1 %v4636_v44, %s4903_s19  ;;  %4752 = vmatprep.subr.msk.bf16.mxu1 %vm2888_vm7, %v4327_v19  ;;  %v3639_v44 = vrot.slane %v7622_v46, 5  ;;  %v7760_v46 = vld [vmem:[%s7965_s2] sm:$0xf]  ;;  %v2702_v9 = vsel %vm2690_vm1, %v2669_v27, %v8277_v45  ;;  %v8279_v19 = vld [vmem:[#allocation99_spill] sm:$0xff]  ;;  %s4419_s19 = sshll.u32 %s4906_s10, 4  ;;  %s4420_s19 = int_to_ptr.vmem [resolvable:$true] %s4419_s19 }
 0x2ac   :  { %4731 = vmatpush3.bf16.xpose.msra.mxu1 %v4342_v29  ;;  %4720 = vmatprep.mubr.msk.bf16.mxu0 %vm2888_vm7, %v7760_v46  ;;  %v2735_v29 = vsel %vm2723_vm2, %v2702_v9, %v8279_v19  ;;  %v8284_v19 = vld [vmem:[#allocation51_spill] sm:$0xff]  ;;  %p4878_p1 = scmp.lt.s32.totalorder %s4420_s19, %s4420_s19 }
 0x2ad   :  { %v3767_v35 = vpop.permute.xlu1 %3766  ;;  %v3641_v54 = vrot.slane %v3639_v44, 4  ;;  %4738 = vmatprep.mubr.msk.bf16.mxu1 %vm2888_vm7, %v7760_v46  ;;  %v3640_v63 = vsel %vm5181_vm8, %v4584_v38, %v3639_v44  ;;  %v2768_v26 = vsel %vm2756_vm3, %v2735_v29, %v8281_v3  ;;  %v8285_v29 = vld [vmem:[#allocation42_spill] sm:$0xff]  ;;  %v8286_v3 = vld [vmem:[#allocation60_spill] sm:$0xff] }
 0x2ae   :  { %v2801_v44 = vsel %vm2789_vm4, %v2768_v26, %v2517_v36  ;;  %v4103_v38 = vsel %vm2608_vm14, %v7005_v2, %v3767_v35 }
 0x2af   :  { %v3971_v61 = vpop.permute.xlu0 %3970  ;;  %2571 = vrot.lane.b32.xlu1 %v4564_v37, %s4904_s7  ;;  %v3643_v42 = vsel %vm5181_vm8, %v3641_v54, %v3642_v7  ;;  %v8280_v37 = vld [vmem:[#allocation92_spill] sm:$0xff] }
 0x2b0   :  { %v4638_v10 = vcombine.low %v3640_v63, %v3643_v42  ;;  %v2718_v40 = vsel %vm2690_vm1, %v2685_v23, %v8280_v37  ;;  %v4217_v42 = vsel %vm2756_vm3, %v4185_v32, %v7721_v14  ;;  %v2629_v37 = vsel %vm2608_vm14, %v8285_v29, %v8284_v19 }
 0x2b1   :  { %v3847_v43 = vpop.permute.xlu1 %3846  ;;  %v2751_v22 = vsel %vm2723_vm2, %v2718_v40, %v8282_v39  ;;  %v4249_v35 = vsel %vm2789_vm4, %v4217_v42, %v3971_v61  ;;  %v2671_v26 = vsel %vm2657_vm15, %v2629_v37, %v8286_v3 }
 0x2b2   :  { %v2784_v56 = vsel %vm2756_vm3, %v2751_v22, %v8283_v49  ;;  %v4137_v7 = vsel %vm2657_vm15, %v4103_v38, %v3847_v43  ;;  %v8288_v22 = vld [vmem:[#allocation75_spill] sm:$0xff]  ;;  %v8291_v38 = vld [vmem:[#allocation84_spill] sm:$0xff] }
 0x2b3   :  { %v2552_v62 = vpop.permute.xlu0 %2551  ;;  %4025 = vrot.lane.b32.xlu1 %v4637_v30, %s4904_s7  ;;  %v8290_v49 = vld [vmem:[#allocation91_spill] sm:$0xff] }
 0x2b4   :  { %v2834_v54 = vsel %vm2822_vm5, %v2801_v44, %v2552_v62  ;;  %v2704_v44 = vsel %vm2690_vm1, %v2671_v26, %v8288_v22  ;;  %v8296_v22 = vld [vmem:[#allocation70_spill] sm:$0xff] }
 0x2b5   :  { %v3882_v15 = vpop.permute.xlu1 %3881 }
 0x2b6   :  { %v4169_v36 = vsel %vm2690_vm1, %v4137_v7, %v3882_v15  ;;  %v8292_v7 = vld [vmem:[#allocation104_spill] sm:$0xff] }
 0x2b7   :  { %v4006_v13 = vpop.permute.xlu0 %4005  ;;  %2606 = vrot.lane.b32.xlu1 %v4565_v41, %s4905_s12 }
 0x2b9   :  { %v3917_v34 = vpop.permute.xlu1 %3916 }
 0x2ba   :  { %v4201_v2 = vsel %vm2723_vm2, %v4169_v36, %v3917_v34 }
 0x2bb   :  { %v2587_v33 = vpop.permute.xlu0 %2586  ;;  %4060 = vrot.lane.b32.xlu1 %v4638_v10, %s4905_s12 }
 0x2bc   :  { %v2867_v63 = vsel %vm2855_vm6, %v2834_v54, %v2587_v33 }
 0x2bd   :  { %v3952_v58 = vpop.permute.xlu1 %3951  ;;  %v2902_v15 = vsel %vm2888_vm7, %v2867_v63, 0  ;;  %v8293_v63 = vld [vmem:[#allocation98_spill] sm:$0xff] }
 0x2be   :  { %v4233_v47 = vsel %vm2756_vm3, %v4201_v2, %v3952_v58 }
 0x2bf   :  { %v4041_v55 = vpop.permute.xlu0 %4040 }
 0x2c1   :  { %v2533_v6 = vpop.permute.xlu1 %2532 }
 0x2c2   :  { %v2817_v41 = vsel %vm2789_vm4, %v2784_v56, %v2533_v6  ;;  %v4281_v6 = vsel %vm2822_vm5, %v4249_v35, %v4006_v13  ;;  %v2737_v56 = vsel %vm2723_vm2, %v2704_v44, %v8290_v49 }
 0x2c3   :  { %v7776_v16 = vpop.permute.xlu0 %3752  ;;  %v4313_v33 = vsel %vm2855_vm6, %v4281_v6, %v4041_v55  ;;  %v2770_v32 = vsel %vm2756_vm3, %v2737_v56, %v8292_v7  ;;  %v8298_v56 = vld [vmem:[#allocation87_spill] sm:$0xff]  ;;  %v8299_v7 = vld [vmem:[#allocation78_spill] sm:$0xff] }
 0x2c4   :  { %v4344_v58 = vsel %vm2888_vm7, %v4313_v33, 0  ;;  %v4082_v18 = vsel %vm2608_vm14, %v7086_v8, %v7776_v16  ;;  %v8289_v8 = vld [vmem:[#allocation68_spill] sm:$0xff] }
 0x2c5   :  { %v3987_v21 = vpop.permute.xlu1 %3986 }
 0x2c6   :  { %v4265_v14 = vsel %vm2789_vm4, %v4233_v47, %v3987_v21 }
 0x2c7   :  { %v7778_v17 = vpop.permute.xlu0 %3832 }
 0x2c8   :  { %v4123_v50 = vsel %vm2657_vm15, %v4082_v18, %v7778_v17 }
 0x2c9   :  { %v2568_v4 = vpop.permute.xlu1 %2567 }
 0x2ca   :  { %v2850_v10 = vsel %vm2822_vm5, %v2817_v41, %v2568_v4 }
 0x2cb   :  { %v7790_v11 = vpop.permute.xlu0 %3867 }
 0x2cc   :  { %v4155_v17 = vsel %vm2690_vm1, %v4123_v50, %v7790_v11  ;;  %v8295_v50 = vld [vmem:[#allocation57_spill] sm:$0xff] }
 0x2cd   :  { %v4022_v48 = vpop.permute.xlu1 %4021 }
 0x2ce   :  { %v4297_v34 = vsel %vm2822_vm5, %v4265_v14, %v4022_v48  ;;  %v8287_v48 = vld [vmem:[#allocation58_spill] sm:$0xff] }
 0x2cf   :  { %v7810_v30 = vpop.permute.xlu0 %3902  ;;  %v2653_v39 = vsel %vm2608_vm14, %v8210_v53, %v8287_v48  ;;  %v2632_v48 = vsel %vm2608_vm14, %v8217_v24, %v8295_v50 }
 0x2d0   :  { %v2687_v16 = vsel %vm2657_vm15, %v2653_v39, %v8289_v8  ;;  %v4187_v11 = vsel %vm2723_vm2, %v4155_v17, %v7810_v30  ;;  %v2673_v44 = vsel %vm2657_vm15, %v2632_v48, %v8296_v22 }
 0x2d1   :  { %v2603_v28 = vpop.permute.xlu1 %2602  ;;  %v2720_v54 = vsel %vm2690_vm1, %v2687_v16, %v8291_v38  ;;  %v8297_v16 = vld [vmem:[#allocation66_spill] sm:$0xff]  ;;  %v2706_v38 = vsel %vm2690_vm1, %v2673_v44, %v8298_v56 }
 0x2d2   :  { %v2883_v43 = vsel %vm2855_vm6, %v2850_v10, %v2603_v28  ;;  %v2753_v36 = vsel %vm2723_vm2, %v2720_v54, %v8293_v63  ;;  %v8294_v10 = vld [vmem:[#allocation108_spill] sm:$0xff]  ;;  %v2656_v49 = vsel %vm2608_vm14, %v8229_v0, %v8297_v16  ;;  %v8303_v0 = vld [vmem:[#allocation19_spill] sm:$0xff] }
 0x2d3   :  { %v3938_v62 = vpop.permute.xlu0 %3937  ;;  %4745 = vmatprep.subr.msk.bf16.mxu0 %vm2888_vm7, %v2883_v43  ;;  %v2786_v28 = vsel %vm2756_vm3, %v2753_v36, %v8294_v10 }
 0x2d4   :  { %4715 = vmatpush3.bf16.xpose.msra.mxu0 %v2902_v15  ;;  %v4219_v14 = vsel %vm2756_vm3, %v4187_v11, %v3938_v62 }
 0x2d5   :  { %v4057_v51 = vpop.permute.xlu1 %4056 }
 0x2d6   :  { %v4329_v61 = vsel %vm2855_vm6, %v4297_v34, %v4057_v51 }
 0x2d7   :  { %v2519_v1 = vpop.permute.xlu0 %2518  ;;  %4753 = vmatprep.subr.msk.bf16.mxu1 %vm2888_vm7, %v4329_v61 }
 0x2d8   :  { %4733 = vmatpush3.bf16.xpose.msra.mxu1 %v4344_v58  ;;  %v2803_v42 = vsel %vm2789_vm4, %v2770_v32, %v2519_v1  ;;  %v8301_v32 = vld [vmem:[#allocation94_spill] sm:$0xff] }
 0x2d9   :  { %v3769_v13 = vpop.permute.xlu1 %3768 }
 0x2da   :  { %v4106_v2 = vsel %vm2608_vm14, %v7188_v59, %v3769_v13 }
 0x2db   :  { %v3973_v31 = vpop.permute.xlu0 %3972 }
 0x2dc   :  { %v4251_v51 = vsel %vm2789_vm4, %v4219_v14, %v3973_v31 }
 0x2dd   :  { %v3849_v25 = vpop.permute.xlu1 %3848 }
 0x2de   :  { %v4139_v43 = vsel %vm2657_vm15, %v4106_v2, %v3849_v25 }
 0x2df   :  { %v2554_v4 = vpop.permute.xlu0 %2553 }
 0x2e0   :  { %v2836_v35 = vsel %vm2822_vm5, %v2803_v42, %v2554_v4 }
 0x2e1   :  { %v3884_v12 = vpop.permute.xlu1 %3883 }
 0x2e2   :  { %v4171_v15 = vsel %vm2690_vm1, %v4139_v43, %v3884_v12 }
 0x2e3   :  { %v4008_v21 = vpop.permute.xlu0 %4007 }
 0x2e4   :  { %v4283_v30 = vsel %vm2822_vm5, %v4251_v51, %v4008_v21 }
 0x2e5   :  { %v3919_v27 = vpop.permute.xlu1 %3918 }
 0x2e6   :  { %v4203_v59 = vsel %vm2723_vm2, %v4171_v15, %v3919_v27 }
 0x2e7   :  { %v2589_v55 = vpop.permute.xlu0 %2588 }
 0x2e8   :  { %v2869_v6 = vsel %vm2855_vm6, %v2836_v35, %v2589_v55 }
 0x2e9   :  { %v3954_v57 = vpop.permute.xlu1 %3953  ;;  %v2904_v58 = vsel %vm2888_vm7, %v2869_v6, 0 }
 0x2ea   :  { %v4235_v1 = vsel %vm2756_vm3, %v4203_v59, %v3954_v57 }
 0x2eb   :  { %v4043_v52 = vpop.permute.xlu0 %4042 }
 0x2ec   :  { %v4315_v25 = vsel %vm2855_vm6, %v4283_v30, %v4043_v52 }
 0x2ed   :  { %v2535_v60 = vpop.permute.xlu1 %2534  ;;  %v4346_v27 = vsel %vm2888_vm7, %v4315_v25, 0 }
 0x2ee   :  { %v2819_v47 = vsel %vm2789_vm4, %v2786_v28, %v2535_v60  ;;  %v8304_v28 = vld [vmem:[#allocation115_spill] sm:$0xff] }
 0x2ef   :  { %v3755_v45 = vpop.permute.xlu0 %3754 }
 0x2f0   :  { %v4085_v26 = vsel %vm2608_vm14, %v7288_v5, %v3755_v45  ;;  %v2689_v5 = vsel %vm2657_vm15, %v2656_v49, %v8299_v7  ;;  %v8300_v45 = vld [vmem:[#allocation9_spill] sm:$0xff] }
 0x2f1   :  { %v3989_v9 = vpop.permute.xlu1 %3988  ;;  %v2739_v24 = vsel %vm2723_vm2, %v2706_v38, %v8300_v45  ;;  %v2722_v17 = vsel %vm2690_vm1, %v2689_v5, %v8301_v32 }
 0x2f2   :  { %v4267_v62 = vsel %vm2789_vm4, %v4235_v1, %v3989_v9  ;;  %v2755_v42 = vsel %vm2723_vm2, %v2722_v17, %v8303_v0 }
 0x2f3   :  { %v3835_v23 = vpop.permute.xlu0 %3834  ;;  %v2788_v2 = vsel %vm2756_vm3, %v2755_v42, %v8304_v28 }
 0x2f4   :  { %v4125_v8 = vsel %vm2657_vm15, %v4085_v26, %v3835_v23 }
 0x2f5   :  { %v2570_v40 = vpop.permute.xlu1 %2569 }
 0x2f6   :  { %v2852_v33 = vsel %vm2822_vm5, %v2819_v47, %v2570_v40 }
 0x2f7   :  { %v3870_v53 = vpop.permute.xlu0 %3869 }
 0x2f8   :  { %v4157_v63 = vsel %vm2690_vm1, %v4125_v8, %v3870_v53 }
 0x2f9   :  { %v4024_v41 = vpop.permute.xlu1 %4023 }
 0x2fa   :  { %v4299_v4 = vsel %vm2822_vm5, %v4267_v62, %v4024_v41  ;;  %v8302_v41 = vld [vmem:[#allocation111_spill] sm:$0xff] }
 0x2fb   :  { %v3905_v13 = vpop.permute.xlu0 %3904  ;;  %v2772_v23 = vsel %vm2756_vm3, %v2739_v24, %v8302_v41 }
 0x2fc   :  { %v4189_v47 = vsel %vm2723_vm2, %v4157_v63, %v3905_v13 }
 0x2fd   :  { %v2605_v34 = vpop.permute.xlu1 %2604 }
 0x2fe   :  { %v2885_v61 = vsel %vm2855_vm6, %v2852_v33, %v2605_v34 }
 0x2ff   :  { %4746 = vmatprep.subr.msk.bf16.mxu0 %vm2888_vm7, %v2885_v61  ;;  %v3940_v55 = vpop.permute.xlu0 %3939 }
 0x300   :  { %4717 = vmatpush3.bf16.xpose.msra.mxu0 %v2904_v58  ;;  %v4221_v14 = vsel %vm2756_vm3, %v4189_v47, %v3940_v55 }
 0x301   :  { %v4059_v12 = vpop.permute.xlu1 %4058 }
 0x302   :  { %v4331_v31 = vsel %vm2855_vm6, %v4299_v4, %v4059_v12 }
 0x303   :  { %4754 = vmatprep.subr.msk.bf16.mxu1 %vm2888_vm7, %v4331_v31  ;;  %v2521_v60 = vpop.permute.xlu0 %2520 }
 0x304   :  { %4735 = vmatpush3.bf16.xpose.msra.mxu1 %v4346_v27  ;;  %v2805_v10 = vsel %vm2789_vm4, %v2772_v23, %v2521_v60  ;;  %v2965_v27 = vstv %s7963_s0  ;;  %s4873_s0 = scalar_lea.vmem %s4420_s19, 512 }
 0x305   :  { %v3771_v21 = vpop.permute.xlu1 %3770  ;;  %p4874_p0 = scmp.ne.s32.totalorder %s4420_s19, %s4873_s0  ;;  %p4879_p2 = scmp.lt.s32.totalorder %s4873_s0, %s4873_s0 }
 0x306   :  { %v4109_v35 = vsel %vm2608_vm14, %v7386_v20, %v3771_v21 }
 0x307   :  { %v3975_v9 = vpop.permute.xlu0 %3974  ;;  %p4880_p3 = por %p4879_p2, %p4878_p1 }
 0x308   :  { %v4253_v51 = vsel %vm2789_vm4, %v4221_v14, %v3975_v9 }
 0x309   :  { %v3851_v57 = vpop.permute.xlu1 %3850  ;;  %p4881_p4 = pnand %p4880_p3, %p4874_p0 }
 0x30a   :  { %v4141_v11 = vsel %vm2657_vm15, %v4109_v35, %v3851_v57 }
 0x30b   :  { %v2556_v52 = vpop.permute.xlu0 %2555 }
 0x30c   :  { %v2838_v43 = vsel %vm2822_vm5, %v2805_v10, %v2556_v52 }
 0x30d   :  { %v3886_v18 = vpop.permute.xlu1 %3885 }
 0x30e   :  { %v4173_v15 = vsel %vm2690_vm1, %v4141_v11, %v3886_v18 }
 0x30f   :  { %v4010_v3 = vpop.permute.xlu0 %4009 }
 0x310   :  { %v4285_v30 = vsel %vm2822_vm5, %v4253_v51, %v4010_v3 }
 0x311   :  { %v3921_v19 = vpop.permute.xlu1 %3920 }
 0x312   :  { %v4205_v20 = vsel %vm2723_vm2, %v4173_v15, %v3921_v19 }
 0x313   :  { %v2591_v54 = vpop.permute.xlu0 %2590 }
 0x314   :  { %v2871_v6 = vsel %vm2855_vm6, %v2838_v43, %v2591_v54 }
 0x315   :  { %v3956_v29 = vpop.permute.xlu1 %3955  ;;  %v2906_v58 = vsel %vm2888_vm7, %v2871_v6, 0 }
 0x316   :  { %v4237_v1 = vsel %vm2756_vm3, %v4205_v20, %v3956_v29 }
 0x317   :  { %v4045_v34 = vpop.permute.xlu0 %4044 }
 0x318   :  { %v4317_v62 = vsel %vm2855_vm6, %v4285_v30, %v4045_v34 }
 0x319   :  { %v2537_v37 = vpop.permute.xlu1 %2536  ;;  %v4348_v31 = vsel %vm2888_vm7, %v4317_v62, 0 }
 0x31a   :  { %v2821_v53 = vsel %vm2789_vm4, %v2788_v2, %v2537_v37 }
 0x31d   :  { %v3991_v40 = vpop.permute.xlu1 %3990 }
 0x31e   :  { %v4269_v13 = vsel %vm2789_vm4, %v4237_v1, %v3991_v40 }
 0x321   :  { %v2572_v39 = vpop.permute.xlu1 %2571 }
 0x322   :  { %v2854_v33 = vsel %vm2822_vm5, %v2821_v53, %v2572_v39 }
 0x325   :  { %v4026_v36 = vpop.permute.xlu1 %4025 }
 0x326   :  { %v4301_v25 = vsel %vm2822_vm5, %v4269_v13, %v4026_v36 }
 0x328   :  { %v2971_v55 = vpop.permute.xlu0 %2970 }
 0x329   :  { %v2607_v59 = vpop.permute.xlu1 %2606 }
 0x32a   :  { %v2887_v61 = vsel %vm2855_vm6, %v2854_v33, %v2607_v59 }
 0x32b   :  { %4747 = vmatprep.subr.msk.bf16.mxu0 %vm2888_vm7, %v2887_v61 }
 0x32c   :  { %4719 = vmatpush3.bf16.xpose.msra.mxu0 %v2906_v58 }
 0x32d   :  { %v4061_v4 = vpop.permute.xlu1 %4060 }
 0x32e   :  { %v4333_v12 = vsel %vm2855_vm6, %v4301_v25, %v4061_v4 }
 0x32f   :  { %4755 = vmatprep.subr.msk.bf16.mxu1 %vm2888_vm7, %v4333_v12 }
 0x330   :  { %4737 = vmatpush3.bf16.xpose.msra.mxu1 %v4348_v31 }
 0x333   :  { %4721 = vmatmul.mubr.msk.bf16.vlgmr.msra.gmra.mrb[0].mxu0 %vm2888_vm7, %v7760_v46 }
 0x337   :  { %4739 = vmatmul.mubr.msk.bf16.vlgmr.msra.gmra.mrb[0].mxu1 %vm2888_vm7, %v7760_v46 }
 0x406   :  { %v2958_v21 = vpop.f32.mrb[0].mxu0 }
 0x407   :  { %v2966_v57 = vmul.f32 %v2965_v27, %v2958_v21  ;;  %v2960_v60 = vpop.f32.mrb[1].mxu0 }
 0x408   :  { %v2967_v18 = vmul.f32 %v2965_v27, %v2960_v60  ;;  %v2962_v19 = vpop.f32.mrb[2].mxu0 }
 0x409   :  { %v2963_v9 = vpop.f32.mrb[3].mxu0  ;;  %v2973_v29 = vadd.f32 %v2971_v55, %v2966_v57 }
 0x40a   :  { %v4400_v52 = vpop.f32.mrb[0].mxu1  ;;  %v2974_v37 = vadd.f32 %v2971_v55, %v2967_v18 }
 0x40b   :  { %v4407_v40 = vmul.f32 %v4400_v52, %v2965_v27  ;;  %v4402_v3 = vpop.f32.mrb[1].mxu1  ;;  %2975 = vst [vmem:[#allocation4] sm:$0xff] %v2973_v29 }
 0x40c   :  { %v4408_v46 = vmul.f32 %v4402_v3, %v2965_v27  ;;  %v4404_v26 = vpop.f32.mrb[2].mxu1  ;;  %2976 = vst [vmem:[#allocation4 + $0x8] sm:$0xff] %v2974_v37 }
 0x40d   :  { %v4409_v50 = vadd.f32 %v4407_v40, %v2971_v55  ;;  %v4405_v48 = vpop.f32.mrb[3].mxu1 }
 0x40e   :  { %v4410_v39 = vadd.f32 %v4408_v46, %v2971_v55 }
 0x40f   :  { %4412 = vst [vmem:[#allocation4 + $0x10] sm:$0xff] %v4409_v50 }
 0x410   :  { %4413 = vst [vmem:[#allocation4 + $0x18] sm:$0xff] %v4410_v39 }
 0x411   :  { %4884 = shalt.err (!%p4881_p4)
}
 0x412   :  { %s4885_s15 = scalar_lea.hbm %s7967_s4, 512 }
 0x413   :  { %p4886_p5 = scmp.ne.s32.totalorder %s7967_s4, %s4885_s15  ;;  %p4889_p6 = scmp.lt.u32.totalorder %s4885_s15, %s7967_s4 }
 0x415   :  { %p4891_p7 = pnand %p4889_p6, %p4886_p5 }
 0x417   :  { %4894 = shalt.err (!%p4891_p7)
}
 0x418   :  { %s4907_s22 = smov 256  }
 0x419   :  { %4425 = dma.vmem_to_hbm [thread:$0]  %s4420_s19, 512, %s7967_s4, [#allocation5], %s4907_s22, %s4907_s22, %s4901_s20  }
 0x41a   :  { %4895 = dma.done.wait [#allocation5], 512  }
 0x41b   :  { %4896 = vsyncadd [#allocation5], 4294966784 }
 0x41c   :  { %4429 = vsyncpa [#allocation5], 1 }

</bundles_post_ra>
